<compile_context>
chip_gen: v7x
topology: tpu7x:2x2x1
jax: 0.10.0
libtpu: 0.0.40
codegen_flags: <defaults>
</compile_context>

<pallas_src>
import functools

import jax
import jax.numpy as jnp
import numpy as np
from jax.experimental import pallas as pl
from jax.experimental.pallas import tpu as pltpu

EPS = 1e-5  # nn.GroupNorm default eps


# --------------------------------------------------------------------------
# In-kernel helpers
# --------------------------------------------------------------------------
def _group_combine(s, *, groups, cpg):
    """Replace each channel (lane) of s:(T, C) with the sum over its GN group.

    Channels of a group are adjacent.  cpg==1 -> identity (skip entirely);
    cpg==2 -> lane roll-add (VPU/XLU, no MXU); larger cpg -> tiny block-diagonal
    indicator matmul fallback (not exercised by this module's config).
    """
    if cpg == 1:
        return s
    if cpg == 2:
        nxt = jnp.roll(s, -1, axis=-1)   # nxt[i] = s[i+1]
        prv = jnp.roll(s, 1, axis=-1)    # prv[i] = s[i-1]
        lane = jax.lax.broadcasted_iota(jnp.int32, s.shape, s.ndim - 1)
        return jnp.where(lane % 2 == 0, s + nxt, s + prv)
    c = s.shape[-1]
    gi = jax.lax.broadcasted_iota(jnp.int32, (c, c), 0) // cpg
    gj = jax.lax.broadcasted_iota(jnp.int32, (c, c), 1) // cpg
    grp = jnp.where(gi == gj, 1.0, 0.0).astype(s.dtype)
    return jnp.dot(s, grp, preferred_element_type=jnp.float32)


def _sub_block(x, scale, shift, w, b, *, ksize, groups, t, hw):
    """One resnet sub-block: GN(affine=False) + cond affine + SiLU + (k,1,1) conv.

    x     : (T, HW, Cin) f32     scale/shift : (T, Cin) f32
    w     : (k*Cin, Cout) f32    b           : (1, Cout) f32
    returns (T, HW, Cout) f32
    """
    cin = x.shape[-1]
    cout = w.shape[-1]
    cpg = cin // groups
    inv_n = 1.0 / float(cpg * hw)

    # --- GroupNorm stats: reshape/VPU reductions, two-pass variance, f32 ---
    s1 = _group_combine(jnp.sum(x, axis=1), groups=groups, cpg=cpg)        # (T, Cin)
    mean = s1 * inv_n
    xc = x - mean[:, None, :]                                              # sublane bcast
    s2 = _group_combine(jnp.sum(xc * xc, axis=1), groups=groups, cpg=cpg)  # (T, Cin)
    rstd = jax.lax.rsqrt(s2 * inv_n + EPS)

    # --- conditional affine + SiLU, fused chain (no (T*HW,C) broadcasts kept) ---
    a = rstd * (scale + 1.0)                                               # (T, Cin)
    y = xc * a[:, None, :] + shift[:, None, :]
    y = y * jax.nn.sigmoid(y)                                              # SiLU (EUP)

    # --- temporal (k,1,1) conv: fold all taps into ONE matmul ---------------
    rows = t * hw
    if ksize == 1:
        yk = y.reshape(rows, cin)
    else:
        pad = (ksize - 1) // 2
        z = jnp.zeros((pad, hw, cin), y.dtype)                             # zero frames
        yz = jnp.concatenate([z, y, z], axis=0)                            # (T+2p, HW, Cin)
        yk = jnp.concatenate(
            [yz[dt:dt + t].reshape(rows, cin) for dt in range(ksize)], axis=-1)
    out = jnp.dot(yk, w, preferred_element_type=jnp.float32) + b           # (rows, Cout)
    return out.reshape(t, hw, cout)


# --------------------------------------------------------------------------
# Fused kernel: TWO resnet sub-blocks back-to-back (no HBM round trip between)
# --------------------------------------------------------------------------
def _two_block_kernel(x_ref, sc0_ref, sh0_ref, w0_ref, b0_ref,
                      sc1_ref, sh1_ref, w1_ref, b1_ref, o_ref, *,
                      k0, k1, groups, t, hw):
    y = _sub_block(x_ref[0], sc0_ref[0], sh0_ref[0], w0_ref[...], b0_ref[...],
                   ksize=k0, groups=groups, t=t, hw=hw)
    y = _sub_block(y, sc1_ref[0], sh1_ref[0], w1_ref[...], b1_ref[...],
                   ksize=k1, groups=groups, t=t, hw=hw)
    o_ref[0] = y


def fused_two_blocks(x, blk0, blk1, sc0, sh0, sc1, sh1, *, groups):
    """x: (B, T, HW, Cin) f32 -> (B, T, HW, Cout) f32 through two fused sub-blocks."""
    bsz, t, hw, cin = x.shape
    k0, k1 = blk0["ksize"], blk1["ksize"]
    c_mid = blk0["conv_w"].shape[-1]
    cout = blk1["conv_w"].shape[-1]
    w0 = blk0["conv_w"].reshape(k0 * cin, c_mid)      # taps folded along K
    w1 = blk1["conv_w"].reshape(k1 * c_mid, cout)
    kern = functools.partial(_two_block_kernel, k0=k0, k1=k1,
                             groups=groups, t=t, hw=hw)
    # NOTE: Cout < 128 here means lane-masked stores; disappears at production C.
    return pl.pallas_call(
        kern,
        out_shape=jax.ShapeDtypeStruct((bsz, t, hw, cout), jnp.float32),
        grid=(bsz,),
        in_specs=[
            pl.BlockSpec((1, t, hw, cin), lambda i: (i, 0, 0, 0)),
            pl.BlockSpec((1, t, cin), lambda i: (i, 0, 0)),
            pl.BlockSpec((1, t, cin), lambda i: (i, 0, 0)),
            pl.BlockSpec((k0 * cin, c_mid), lambda i: (0, 0)),
            pl.BlockSpec((1, c_mid), lambda i: (0, 0)),
            pl.BlockSpec((1, t, c_mid), lambda i: (i, 0, 0)),
            pl.BlockSpec((1, t, c_mid), lambda i: (i, 0, 0)),
            pl.BlockSpec((k1 * c_mid, cout), lambda i: (0, 0)),
            pl.BlockSpec((1, cout), lambda i: (0, 0)),
        ],
        out_specs=pl.BlockSpec((1, t, hw, cout), lambda i: (i, 0, 0, 0)),
        compiler_params=pltpu.CompilerParams(
            dimension_semantics=("parallel",),
        ),
    )(x, sc0, sh0, w0, blk0["conv_b"].reshape(1, c_mid),
      sc1, sh1, w1, blk1["conv_b"].reshape(1, cout))


# --------------------------------------------------------------------------
# Full TemporalResNetBlock forward
# --------------------------------------------------------------------------
def temporal_resnet_block_forward(x, time_embed, params, num_frames, norm_groups):
    # x: (B*T, C, H, W); time_embed: (B*T, D)
    n, c, h, w = x.shape
    t = num_frames
    b = n // t
    hw = h * w

    # single layout change to channels-last video: (B*T, C, H, W) -> (B, T, HW, C)
    out = x.reshape(b, t, c, hw).transpose(0, 1, 3, 2)

    # context MLP: SiLU(time_embed) @ W + b per block (tiny -> plain JAX / XLA)
    h_te = time_embed * jax.nn.sigmoid(time_embed)
    scale_shift = []
    for blk in params:
        cin = blk["conv_w"].shape[1]
        ctx = h_te @ blk["ctx_w"] + blk["ctx_b"]          # (N, 2*Cin)
        scale_shift.append((ctx[:, :cin].reshape(b, t, cin),
                            ctx[:, cin:].reshape(b, t, cin)))

    # kernel A = blocks 0 (k=1) + 1 (k=3);  kernel B = blocks 2 (k=3) + 3 (k=1)
    mid = fused_two_blocks(out, params[0], params[1],
                           scale_shift[0][0], scale_shift[0][1],
                           scale_shift[1][0], scale_shift[1][1],
                           groups=norm_groups)
    out = fused_two_blocks(mid, params[2], params[3],
                           scale_shift[2][0], scale_shift[2][1],
                           scale_shift[3][0], scale_shift[3][1],
                           groups=norm_groups)

    # back to (B*T, C, H, W) + residual (fused by XLA under jit)
    out = out.transpose(0, 1, 3, 2).reshape(n, c, h, w)
    return x + out


# --------------------------------------------------------------------------
# Pure-JAX f32 reference (mirrors the PyTorch forward)
# --------------------------------------------------------------------------
def reference_forward(x, time_embed, params, num_frames, norm_groups):
    n, c, h, w = x.shape
    t = num_frames
    b = n // t
    out = x
    hh = time_embed * jax.nn.sigmoid(time_embed)
    for blk in params:
        cin = blk["conv_w"].shape[1]
        ctx = hh @ blk["ctx_w"] + blk["ctx_b"]
        scale, shift = ctx[:, :cin], ctx[:, cin:]
        g = norm_groups
        xg = out.reshape(n, g, cin // g, h, w)
        mean = xg.mean(axis=(2, 3, 4), keepdims=True)
        var = xg.var(axis=(2, 3, 4), keepdims=True)
        xn = ((xg - mean) / jnp.sqrt(var + EPS)).reshape(n, cin, h, w)
        y = xn * (scale[:, :, None, None] + 1.0) + shift[:, :, None, None]
        y = y * jax.nn.sigmoid(y)
        yv = y.reshape(b, t, cin, h, w)
        k = blk["ksize"]
        pad = (k - 1) // 2
        yp = jnp.pad(yv, ((0, 0), (pad, pad), (0, 0), (0, 0), (0, 0)))
        wgt = blk["conv_w"]
        cout = wgt.shape[2]
        o = jnp.zeros((b, t, cout, h, w), jnp.float32)
        for dt in range(k):
            o = o + jnp.einsum("btchw,cd->btdhw", yp[:, dt:dt + t], wgt[dt],
                               preferred_element_type=jnp.float32)
        o = o + blk["conv_b"][None, None, :, None, None]
        out = o.reshape(n, cout, h, w)
    return x + out


# --------------------------------------------------------------------------
# Deterministic parameter init (shapes from the module __init__)
# --------------------------------------------------------------------------
def init_params(key, num_channels, time_embed_dim, compression_ratio=2):
    hidden = num_channels // compression_ratio
    chans = [(num_channels, hidden), (hidden, hidden),
             (hidden, hidden), (hidden, num_channels)]
    ksizes = [1, 3, 3, 1]
    params = []
    for (cin, cout), k in zip(chans, ksizes):
        key, k1, k2, k3, k4 = jax.random.split(key, 5)
        params.append(dict(
            ctx_w=jax.random.normal(k1, (time_embed_dim, 2 * cin), jnp.float32)
                  / jnp.sqrt(time_embed_dim),
            ctx_b=0.1 * jax.random.normal(k2, (2 * cin,), jnp.float32),
            # PyTorch Conv3d weight (Cout, Cin, k, 1, 1) stored here as (k, Cin, Cout)
            conv_w=jax.random.normal(k3, (k, cin, cout), jnp.float32)
                   / jnp.sqrt(cin * k),
            conv_b=0.1 * jax.random.normal(k4, (cout,), jnp.float32),
            ksize=k,
        ))
    return params


if __name__ == "__main__":
    # small shapes consistent with the module
    B, T = 2, 4                    # num_frames = 4
    C, H, W = 64, 8, 8             # num_channels = 64 (norm_groups=32 divides 64 and 32)
    D = 32                         # time_embed_dim
    NORM_GROUPS = 32
    N = B * T

    key = jax.random.PRNGKey(0)
    kx, kt, kp = jax.random.split(key, 3)
    x = jax.random.normal(kx, (N, C, H, W), jnp.float32)
    time_embed = jax.random.normal(kt, (N, D), jnp.float32)
    params = init_params(kp, C, D)

    fwd = jax.jit(lambda xx, te: temporal_resnet_block_forward(
        xx, te, params, T, NORM_GROUPS))
    out = jax.block_until_ready(fwd(x, time_embed))

    ref = reference_forward(x, time_embed, params, T, NORM_GROUPS)
    np.testing.assert_allclose(np.asarray(out), np.asarray(ref), rtol=2e-3, atol=2e-3)

    print("KERNEL_OK")
</pallas_src>

<mosaic_0001>
module attributes {stable_mosaic.version = 11 : i64} {
  func.func @_two_block_kernel(%arg0: i32, %arg1: memref<1x4x64x32xf32, #tpu.memory_space<vmem>>, %arg2: memref<1x4x32xf32, #tpu.memory_space<vmem>>, %arg3: memref<1x4x32xf32, #tpu.memory_space<vmem>>, %arg4: memref<96x32xf32, #tpu.memory_space<vmem>>, %arg5: memref<1x32xf32, #tpu.memory_space<vmem>>, %arg6: memref<1x4x32xf32, #tpu.memory_space<vmem>>, %arg7: memref<1x4x32xf32, #tpu.memory_space<vmem>>, %arg8: memref<32x64xf32, #tpu.memory_space<vmem>>, %arg9: memref<1x64xf32, #tpu.memory_space<vmem>>, %arg10: memref<1x4x64x64xf32, #tpu.memory_space<vmem>>) attributes {dimension_semantics = [#tpu.dimension_semantics<parallel>], iteration_bounds = array<i64: 2>, scalar_prefetch = 0 : i64, scratch_operands = 0 : i64, tpu.core_type = #tpu.core_type<tc>, window_params = [{transform_indices = @transform_0, window_bounds = array<i64: 1, 4, 64, 32>}, {transform_indices = @transform_1, window_bounds = array<i64: 1, 4, 32>}, {transform_indices = @transform_2, window_bounds = array<i64: 1, 4, 32>}, {pipeline_mode = #tpu.pipeline_mode<synchronous>, transform_indices = @transform_3, window_bounds = array<i64: 96, 32>}, {pipeline_mode = #tpu.pipeline_mode<synchronous>, transform_indices = @transform_4, window_bounds = array<i64: 1, 32>}, {transform_indices = @transform_5, window_bounds = array<i64: 1, 4, 32>}, {transform_indices = @transform_6, window_bounds = array<i64: 1, 4, 32>}, {pipeline_mode = #tpu.pipeline_mode<synchronous>, transform_indices = @transform_7, window_bounds = array<i64: 32, 64>}, {pipeline_mode = #tpu.pipeline_mode<synchronous>, transform_indices = @transform_8, window_bounds = array<i64: 1, 64>}, {transform_indices = @transform_9, window_bounds = array<i64: 1, 4, 64, 64>}]} {
    %c0 = arith.constant 0 : index
    %c0_0 = arith.constant 0 : index
    %c0_1 = arith.constant 0 : index
    %c0_2 = arith.constant 0 : index
    %0 = vector.load %arg1[%c0, %c0_0, %c0_1, %c0_2] : memref<1x4x64x32xf32, #tpu.memory_space<vmem>>, vector<1x4x64x32xf32>
    %1 = vector.shape_cast %0 : vector<1x4x64x32xf32> to vector<4x64x32xf32>
    %c0_3 = arith.constant 0 : index
    %c0_4 = arith.constant 0 : index
    %c0_5 = arith.constant 0 : index
    %2 = vector.load %arg2[%c0_3, %c0_4, %c0_5] : memref<1x4x32xf32, #tpu.memory_space<vmem>>, vector<1x4x32xf32>
    %3 = vector.shape_cast %2 : vector<1x4x32xf32> to vector<4x32xf32>
    %c0_6 = arith.constant 0 : index
    %c0_7 = arith.constant 0 : index
    %c0_8 = arith.constant 0 : index
    %4 = vector.load %arg3[%c0_6, %c0_7, %c0_8] : memref<1x4x32xf32, #tpu.memory_space<vmem>>, vector<1x4x32xf32>
    %5 = vector.shape_cast %4 : vector<1x4x32xf32> to vector<4x32xf32>
    %c0_9 = arith.constant 0 : index
    %c0_10 = arith.constant 0 : index
    %6 = vector.load %arg4[%c0_9, %c0_10] : memref<96x32xf32, #tpu.memory_space<vmem>>, vector<96x32xf32>
    %c0_11 = arith.constant 0 : index
    %c0_12 = arith.constant 0 : index
    %7 = vector.load %arg5[%c0_11, %c0_12] : memref<1x32xf32, #tpu.memory_space<vmem>>, vector<1x32xf32>
    %cst = arith.constant dense<0.000000e+00> : vector<4x32xf32>
    %8 = vector.multi_reduction <add>, %1, %cst [1] : vector<4x64x32xf32> to vector<4x32xf32>
    %cst_13 = arith.constant 1.562500e-02 : f32
    %9 = vector.broadcast %cst_13 : f32 to vector<4x32xf32>
    %10 = arith.mulf %8, %9 : vector<4x32xf32>
    %11 = vector.shape_cast %10 : vector<4x32xf32> to vector<4x1x32xf32>
    %12 = vector.broadcast %11 : vector<4x1x32xf32> to vector<4x64x32xf32>
    %13 = arith.subf %1, %12 : vector<4x64x32xf32>
    %14 = arith.mulf %13, %13 : vector<4x64x32xf32>
    %cst_14 = arith.constant dense<0.000000e+00> : vector<4x32xf32>
    %15 = vector.multi_reduction <add>, %14, %cst_14 [1] : vector<4x64x32xf32> to vector<4x32xf32>
    %cst_15 = arith.constant 1.562500e-02 : f32
    %16 = vector.broadcast %cst_15 : f32 to vector<4x32xf32>
    %17 = arith.mulf %15, %16 : vector<4x32xf32>
    %cst_16 = arith.constant 9.99999974E-6 : f32
    %18 = vector.broadcast %cst_16 : f32 to vector<4x32xf32>
    %19 = arith.addf %17, %18 : vector<4x32xf32>
    %20 = math.rsqrt %19 : vector<4x32xf32>
    %cst_17 = arith.constant 1.000000e+00 : f32
    %21 = vector.broadcast %cst_17 : f32 to vector<4x32xf32>
    %22 = arith.addf %3, %21 : vector<4x32xf32>
    %23 = arith.mulf %20, %22 : vector<4x32xf32>
    %24 = vector.shape_cast %23 : vector<4x32xf32> to vector<4x1x32xf32>
    %25 = vector.broadcast %24 : vector<4x1x32xf32> to vector<4x64x32xf32>
    %26 = arith.mulf %13, %25 : vector<4x64x32xf32>
    %27 = vector.shape_cast %5 : vector<4x32xf32> to vector<4x1x32xf32>
    %28 = vector.broadcast %27 : vector<4x1x32xf32> to vector<4x64x32xf32>
    %29 = arith.addf %26, %28 : vector<4x64x32xf32>
    %30 = arith.negf %29 : vector<4x64x32xf32>
    %31 = math.exp %30 : vector<4x64x32xf32>
    %cst_18 = arith.constant 1.000000e+00 : f32
    %32 = vector.broadcast %cst_18 : f32 to vector<4x64x32xf32>
    %33 = arith.addf %32, %31 : vector<4x64x32xf32>
    %34 = arith.divf %32, %33 : vector<4x64x32xf32>
    %35 = arith.mulf %29, %34 : vector<4x64x32xf32>
    %cst_19 = arith.constant 0.000000e+00 : f32
    %36 = vector.broadcast %cst_19 : f32 to vector<1x64x32xf32>
    %37 = tpu.concatenate %36, %35, %36 in 0 : vector<1x64x32xf32>, vector<4x64x32xf32>, vector<1x64x32xf32> -> vector<6x64x32xf32>
    %38 = vector.extract_strided_slice %37 {offsets = [0, 0, 0], sizes = [4, 64, 32], strides = [1, 1, 1]} : vector<6x64x32xf32> to vector<4x64x32xf32>
    %39 = vector.shape_cast %38 : vector<4x64x32xf32> to vector<256x32xf32>
    %40 = vector.extract_strided_slice %37 {offsets = [1, 0, 0], sizes = [4, 64, 32], strides = [1, 1, 1]} : vector<6x64x32xf32> to vector<4x64x32xf32>
    %41 = vector.shape_cast %40 : vector<4x64x32xf32> to vector<256x32xf32>
    %42 = vector.extract_strided_slice %37 {offsets = [2, 0, 0], sizes = [4, 64, 32], strides = [1, 1, 1]} : vector<6x64x32xf32> to vector<4x64x32xf32>
    %43 = vector.shape_cast %42 : vector<4x64x32xf32> to vector<256x32xf32>
    %44 = tpu.concatenate %39, %41, %43 in 1 : vector<256x32xf32>, vector<256x32xf32>, vector<256x32xf32> -> vector<256x96xf32>
    %cst_20 = arith.constant dense<0.000000e+00> : vector<256x32xf32>
    %45 = tpu.matmul %44, %6, %cst_20 {dimension_numbers = #tpu.dot_dimension_numbers<[1], [0], [0], [1], [0, 0, 1, 1], [], []>} : vector<256x96xf32>, vector<96x32xf32>, vector<256x32xf32> -> vector<256x32xf32>
    %46 = vector.broadcast %7 : vector<1x32xf32> to vector<256x32xf32>
    %47 = arith.addf %45, %46 : vector<256x32xf32>
    %48 = vector.shape_cast %47 : vector<256x32xf32> to vector<4x64x32xf32>
    %c0_21 = arith.constant 0 : index
    %c0_22 = arith.constant 0 : index
    %c0_23 = arith.constant 0 : index
    %49 = vector.load %arg6[%c0_21, %c0_22, %c0_23] : memref<1x4x32xf32, #tpu.memory_space<vmem>>, vector<1x4x32xf32>
    %50 = vector.shape_cast %49 : vector<1x4x32xf32> to vector<4x32xf32>
    %c0_24 = arith.constant 0 : index
    %c0_25 = arith.constant 0 : index
    %c0_26 = arith.constant 0 : index
    %51 = vector.load %arg7[%c0_24, %c0_25, %c0_26] : memref<1x4x32xf32, #tpu.memory_space<vmem>>, vector<1x4x32xf32>
    %52 = vector.shape_cast %51 : vector<1x4x32xf32> to vector<4x32xf32>
    %c0_27 = arith.constant 0 : index
    %c0_28 = arith.constant 0 : index
    %53 = vector.load %arg8[%c0_27, %c0_28] : memref<32x64xf32, #tpu.memory_space<vmem>>, vector<32x64xf32>
    %c0_29 = arith.constant 0 : index
    %c0_30 = arith.constant 0 : index
    %54 = vector.load %arg9[%c0_29, %c0_30] : memref<1x64xf32, #tpu.memory_space<vmem>>, vector<1x64xf32>
    %cst_31 = arith.constant dense<0.000000e+00> : vector<4x32xf32>
    %55 = vector.multi_reduction <add>, %48, %cst_31 [1] : vector<4x64x32xf32> to vector<4x32xf32>
    %cst_32 = arith.constant 1.562500e-02 : f32
    %56 = vector.broadcast %cst_32 : f32 to vector<4x32xf32>
    %57 = arith.mulf %55, %56 : vector<4x32xf32>
    %58 = vector.shape_cast %57 : vector<4x32xf32> to vector<4x1x32xf32>
    %59 = vector.broadcast %58 : vector<4x1x32xf32> to vector<4x64x32xf32>
    %60 = arith.subf %48, %59 : vector<4x64x32xf32>
    %61 = arith.mulf %60, %60 : vector<4x64x32xf32>
    %cst_33 = arith.constant dense<0.000000e+00> : vector<4x32xf32>
    %62 = vector.multi_reduction <add>, %61, %cst_33 [1] : vector<4x64x32xf32> to vector<4x32xf32>
    %cst_34 = arith.constant 1.562500e-02 : f32
    %63 = vector.broadcast %cst_34 : f32 to vector<4x32xf32>
    %64 = arith.mulf %62, %63 : vector<4x32xf32>
    %cst_35 = arith.constant 9.99999974E-6 : f32
    %65 = vector.broadcast %cst_35 : f32 to vector<4x32xf32>
    %66 = arith.addf %64, %65 : vector<4x32xf32>
    %67 = math.rsqrt %66 : vector<4x32xf32>
    %cst_36 = arith.constant 1.000000e+00 : f32
    %68 = vector.broadcast %cst_36 : f32 to vector<4x32xf32>
    %69 = arith.addf %50, %68 : vector<4x32xf32>
    %70 = arith.mulf %67, %69 : vector<4x32xf32>
    %71 = vector.shape_cast %70 : vector<4x32xf32> to vector<4x1x32xf32>
    %72 = vector.broadcast %71 : vector<4x1x32xf32> to vector<4x64x32xf32>
    %73 = arith.mulf %60, %72 : vector<4x64x32xf32>
    %74 = vector.shape_cast %52 : vector<4x32xf32> to vector<4x1x32xf32>
    %75 = vector.broadcast %74 : vector<4x1x32xf32> to vector<4x64x32xf32>
    %76 = arith.addf %73, %75 : vector<4x64x32xf32>
    %77 = arith.negf %76 : vector<4x64x32xf32>
    %78 = math.exp %77 : vector<4x64x32xf32>
    %cst_37 = arith.constant 1.000000e+00 : f32
    %79 = vector.broadcast %cst_37 : f32 to vector<4x64x32xf32>
    %80 = arith.addf %79, %78 : vector<4x64x32xf32>
    %81 = arith.divf %79, %80 : vector<4x64x32xf32>
    %82 = arith.mulf %76, %81 : vector<4x64x32xf32>
    %83 = vector.shape_cast %82 : vector<4x64x32xf32> to vector<256x32xf32>
    %cst_38 = arith.constant dense<0.000000e+00> : vector<256x64xf32>
    %84 = tpu.matmul %83, %53, %cst_38 {dimension_numbers = #tpu.dot_dimension_numbers<[1], [0], [0], [1], [0, 0, 1, 1], [], []>} : vector<256x32xf32>, vector<32x64xf32>, vector<256x64xf32> -> vector<256x64xf32>
    %85 = vector.broadcast %54 : vector<1x64xf32> to vector<256x64xf32>
    %86 = arith.addf %84, %85 : vector<256x64xf32>
    %87 = vector.shape_cast %86 : vector<256x64xf32> to vector<4x64x64xf32>
    %c0_39 = arith.constant 0 : index
    %c0_40 = arith.constant 0 : index
    %c0_41 = arith.constant 0 : index
    %c0_42 = arith.constant 0 : index
    %88 = vector.load %arg10[%c0_39, %c0_40, %c0_41, %c0_42] : memref<1x4x64x64xf32, #tpu.memory_space<vmem>>, vector<1x4x64x64xf32>
    %89 = vector.shape_cast %88 : vector<1x4x64x64xf32> to vector<4x64x64xf32>
    %90 = vector.shape_cast %87 : vector<4x64x64xf32> to vector<1x4x64x64xf32>
    tpu.vector_store %arg10[%c0_39, %c0_40, %c0_41, %c0_42], %90 {strides = array<i32>} : memref<1x4x64x64xf32, #tpu.memory_space<vmem>>, vector<1x4x64x64xf32>,
    return
  }
  func.func @transform_0(%arg0: i32) -> (i32, i32, i32, i32) {
    %c0_i32 = arith.constant 0 : i32
    %c0_i32_0 = arith.constant 0 : i32
    %c0_i32_1 = arith.constant 0 : i32
    %c0_i32_2 = arith.constant 0 : i32
    return %arg0, %c0_i32, %c0_i32_0, %c0_i32_1 : i32, i32, i32, i32
  }
  func.func @transform_1(%arg0: i32) -> (i32, i32, i32) {
    %c0_i32 = arith.constant 0 : i32
    %c0_i32_0 = arith.constant 0 : i32
    %c0_i32_1 = arith.constant 0 : i32
    return %arg0, %c0_i32, %c0_i32_0 : i32, i32, i32
  }
  func.func @transform_2(%arg0: i32) -> (i32, i32, i32) {
    %c0_i32 = arith.constant 0 : i32
    %c0_i32_0 = arith.constant 0 : i32
    %c0_i32_1 = arith.constant 0 : i32
    return %arg0, %c0_i32, %c0_i32_0 : i32, i32, i32
  }
  func.func @transform_3(%arg0: i32) -> (i32, i32) {
    %c0_i32 = arith.constant 0 : i32
    %c0_i32_0 = arith.constant 0 : i32
    %c0_i32_1 = arith.constant 0 : i32
    return %c0_i32, %c0_i32_0 : i32, i32
  }
  func.func @transform_4(%arg0: i32) -> (i32, i32) {
    %c0_i32 = arith.constant 0 : i32
    %c0_i32_0 = arith.constant 0 : i32
    %c0_i32_1 = arith.constant 0 : i32
    return %c0_i32, %c0_i32_0 : i32, i32
  }
  func.func @transform_5(%arg0: i32) -> (i32, i32, i32) {
    %c0_i32 = arith.constant 0 : i32
    %c0_i32_0 = arith.constant 0 : i32
    %c0_i32_1 = arith.constant 0 : i32
    return %arg0, %c0_i32, %c0_i32_0 : i32, i32, i32
  }
  func.func @transform_6(%arg0: i32) -> (i32, i32, i32) {
    %c0_i32 = arith.constant 0 : i32
    %c0_i32_0 = arith.constant 0 : i32
    %c0_i32_1 = arith.constant 0 : i32
    return %arg0, %c0_i32, %c0_i32_0 : i32, i32, i32
  }
  func.func @transform_7(%arg0: i32) -> (i32, i32) {
    %c0_i32 = arith.constant 0 : i32
    %c0_i32_0 = arith.constant 0 : i32
    %c0_i32_1 = arith.constant 0 : i32
    return %c0_i32, %c0_i32_0 : i32, i32
  }
  func.func @transform_8(%arg0: i32) -> (i32, i32) {
    %c0_i32 = arith.constant 0 : i32
    %c0_i32_0 = arith.constant 0 : i32
    %c0_i32_1 = arith.constant 0 : i32
    return %c0_i32, %c0_i32_0 : i32, i32
  }
  func.func @transform_9(%arg0: i32) -> (i32, i32, i32, i32) {
    %c0_i32 = arith.constant 0 : i32
    %c0_i32_0 = arith.constant 0 : i32
    %c0_i32_1 = arith.constant 0 : i32
    %c0_i32_2 = arith.constant 0 : i32
    return %arg0, %c0_i32, %c0_i32_0, %c0_i32_1 : i32, i32, i32, i32
  }
}

module attributes {stable_mosaic.version = 11 : i64} {
  func.func @_two_block_kernel(%arg0: i32, %arg1: memref<1x4x64x64xf32, #tpu.memory_space<vmem>>, %arg2: memref<1x4x64xf32, #tpu.memory_space<vmem>>, %arg3: memref<1x4x64xf32, #tpu.memory_space<vmem>>, %arg4: memref<64x32xf32, #tpu.memory_space<vmem>>, %arg5: memref<1x32xf32, #tpu.memory_space<vmem>>, %arg6: memref<1x4x32xf32, #tpu.memory_space<vmem>>, %arg7: memref<1x4x32xf32, #tpu.memory_space<vmem>>, %arg8: memref<96x32xf32, #tpu.memory_space<vmem>>, %arg9: memref<1x32xf32, #tpu.memory_space<vmem>>, %arg10: memref<1x4x64x32xf32, #tpu.memory_space<vmem>>) attributes {dimension_semantics = [#tpu.dimension_semantics<parallel>], iteration_bounds = array<i64: 2>, scalar_prefetch = 0 : i64, scratch_operands = 0 : i64, tpu.core_type = #tpu.core_type<tc>, window_params = [{transform_indices = @transform_0, window_bounds = array<i64: 1, 4, 64, 64>}, {transform_indices = @transform_1, window_bounds = array<i64: 1, 4, 64>}, {transform_indices = @transform_2, window_bounds = array<i64: 1, 4, 64>}, {pipeline_mode = #tpu.pipeline_mode<synchronous>, transform_indices = @transform_3, window_bounds = array<i64: 64, 32>}, {pipeline_mode = #tpu.pipeline_mode<synchronous>, transform_indices = @transform_4, window_bounds = array<i64: 1, 32>}, {transform_indices = @transform_5, window_bounds = array<i64: 1, 4, 32>}, {transform_indices = @transform_6, window_bounds = array<i64: 1, 4, 32>}, {pipeline_mode = #tpu.pipeline_mode<synchronous>, transform_indices = @transform_7, window_bounds = array<i64: 96, 32>}, {pipeline_mode = #tpu.pipeline_mode<synchronous>, transform_indices = @transform_8, window_bounds = array<i64: 1, 32>}, {transform_indices = @transform_9, window_bounds = array<i64: 1, 4, 64, 32>}]} {
    %c0 = arith.constant 0 : index
    %c0_0 = arith.constant 0 : index
    %c0_1 = arith.constant 0 : index
    %c0_2 = arith.constant 0 : index
    %0 = vector.load %arg1[%c0, %c0_0, %c0_1, %c0_2] : memref<1x4x64x64xf32, #tpu.memory_space<vmem>>, vector<1x4x64x64xf32>
    %1 = vector.shape_cast %0 : vector<1x4x64x64xf32> to vector<4x64x64xf32>
    %c0_3 = arith.constant 0 : index
    %c0_4 = arith.constant 0 : index
    %c0_5 = arith.constant 0 : index
    %2 = vector.load %arg2[%c0_3, %c0_4, %c0_5] : memref<1x4x64xf32, #tpu.memory_space<vmem>>, vector<1x4x64xf32>
    %3 = vector.shape_cast %2 : vector<1x4x64xf32> to vector<4x64xf32>
    %c0_6 = arith.constant 0 : index
    %c0_7 = arith.constant 0 : index
    %c0_8 = arith.constant 0 : index
    %4 = vector.load %arg3[%c0_6, %c0_7, %c0_8] : memref<1x4x64xf32, #tpu.memory_space<vmem>>, vector<1x4x64xf32>
    %5 = vector.shape_cast %4 : vector<1x4x64xf32> to vector<4x64xf32>
    %c0_9 = arith.constant 0 : index
    %c0_10 = arith.constant 0 : index
    %6 = vector.load %arg4[%c0_9, %c0_10] : memref<64x32xf32, #tpu.memory_space<vmem>>, vector<64x32xf32>
    %c0_11 = arith.constant 0 : index
    %c0_12 = arith.constant 0 : index
    %7 = vector.load %arg5[%c0_11, %c0_12] : memref<1x32xf32, #tpu.memory_space<vmem>>, vector<1x32xf32>
    %cst = arith.constant dense<0.000000e+00> : vector<4x64xf32>
    %8 = vector.multi_reduction <add>, %1, %cst [1] : vector<4x64x64xf32> to vector<4x64xf32>
    %9 = vector.extract_strided_slice %8 {offsets = [0, 1], sizes = [4, 63], strides = [1, 1]} : vector<4x64xf32> to vector<4x63xf32>
    %10 = vector.extract_strided_slice %8 {offsets = [0, 0], sizes = [4, 1], strides = [1, 1]} : vector<4x64xf32> to vector<4x1xf32>
    %11 = tpu.concatenate %9, %10 in 1 : vector<4x63xf32>, vector<4x1xf32> -> vector<4x64xf32>
    %12 = vector.extract_strided_slice %8 {offsets = [0, 63], sizes = [4, 1], strides = [1, 1]} : vector<4x64xf32> to vector<4x1xf32>
    %13 = vector.extract_strided_slice %8 {offsets = [0, 0], sizes = [4, 63], strides = [1, 1]} : vector<4x64xf32> to vector<4x63xf32>
    %14 = tpu.concatenate %12, %13 in 1 : vector<4x1xf32>, vector<4x63xf32> -> vector<4x64xf32>
    %15 = tpu.iota {dimensions = array<i32: 1>} : vector<4x64xi32>
    %c2_i32 = arith.constant 2 : i32
    %c0_i32 = arith.constant 0 : i32
    %16 = arith.cmpi eq, %c2_i32, %c0_i32 : i32
    %c1_i32 = arith.constant 1 : i32
    %17 = arith.select %16, %c1_i32, %c2_i32 : i32
    %18 = vector.broadcast %17 : i32 to vector<4x64xi32>
    %19 = arith.remsi %15, %18 : vector<4x64xi32>
    %c0_i32_13 = arith.constant 0 : i32
    %20 = vector.broadcast %c0_i32_13 : i32 to vector<4x64xi32>
    %21 = arith.cmpi ne, %19, %20 : vector<4x64xi32>
    %c0_i32_14 = arith.constant 0 : i32
    %22 = vector.broadcast %c0_i32_14 : i32 to vector<4x64xi32>
    %23 = arith.cmpi slt, %19, %22 : vector<4x64xi32>
    %c0_i32_15 = arith.constant 0 : i32
    %24 = arith.cmpi slt, %17, %c0_i32_15 : i32
    %25 = vector.broadcast %24 : i1 to vector<4x64xi1>
    %26 = vector.broadcast %25 : vector<4x64xi1> to vector<4x64xi1>
    %27 = arith.xori %23, %26 : vector<4x64xi1>
    %28 = arith.andi %27, %21 : vector<4x64xi1>
    %29 = vector.broadcast %17 : i32 to vector<4x64xi32>
    %30 = arith.addi %19, %29 : vector<4x64xi32>
    %31 = arith.select %28, %30, %19 : vector<4x64xi1>, vector<4x64xi32>
    %c0_i32_16 = arith.constant 0 : i32
    %32 = vector.broadcast %c0_i32_16 : i32 to vector<4x64xi32>
    %33 = arith.cmpi eq, %31, %32 : vector<4x64xi32>
    %34 = arith.addf %8, %11 : vector<4x64xf32>
    %35 = arith.addf %8, %14 : vector<4x64xf32>
    %36 = arith.select %33, %34, %35 : vector<4x64xi1>, vector<4x64xf32>
    %cst_17 = arith.constant 7.812500e-03 : f32
    %37 = vector.broadcast %cst_17 : f32 to vector<4x64xf32>
    %38 = arith.mulf %36, %37 : vector<4x64xf32>
    %39 = vector.shape_cast %38 : vector<4x64xf32> to vector<4x1x64xf32>
    %40 = vector.broadcast %39 : vector<4x1x64xf32> to vector<4x64x64xf32>
    %41 = arith.subf %1, %40 : vector<4x64x64xf32>
    %42 = arith.mulf %41, %41 : vector<4x64x64xf32>
    %cst_18 = arith.constant dense<0.000000e+00> : vector<4x64xf32>
    %43 = vector.multi_reduction <add>, %42, %cst_18 [1] : vector<4x64x64xf32> to vector<4x64xf32>
    %44 = vector.extract_strided_slice %43 {offsets = [0, 1], sizes = [4, 63], strides = [1, 1]} : vector<4x64xf32> to vector<4x63xf32>
    %45 = vector.extract_strided_slice %43 {offsets = [0, 0], sizes = [4, 1], strides = [1, 1]} : vector<4x64xf32> to vector<4x1xf32>
    %46 = tpu.concatenate %44, %45 in 1 : vector<4x63xf32>, vector<4x1xf32> -> vector<4x64xf32>
    %47 = vector.extract_strided_slice %43 {offsets = [0, 63], sizes = [4, 1], strides = [1, 1]} : vector<4x64xf32> to vector<4x1xf32>
    %48 = vector.extract_strided_slice %43 {offsets = [0, 0], sizes = [4, 63], strides = [1, 1]} : vector<4x64xf32> to vector<4x63xf32>
    %49 = tpu.concatenate %47, %48 in 1 : vector<4x1xf32>, vector<4x63xf32> -> vector<4x64xf32>
    %50 = tpu.iota {dimensions = array<i32: 1>} : vector<4x64xi32>
    %c2_i32_19 = arith.constant 2 : i32
    %c0_i32_20 = arith.constant 0 : i32
    %51 = arith.cmpi eq, %c2_i32_19, %c0_i32_20 : i32
    %c1_i32_21 = arith.constant 1 : i32
    %52 = arith.select %51, %c1_i32_21, %c2_i32_19 : i32
    %53 = vector.broadcast %52 : i32 to vector<4x64xi32>
    %54 = arith.remsi %50, %53 : vector<4x64xi32>
    %c0_i32_22 = arith.constant 0 : i32
    %55 = vector.broadcast %c0_i32_22 : i32 to vector<4x64xi32>
    %56 = arith.cmpi ne, %54, %55 : vector<4x64xi32>
    %c0_i32_23 = arith.constant 0 : i32
    %57 = vector.broadcast %c0_i32_23 : i32 to vector<4x64xi32>
    %58 = arith.cmpi slt, %54, %57 : vector<4x64xi32>
    %c0_i32_24 = arith.constant 0 : i32
    %59 = arith.cmpi slt, %52, %c0_i32_24 : i32
    %60 = vector.broadcast %59 : i1 to vector<4x64xi1>
    %61 = vector.broadcast %60 : vector<4x64xi1> to vector<4x64xi1>
    %62 = arith.xori %58, %61 : vector<4x64xi1>
    %63 = arith.andi %62, %56 : vector<4x64xi1>
    %64 = vector.broadcast %52 : i32 to vector<4x64xi32>
    %65 = arith.addi %54, %64 : vector<4x64xi32>
    %66 = arith.select %63, %65, %54 : vector<4x64xi1>, vector<4x64xi32>
    %c0_i32_25 = arith.constant 0 : i32
    %67 = vector.broadcast %c0_i32_25 : i32 to vector<4x64xi32>
    %68 = arith.cmpi eq, %66, %67 : vector<4x64xi32>
    %69 = arith.addf %43, %46 : vector<4x64xf32>
    %70 = arith.addf %43, %49 : vector<4x64xf32>
    %71 = arith.select %68, %69, %70 : vector<4x64xi1>, vector<4x64xf32>
    %cst_26 = arith.constant 7.812500e-03 : f32
    %72 = vector.broadcast %cst_26 : f32 to vector<4x64xf32>
    %73 = arith.mulf %71, %72 : vector<4x64xf32>
    %cst_27 = arith.constant 9.99999974E-6 : f32
    %74 = vector.broadcast %cst_27 : f32 to vector<4x64xf32>
    %75 = arith.addf %73, %74 : vector<4x64xf32>
    %76 = math.rsqrt %75 : vector<4x64xf32>
    %cst_28 = arith.constant 1.000000e+00 : f32
    %77 = vector.broadcast %cst_28 : f32 to vector<4x64xf32>
    %78 = arith.addf %3, %77 : vector<4x64xf32>
    %79 = arith.mulf %76, %78 : vector<4x64xf32>
    %80 = vector.shape_cast %79 : vector<4x64xf32> to vector<4x1x64xf32>
    %81 = vector.broadcast %80 : vector<4x1x64xf32> to vector<4x64x64xf32>
    %82 = arith.mulf %41, %81 : vector<4x64x64xf32>
    %83 = vector.shape_cast %5 : vector<4x64xf32> to vector<4x1x64xf32>
    %84 = vector.broadcast %83 : vector<4x1x64xf32> to vector<4x64x64xf32>
    %85 = arith.addf %82, %84 : vector<4x64x64xf32>
    %86 = arith.negf %85 : vector<4x64x64xf32>
    %87 = math.exp %86 : vector<4x64x64xf32>
    %cst_29 = arith.constant 1.000000e+00 : f32
    %88 = vector.broadcast %cst_29 : f32 to vector<4x64x64xf32>
    %89 = arith.addf %88, %87 : vector<4x64x64xf32>
    %90 = arith.divf %88, %89 : vector<4x64x64xf32>
    %91 = arith.mulf %85, %90 : vector<4x64x64xf32>
    %92 = vector.shape_cast %91 : vector<4x64x64xf32> to vector<256x64xf32>
    %cst_30 = arith.constant dense<0.000000e+00> : vector<256x32xf32>
    %93 = tpu.matmul %92, %6, %cst_30 {dimension_numbers = #tpu.dot_dimension_numbers<[1], [0], [0], [1], [0, 0, 1, 1], [], []>} : vector<256x64xf32>, vector<64x32xf32>, vector<256x32xf32> -> vector<256x32xf32>
    %94 = vector.broadcast %7 : vector<1x32xf32> to vector<256x32xf32>
    %95 = arith.addf %93, %94 : vector<256x32xf32>
    %96 = vector.shape_cast %95 : vector<256x32xf32> to vector<4x64x32xf32>
    %c0_31 = arith.constant 0 : index
    %c0_32 = arith.constant 0 : index
    %c0_33 = arith.constant 0 : index
    %97 = vector.load %arg6[%c0_31, %c0_32, %c0_33] : memref<1x4x32xf32, #tpu.memory_space<vmem>>, vector<1x4x32xf32>
    %98 = vector.shape_cast %97 : vector<1x4x32xf32> to vector<4x32xf32>
    %c0_34 = arith.constant 0 : index
    %c0_35 = arith.constant 0 : index
    %c0_36 = arith.constant 0 : index
    %99 = vector.load %arg7[%c0_34, %c0_35, %c0_36] : memref<1x4x32xf32, #tpu.memory_space<vmem>>, vector<1x4x32xf32>
    %100 = vector.shape_cast %99 : vector<1x4x32xf32> to vector<4x32xf32>
    %c0_37 = arith.constant 0 : index
    %c0_38 = arith.constant 0 : index
    %101 = vector.load %arg8[%c0_37, %c0_38] : memref<96x32xf32, #tpu.memory_space<vmem>>, vector<96x32xf32>
    %c0_39 = arith.constant 0 : index
    %c0_40 = arith.constant 0 : index
    %102 = vector.load %arg9[%c0_39, %c0_40] : memref<1x32xf32, #tpu.memory_space<vmem>>, vector<1x32xf32>
    %cst_41 = arith.constant dense<0.000000e+00> : vector<4x32xf32>
    %103 = vector.multi_reduction <add>, %96, %cst_41 [1] : vector<4x64x32xf32> to vector<4x32xf32>
    %cst_42 = arith.constant 1.562500e-02 : f32
    %104 = vector.broadcast %cst_42 : f32 to vector<4x32xf32>
    %105 = arith.mulf %103, %104 : vector<4x32xf32>
    %106 = vector.shape_cast %105 : vector<4x32xf32> to vector<4x1x32xf32>
    %107 = vector.broadcast %106 : vector<4x1x32xf32> to vector<4x64x32xf32>
    %108 = arith.subf %96, %107 : vector<4x64x32xf32>
    %109 = arith.mulf %108, %108 : vector<4x64x32xf32>
    %cst_43 = arith.constant dense<0.000000e+00> : vector<4x32xf32>
    %110 = vector.multi_reduction <add>, %109, %cst_43 [1] : vector<4x64x32xf32> to vector<4x32xf32>
    %cst_44 = arith.constant 1.562500e-02 : f32
    %111 = vector.broadcast %cst_44 : f32 to vector<4x32xf32>
    %112 = arith.mulf %110, %111 : vector<4x32xf32>
    %cst_45 = arith.constant 9.99999974E-6 : f32
    %113 = vector.broadcast %cst_45 : f32 to vector<4x32xf32>
    %114 = arith.addf %112, %113 : vector<4x32xf32>
    %115 = math.rsqrt %114 : vector<4x32xf32>
    %cst_46 = arith.constant 1.000000e+00 : f32
    %116 = vector.broadcast %cst_46 : f32 to vector<4x32xf32>
    %117 = arith.addf %98, %116 : vector<4x32xf32>
    %118 = arith.mulf %115, %117 : vector<4x32xf32>
    %119 = vector.shape_cast %118 : vector<4x32xf32> to vector<4x1x32xf32>
    %120 = vector.broadcast %119 : vector<4x1x32xf32> to vector<4x64x32xf32>
    %121 = arith.mulf %108, %120 : vector<4x64x32xf32>
    %122 = vector.shape_cast %100 : vector<4x32xf32> to vector<4x1x32xf32>
    %123 = vector.broadcast %122 : vector<4x1x32xf32> to vector<4x64x32xf32>
    %124 = arith.addf %121, %123 : vector<4x64x32xf32>
    %125 = arith.negf %124 : vector<4x64x32xf32>
    %126 = math.exp %125 : vector<4x64x32xf32>
    %cst_47 = arith.constant 1.000000e+00 : f32
    %127 = vector.broadcast %cst_47 : f32 to vector<4x64x32xf32>
    %128 = arith.addf %127, %126 : vector<4x64x32xf32>
    %129 = arith.divf %127, %128 : vector<4x64x32xf32>
    %130 = arith.mulf %124, %129 : vector<4x64x32xf32>
    %cst_48 = arith.constant 0.000000e+00 : f32
    %131 = vector.broadcast %cst_48 : f32 to vector<1x64x32xf32>
    %132 = tpu.concatenate %131, %130, %131 in 0 : vector<1x64x32xf32>, vector<4x64x32xf32>, vector<1x64x32xf32> -> vector<6x64x32xf32>
    %133 = vector.extract_strided_slice %132 {offsets = [0, 0, 0], sizes = [4, 64, 32], strides = [1, 1, 1]} : vector<6x64x32xf32> to vector<4x64x32xf32>
    %134 = vector.shape_cast %133 : vector<4x64x32xf32> to vector<256x32xf32>
    %135 = vector.extract_strided_slice %132 {offsets = [1, 0, 0], sizes = [4, 64, 32], strides = [1, 1, 1]} : vector<6x64x32xf32> to vector<4x64x32xf32>
    %136 = vector.shape_cast %135 : vector<4x64x32xf32> to vector<256x32xf32>
    %137 = vector.extract_strided_slice %132 {offsets = [2, 0, 0], sizes = [4, 64, 32], strides = [1, 1, 1]} : vector<6x64x32xf32> to vector<4x64x32xf32>
    %138 = vector.shape_cast %137 : vector<4x64x32xf32> to vector<256x32xf32>
    %139 = tpu.concatenate %134, %136, %138 in 1 : vector<256x32xf32>, vector<256x32xf32>, vector<256x32xf32> -> vector<256x96xf32>
    %cst_49 = arith.constant dense<0.000000e+00> : vector<256x32xf32>
    %140 = tpu.matmul %139, %101, %cst_49 {dimension_numbers = #tpu.dot_dimension_numbers<[1], [0], [0], [1], [0, 0, 1, 1], [], []>} : vector<256x96xf32>, vector<96x32xf32>, vector<256x32xf32> -> vector<256x32xf32>
    %141 = vector.broadcast %102 : vector<1x32xf32> to vector<256x32xf32>
    %142 = arith.addf %140, %141 : vector<256x32xf32>
    %143 = vector.shape_cast %142 : vector<256x32xf32> to vector<4x64x32xf32>
    %c0_50 = arith.constant 0 : index
    %c0_51 = arith.constant 0 : index
    %c0_52 = arith.constant 0 : index
    %c0_53 = arith.constant 0 : index
    %144 = vector.load %arg10[%c0_50, %c0_51, %c0_52, %c0_53] : memref<1x4x64x32xf32, #tpu.memory_space<vmem>>, vector<1x4x64x32xf32>
    %145 = vector.shape_cast %144 : vector<1x4x64x32xf32> to vector<4x64x32xf32>
    %146 = vector.shape_cast %143 : vector<4x64x32xf32> to vector<1x4x64x32xf32>
    tpu.vector_store %arg10[%c0_50, %c0_51, %c0_52, %c0_53], %146 {strides = array<i32>} : memref<1x4x64x32xf32, #tpu.memory_space<vmem>>, vector<1x4x64x32xf32>,
    return
  }
  func.func @transform_0(%arg0: i32) -> (i32, i32, i32, i32) {
    %c0_i32 = arith.constant 0 : i32
    %c0_i32_0 = arith.constant 0 : i32
    %c0_i32_1 = arith.constant 0 : i32
    %c0_i32_2 = arith.constant 0 : i32
    return %arg0, %c0_i32, %c0_i32_0, %c0_i32_1 : i32, i32, i32, i32
  }
  func.func @transform_1(%arg0: i32) -> (i32, i32, i32) {
    %c0_i32 = arith.constant 0 : i32
    %c0_i32_0 = arith.constant 0 : i32
    %c0_i32_1 = arith.constant 0 : i32
    return %arg0, %c0_i32, %c0_i32_0 : i32, i32, i32
  }
  func.func @transform_2(%arg0: i32) -> (i32, i32, i32) {
    %c0_i32 = arith.constant 0 : i32
    %c0_i32_0 = arith.constant 0 : i32
    %c0_i32_1 = arith.constant 0 : i32
    return %arg0, %c0_i32, %c0_i32_0 : i32, i32, i32
  }
  func.func @transform_3(%arg0: i32) -> (i32, i32) {
    %c0_i32 = arith.constant 0 : i32
    %c0_i32_0 = arith.constant 0 : i32
    %c0_i32_1 = arith.constant 0 : i32
    return %c0_i32, %c0_i32_0 : i32, i32
  }
  func.func @transform_4(%arg0: i32) -> (i32, i32) {
    %c0_i32 = arith.constant 0 : i32
    %c0_i32_0 = arith.constant 0 : i32
    %c0_i32_1 = arith.constant 0 : i32
    return %c0_i32, %c0_i32_0 : i32, i32
  }
  func.func @transform_5(%arg0: i32) -> (i32, i32, i32) {
    %c0_i32 = arith.constant 0 : i32
    %c0_i32_0 = arith.constant 0 : i32
    %c0_i32_1 = arith.constant 0 : i32
    return %arg0, %c0_i32, %c0_i32_0 : i32, i32, i32
  }
  func.func @transform_6(%arg0: i32) -> (i32, i32, i32) {
    %c0_i32 = arith.constant 0 : i32
    %c0_i32_0 = arith.constant 0 : i32
    %c0_i32_1 = arith.constant 0 : i32
    return %arg0, %c0_i32, %c0_i32_0 : i32, i32, i32
  }
  func.func @transform_7(%arg0: i32) -> (i32, i32) {
    %c0_i32 = arith.constant 0 : i32
    %c0_i32_0 = arith.constant 0 : i32
    %c0_i32_1 = arith.constant 0 : i32
    return %c0_i32, %c0_i32_0 : i32, i32
  }
  func.func @transform_8(%arg0: i32) -> (i32, i32) {
    %c0_i32 = arith.constant 0 : i32
    %c0_i32_0 = arith.constant 0 : i32
    %c0_i32_1 = arith.constant 0 : i32
    return %c0_i32, %c0_i32_0 : i32, i32
  }
  func.func @transform_9(%arg0: i32) -> (i32, i32, i32, i32) {
    %c0_i32 = arith.constant 0 : i32
    %c0_i32_0 = arith.constant 0 : i32
    %c0_i32_1 = arith.constant 0 : i32
    %c0_i32_2 = arith.constant 0 : i32
    return %arg0, %c0_i32, %c0_i32_0, %c0_i32_1 : i32, i32, i32, i32
  }
}

</mosaic_0001>

<bundles_post_ra>
// kernel: _lambda_.3
= control target key start
LH: loop header
LB: loop body
LE: loop exit
PB: predicated region body
PF: predicated region fallthrough
CT: control target
= control target key end

     0   :  { %s3470_s30 = smov 0   ;;  %s5081_s0 = inlined_call_operand.vmem [shape: f32[2,4,64,32], index: 0, kind: input, shape index: {}]   ;;  %s5082_s1 = inlined_call_operand.vmem [shape: f32[2,4,32], index: 1, kind: input, shape index: {}]   ;;  %s5083_s2 = inlined_call_operand.vmem [shape: f32[2,4,32], index: 2, kind: input, shape index: {}]   ;;  %s5084_s3 = inlined_call_operand.vmem [shape: f32[96,32], index: 3, kind: input, shape index: {}]   ;;  %s5085_s4 = inlined_call_operand.vmem [shape: f32[1,32], index: 4, kind: input, shape index: {}]   ;;  %s5086_s5 = inlined_call_operand.vmem [shape: f32[2,4,32], index: 5, kind: input, shape index: {}]   ;;  %s5087_s6 = inlined_call_operand.vmem [shape: f32[2,4,32], index: 6, kind: input, shape index: {}]   ;;  %s5088_s7 = inlined_call_operand.vmem [shape: f32[32,64], index: 7, kind: input, shape index: {}]   ;;  %s5089_s8 = inlined_call_operand.vmem [shape: f32[1,64], index: 8, kind: input, shape index: {}]   ;;  %s5090_s9 = inlined_call_operand.vmem [shape: f32[2,4,64,64], index: 9, kind: output, shape index: {}]  }
   0x1 LB: > { %s2735_s10 = sadd.s32 4294967295, %s3414_s30   ;;  %p2739_p0 = scmp.ge.s32.totalorder %s3414_s30, 1  ;;  %s3414_s30 = sphi %s3470_s30, %s19_s30  }
   0x2   : > { %p323_p1 = scmp.lt.s32.totalorder %s3414_s30, 3 }
   0x4   : > { %p324_p2 = pnand %p2739_p0, %p323_p1 }
   0x5   : > { %p375_p3 = scmp.lt.s32.totalorder (!%p324_p2), %s2735_s10, 1  ;;  %vm448_vm0 = vcmask (!%p324_p2), 261120   ;;  %s3417_s25 = smov (!%p324_p2), 64   ;;  %vm1295_vm1 = vcmask (!%p324_p2), 523264   ;;  %vm1334_vm2 = vcmask (!%p324_p2), 785408  }
   0x6   : > { %327 = sbr.rel (%p324_p2) target bundleno = 926 (0x39e), region = 56  ;;  %s3418_s12 = smov (!%p324_p2), 32  }
   0xd   : > { %s5092_s10 = smov (!%p375_p3, %s2735_s10), 1 }
   0xe   : > { %s2882_s11 = sshll.u32 %s5092_s10, 8  ;;  %s3782_s15 = sshll.u32 %s5092_s10, 2 }
   0xf   : > { %s3486_s14 = scalar_lea.vmem %s5081_s0, %s2882_s11  ;;  %s383_s18 = scalar_lea.vmem %s5082_s1, %s3782_s15 }
  0x10   : > { %v3489_v0 = vld [vmem:[%s3486_s14 + $0x40] sm:$0xff]  ;;  %v3492_v1 = vld [vmem:[%s3486_s14 + $0x48] sm:$0xff]  ;;  %v3495_v2 = vld [vmem:[%s3486_s14 + $0x50] sm:$0xff]  ;;  %s387_s21 = scalar_lea.vmem %s5083_s2, %s3782_s15  ;;  %s391_s26 = scalar_lea.vmem %s5086_s5, %s3782_s15 }
  0x11   : > { %v3498_v3 = vld [vmem:[%s3486_s14 + $0x58] sm:$0xff]  ;;  %v470_v4 = vsel %vm448_vm0, %v3489_v0, 0.0  ;;  %v471_v5 = vsel %vm448_vm0, %v3492_v1, 0.0  ;;  %v473_v6 = vsel %vm448_vm0, %v3495_v2, 0.0  ;;  %v3507_v7 = vld [vmem:[%s3486_s14 + $0x60] sm:$0xff]  ;;  %v3510_v9 = vld [vmem:[%s3486_s14 + $0x68] sm:$0xff]  ;;  %s395_s29 = scalar_lea.vmem %s5087_s6, %s3782_s15  ;;  %s4980_s16 = scalar_lea.vmem %s5090_s9, %s2882_s11 }
  0x12   : > { %v472_v8 = vadd.f32 %v471_v5, %v470_v4  ;;  %v475_v10 = vsel %vm448_vm0, %v3498_v3, 0.0  ;;  %v3515_v12 = vld [vmem:[%s3486_s14] sm:$0xff]  ;;  %v3518_v13 = vld [vmem:[%s3486_s14 + $0x8] sm:$0xff]  ;;  %v3521_v14 = vld [vmem:[%s3486_s14 + $0x10] sm:$0xff]  ;;  %v477_v15 = vsel %vm448_vm0, %v3507_v7, 0.0  ;;  %v479_v25 = vsel %vm448_vm0, %v3510_v9, 0.0 }
  0x13   : > { %v3526_v16 = vld [vmem:[%s3486_s14 + $0x18] sm:$0xff]  ;;  %v449_v17 = vsel %vm448_vm0, %v3515_v12, 0.0  ;;  %v450_v18 = vsel %vm448_vm0, %v3518_v13, 0.0  ;;  %v452_v19 = vsel %vm448_vm0, %v3521_v14, 0.0  ;;  %v3535_v20 = vld [vmem:[%s3486_s14 + $0x70] sm:$0xff]  ;;  %v3538_v22 = vld [vmem:[%s3486_s14 + $0x20] sm:$0xff] }
  0x14   : > { %v474_v11 = vadd.f32 %v473_v6, %v472_v8  ;;  %v451_v23 = vadd.f32 %v450_v18, %v449_v17  ;;  %v3541_v24 = vld [vmem:[%s3486_s14 + $0x80] sm:$0xff]  ;;  %v454_v26 = vsel %vm448_vm0, %v3526_v16, 0.0  ;;  %v3548_v27 = vld [vmem:[%s3486_s14 + $0x88] sm:$0xff]  ;;  %v3551_v28 = vld [vmem:[%s3486_s14 + $0x90] sm:$0xff]  ;;  %v481_v34 = vsel %vm448_vm0, %v3535_v20, 0.0 }
  0x15   : > { %v3554_v29 = vld [vmem:[%s3486_s14 + $0x78] sm:$0xff]  ;;  %v3557_v31 = vld [vmem:[%s3486_s14 + $0x28] sm:$0xff]  ;;  %v3565_v35 = vld [vmem:[%s3486_s14 + $0x30] sm:$0xff]  ;;  %v456_v36 = vsel %vm448_vm0, %v3538_v22, 0.0  ;;  %v491_v37 = vsel %vm448_vm0, %v3541_v24, 0.0  ;;  %v492_v38 = vsel %vm448_vm0, %v3548_v27, 0.0 }
  0x16   : > { %v476_v21 = vadd.f32 %v475_v10, %v474_v11  ;;  %v453_v32 = vadd.f32 %v452_v19, %v451_v23  ;;  %v3560_v33 = vld [vmem:[%s3486_s14 + $0x98] sm:$0xff]  ;;  %v3574_v41 = vld [vmem:[%s3486_s14 + $0xa0] sm:$0xff]  ;;  %v493_v42 = vadd.f32 %v492_v38, %v491_v37  ;;  %v494_v43 = vsel %vm448_vm0, %v3551_v28, 0.0  ;;  %v3582_v45 = vld [vmem:[%s3486_s14 + $0xc8] sm:$0xff] }
  0x17   : > { %v3579_v44 = vld [vmem:[%s3486_s14 + $0xc0] sm:$0xff]  ;;  %v483_v46 = vsel %vm448_vm0, %v3554_v29, 0.0  ;;  %v3587_v47 = vld [vmem:[%s3486_s14 + $0x38] sm:$0xff]  ;;  %v458_v48 = vsel %vm448_vm0, %v3557_v31, 0.0  ;;  %v496_v49 = vsel %vm448_vm0, %v3560_v33, 0.0  ;;  %v3594_v52 = vld [vmem:[%s3486_s14 + $0xa8] sm:$0xff] }
  0x18   : > { %v478_v30 = vadd.f32 %v477_v15, %v476_v21  ;;  %v455_v40 = vadd.f32 %v454_v26, %v453_v32  ;;  %v495_v53 = vadd.f32 %v494_v43, %v493_v42  ;;  %v3597_v54 = vld [vmem:[%s3486_s14 + $0xd0] sm:$0xff]  ;;  %v3600_v55 = vld [vmem:[%s3486_s14 + $0xd8] sm:$0xff]  ;;  %v460_v56 = vsel %vm448_vm0, %v3565_v35, 0.0  ;;  %v3614_v4 = vld [vmem:[%s3486_s14 + $0xe0] sm:$0xff] }
  0x19   : > { %v498_v57 = vsel %vm448_vm0, %v3574_v41, 0.0  ;;  %v512_v58 = vsel %vm448_vm0, %v3579_v44, 0.0  ;;  %v513_v59 = vsel %vm448_vm0, %v3582_v45, 0.0  ;;  %v3611_v62 = vld [vmem:[%s3486_s14 + $0xb0] sm:$0xff]  ;;  %v462_v6 = vsel %vm448_vm0, %v3587_v47, 0.0  ;;  %v3625_v21 = vld [vmem:[%s3486_s14 + $0xb8] sm:$0xff] }
  0x1a   : > { %v480_v39 = vadd.f32 %v479_v25, %v478_v30  ;;  %v457_v51 = vadd.f32 %v456_v36, %v455_v40  ;;  %v497_v63 = vadd.f32 %v496_v49, %v495_v53  ;;  %v514_v5 = vadd.f32 %v513_v59, %v512_v58  ;;  %v3632_v36 = vld [vmem:[%s3486_s14 + $0xe8] sm:$0xff]  ;;  %v3642_v58 = vld [vmem:[%s3486_s14 + $0xf8] sm:$0xff] }
  0x1b   : > { %v500_v8 = vsel %vm448_vm0, %v3594_v52, 0.0  ;;  %v515_v10 = vsel %vm448_vm0, %v3597_v54, 0.0  ;;  %v517_v11 = vsel %vm448_vm0, %v3600_v55, 0.0  ;;  %v502_v23 = vsel %vm448_vm0, %v3611_v62, 0.0 }
  0x1c   : > { %v482_v50 = vadd.f32 %v481_v34, %v480_v39  ;;  %v459_v61 = vadd.f32 %v458_v48, %v457_v51  ;;  %v499_v18 = vadd.f32 %v498_v57, %v497_v63  ;;  %v516_v19 = vadd.f32 %v515_v10, %v514_v5 }
  0x1d   : > { %v519_v25 = vsel %vm448_vm0, %v3614_v4, 0.0  ;;  %v504_v40 = vsel %vm448_vm0, %v3625_v21, 0.0  ;;  %v521_v48 = vsel %vm448_vm0, %v3632_v36, 0.0 }
  0x1e   : > { %v484_v60 = vadd.f32 %v483_v46, %v482_v50  ;;  %v461_v17 = vadd.f32 %v460_v56, %v459_v61  ;;  %v501_v32 = vadd.f32 %v500_v8, %v499_v18  ;;  %v518_v34 = vadd.f32 %v517_v11, %v516_v19  ;;  %v3639_v50 = vld [vmem:[%s3486_s14 + $0xf0] sm:$0xff] }
  0x1f   : > { %v523_v59 = vsel %vm448_vm0, %v3639_v50, 0.0 }
  0x20   : > { %v485_v15 = vrot.slane %v484_v60, 4  ;;  %v463_v30 = vadd.f32 %v462_v6, %v461_v17  ;;  %v503_v39 = vadd.f32 %v502_v23, %v501_v32  ;;  %v520_v42 = vadd.f32 %v519_v25, %v518_v34 }
  0x21   : > { %v525_v6 = vsel %vm448_vm0, %v3642_v58, 0.0 }
  0x22   : > { %v486_v26 = vadd.f32 %v485_v15, %v484_v60  ;;  %v464_v38 = vrot.slane %v463_v30, 4  ;;  %v505_v49 = vadd.f32 %v504_v40, %v503_v39  ;;  %v522_v56 = vadd.f32 %v521_v48, %v520_v42 }
  0x24   : > { %v487_v37 = vrot.slane %v486_v26, 2  ;;  %v465_v46 = vadd.f32 %v464_v38, %v463_v30  ;;  %v506_v61 = vrot.slane %v505_v49, 4  ;;  %v524_v5 = vadd.f32 %v523_v59, %v522_v56 }
  0x26   : > { %v488_v43 = vadd.f32 %v487_v37, %v486_v26  ;;  %v466_v53 = vrot.slane %v465_v46, 2  ;;  %v507_v23 = vadd.f32 %v506_v61, %v505_v49  ;;  %v526_v25 = vadd.f32 %v525_v6, %v524_v5 }
  0x28   : > { %v489_v51 = vrot.slane %v488_v43, 1  ;;  %v467_v60 = vadd.f32 %v466_v53, %v465_v46  ;;  %v508_v39 = vrot.slane %v507_v23, 2  ;;  %v527_v49 = vrot.slane %v526_v25, 4 }
  0x2a   : > { %v490_v57 = vadd.f32 %v489_v51, %v488_v43  ;;  %v468_v19 = vrot.slane %v467_v60, 1  ;;  %v509_v56 = vadd.f32 %v508_v39, %v507_v23 }
  0x2c   : > { %v534_v63 = vmul.f32 0.015625, %v490_v57  ;;  %v469_v40 = vadd.f32 %v468_v19, %v467_v60 }
  0x2e   : > { %v3649_v8 = vsub.f32 %v3489_v0, %v534_v63  ;;  %v3652_v10 = vsub.f32 %v3492_v1, %v534_v63  ;;  %v3655_v11 = vsub.f32 %v3495_v2, %v534_v63  ;;  %v3658_v15 = vsub.f32 %v3498_v3, %v534_v63 }
  0x2f   : > { %v3661_v17 = vsub.f32 %v3507_v7, %v534_v63  ;;  %v3664_v18 = vsub.f32 %v3510_v9, %v534_v63  ;;  %v3675_v7 = vsub.f32 %v3535_v20, %v534_v63  ;;  %v3683_v34 = vsub.f32 %v3554_v29, %v534_v63 }
  0x30   : > { %v577_v0 = vmul.f32 %v3649_v8, %v3649_v8  ;;  %v578_v1 = vmul.f32 %v3652_v10, %v3652_v10  ;;  %v579_v2 = vmul.f32 %v3655_v11, %v3655_v11  ;;  %v580_v3 = vmul.f32 %v3658_v15, %v3658_v15 }
  0x31   : > { %v581_v9 = vmul.f32 %v3661_v17, %v3661_v17  ;;  %v582_v37 = vmul.f32 %v3664_v18, %v3664_v18  ;;  %v583_v42 = vmul.f32 %v3675_v7, %v3675_v7  ;;  %v533_v48 = vmul.f32 0.015625, %v469_v40 }
  0x32   : > { %v622_v26 = vsel %vm448_vm0, %v577_v0, 0.0  ;;  %v623_v30 = vsel %vm448_vm0, %v578_v1, 0.0  ;;  %v625_v32 = vsel %vm448_vm0, %v579_v2, 0.0  ;;  %v627_v20 = vsel %vm448_vm0, %v580_v3, 0.0 }
  0x33   : > { %v624_v38 = vadd.f32 %v623_v30, %v622_v26  ;;  %v629_v46 = vsel %vm448_vm0, %v581_v9, 0.0  ;;  %v584_v29 = vmul.f32 %v3683_v34, %v3683_v34  ;;  %v631_v53 = vsel %vm448_vm0, %v582_v37, 0.0 }
  0x34   : > { %v3695_v57 = vsub.f32 %v3515_v12, %v533_v48  ;;  %v3698_v59 = vsub.f32 %v3518_v13, %v533_v48  ;;  %v3701_v60 = vsub.f32 %v3521_v14, %v533_v48  ;;  %v3704_v61 = vsub.f32 %v3526_v16, %v533_v48 }
  0x35   : > { %v626_v43 = vadd.f32 %v625_v32, %v624_v38  ;;  %v633_v5 = vsel %vm448_vm0, %v583_v42, 0.0  ;;  %v3708_v6 = vsub.f32 %v3538_v22, %v533_v48  ;;  %v3711_v19 = vsub.f32 %v3557_v31, %v533_v48 }
  0x36   : > { %v3714_v12 = vsub.f32 %v3565_v35, %v533_v48  ;;  %v569_v13 = vmul.f32 %v3695_v57, %v3695_v57  ;;  %v570_v14 = vmul.f32 %v3698_v59, %v3698_v59  ;;  %v571_v16 = vmul.f32 %v3701_v60, %v3701_v60 }
  0x37   : > { %v628_v51 = vadd.f32 %v627_v20, %v626_v43  ;;  %v635_v0 = vsel %vm448_vm0, %v584_v29, 0.0  ;;  %v572_v22 = vmul.f32 %v3704_v61, %v3704_v61  ;;  %v510_v31 = vrot.slane %v509_v56, 1 }
  0x38   : > { %v573_v35 = vmul.f32 %v3708_v6, %v3708_v6  ;;  %v601_v1 = vsel %vm448_vm0, %v569_v13, 0.0  ;;  %v602_v2 = vsel %vm448_vm0, %v570_v14, 0.0  ;;  %v528_v3 = vadd.f32 %v527_v49, %v526_v25 }
  0x39   : > { %v630_v63 = vadd.f32 %v629_v46, %v628_v51  ;;  %v3730_v26 = vsub.f32 %v3587_v47, %v533_v48  ;;  %v603_v30 = vadd.f32 %v602_v2, %v601_v1  ;;  %v604_v32 = vsel %vm448_vm0, %v571_v16, 0.0 }
  0x3a   : > { %v574_v37 = vmul.f32 %v3711_v19, %v3711_v19  ;;  %v575_v38 = vmul.f32 %v3714_v12, %v3714_v12  ;;  %v606_v39 = vsel %vm448_vm0, %v572_v22, 0.0  ;;  %v511_v42 = vadd.f32 %v510_v31, %v509_v56 }
  0x3b   : > { %v632_v23 = vadd.f32 %v631_v53, %v630_v63  ;;  %v605_v40 = vadd.f32 %v604_v32, %v603_v30  ;;  %v608_v25 = vsel %vm448_vm0, %v573_v35, 0.0  ;;  %v529_v43 = vrot.slane %v528_v3, 2 }
  0x3c   : > { %v576_v47 = vmul.f32 %v3730_v26, %v3730_v26  ;;  %v535_v49 = vmul.f32 0.015625, %v511_v42  ;;  %v610_v29 = vsel %vm448_vm0, %v574_v37, 0.0  ;;  %v612_v51 = vsel %vm448_vm0, %v575_v38, 0.0 }
  0x3d   : > { %v634_v9 = vadd.f32 %v633_v5, %v632_v23  ;;  %v607_v48 = vadd.f32 %v606_v39, %v605_v40  ;;  %v530_v23 = vadd.f32 %v529_v43, %v528_v3  ;;  %v710_v39 = vlaneseq }
  0x3e   : > { %v3744_v5 = vsub.f32 %v3541_v24, %v535_v49  ;;  %v3747_v56 = vsub.f32 %v3548_v27, %v535_v49  ;;  %v3750_v13 = vsub.f32 %v3551_v28, %v535_v49  ;;  %v3753_v14 = vsub.f32 %v3560_v33, %v535_v49 }
  0x3f   : > { %v636_v20 = vadd.f32 %v635_v0, %v634_v9  ;;  %v609_v63 = vadd.f32 %v608_v25, %v607_v48  ;;  %v3756_v16 = vsub.f32 %v3574_v41, %v535_v49  ;;  %v614_v31 = vsel %vm448_vm0, %v576_v47, 0.0 }
  0x40   : > { %v3760_v24 = vsub.f32 %v3594_v52, %v535_v49  ;;  %v585_v27 = vmul.f32 %v3744_v5, %v3744_v5  ;;  %v586_v28 = vmul.f32 %v3747_v56, %v3747_v56  ;;  %v587_v33 = vmul.f32 %v3750_v13, %v3750_v13 }
  0x41   : > { %v637_v46 = vrot.slane %v636_v20, 4  ;;  %v611_v22 = vadd.f32 %v610_v29, %v609_v63  ;;  %v588_v41 = vmul.f32 %v3753_v14, %v3753_v14  ;;  %v589_v2 = vmul.f32 %v3756_v16, %v3756_v16 }
  0x42   : > { %v643_v52 = vsel %vm448_vm0, %v585_v27, 0.0  ;;  %v644_v3 = vsel %vm448_vm0, %v586_v28, 0.0  ;;  %v531_v9 = vrot.slane %v530_v23, 1  ;;  %v646_v38 = vsel %vm448_vm0, %v587_v33, 0.0 }
  0x43   : > { %v638_v53 = vadd.f32 %v637_v46, %v636_v20  ;;  %v613_v1 = vadd.f32 %v612_v51, %v611_v22  ;;  %v645_v37 = vadd.f32 %v644_v3, %v643_v52  ;;  %v3776_v20 = vsub.f32 %v3611_v62, %v535_v49  ;;  %v433_v52 = vld [vmem:[%s383_s18] sm:$0xf] }
  0x44   : > { %v590_v40 = vmul.f32 %v3760_v24, %v3760_v24  ;;  %v648_v42 = vsel %vm448_vm0, %v588_v41, 0.0  ;;  %v3416_v43 = vmov 1966171168   ;;  %v650_v29 = vsel %vm448_vm0, %v589_v2, 0.0 }
  0x45   : > { %v639_v0 = vrot.slane %v638_v53, 2  ;;  %v615_v32 = vadd.f32 %v614_v31, %v613_v1  ;;  %v768_v46 = vunpack.c.l.s4 %v3416_v43  ;;  %v647_v48 = vadd.f32 %v646_v38, %v645_v37  ;;  %v2748_v3 = vld.sshfl [vmem:[%s387_s21] sm:$0x33 pattern:$0x75316420] }
  0x46   : > { %v532_v51 = vadd.f32 %v531_v9, %v530_v23  ;;  %v3786_v63 = vsub.f32 %v3625_v21, %v535_v49  ;;  %v711_v22 = vshrl.u32 %v710_v39, 7  ;;  %v591_v31 = vmul.f32 %v3776_v20, %v3776_v20 }
  0x47   : > { %v640_v35 = vadd.f32 %v639_v0, %v638_v53  ;;  %v616_v47 = vrot.slane %v615_v32, 4  ;;  %v649_v0 = vadd.f32 %v648_v42, %v647_v48  ;;  %v652_v23 = vsel %vm448_vm0, %v590_v40, 0.0 }
  0x48   : > { %v536_v27 = vmul.f32 0.015625, %v532_v51  ;;  %v769_v33 = vunpack.c.0.s8 %v768_v46  ;;  %v3823_v39 = vadd.f32 1.0, %v433_v52  ;;  %v766_v40 = vcombine.high %v2748_v3, %v2748_v3 }
  0x49   : > { %v641_v30 = vrot.slane %v640_v35, 1  ;;  %v617_v62 = vadd.f32 %v616_v47, %v615_v32  ;;  %v651_v49 = vadd.f32 %v650_v29, %v649_v0 }
  0x4a   : > { %v3800_v41 = vsub.f32 %v3579_v44, %v536_v27  ;;  %v3806_v1 = vsub.f32 %v3597_v54, %v536_v27  ;;  %v3809_v2 = vsub.f32 %v3600_v55, %v536_v27  ;;  %v654_v44 = vsel %vm448_vm0, %v591_v31, 0.0 }
  0x4b   : > { %v642_v25 = vadd.f32 %v641_v30, %v640_v35  ;;  %v618_v21 = vrot.slane %v617_v62, 2  ;;  %v3803_v35 = vsub.f32 %v3582_v45, %v536_v27  ;;  %v592_v30 = vmul.f32 %v3786_v63, %v3786_v63 }
  0x4c   : > { %v653_v32 = vadd.f32 %v652_v23, %v651_v49  ;;  %v3815_v37 = vsub.f32 %v3614_v4, %v536_v27  ;;  %v593_v45 = vmul.f32 %v3800_v41, %v3800_v41  ;;  %v595_v38 = vmul.f32 %v3806_v1, %v3806_v1 }
  0x4d   : > { %v686_v53 = vmul.f32 0.015625, %v642_v25  ;;  %v619_v9 = vadd.f32 %v618_v21, %v617_v62  ;;  %v594_v55 = vmul.f32 %v3803_v35, %v3803_v35  ;;  %v3825_v42 = vsub.s32 %v769_v33, %v711_v22 }
  0x4e   : > { %v596_v25 = vmul.f32 %v3809_v2, %v3809_v2  ;;  %v655_v43 = vadd.f32 %v654_v44, %v653_v32  ;;  %v656_v46 = vsel %vm448_vm0, %v592_v30, 0.0  ;;  %v664_v47 = vsel %vm448_vm0, %v593_v45, 0.0 }
  0x4f   : > { %v690_v28 = vadd.f32 1e-05, %v686_v53  ;;  %v620_v54 = vrot.slane %v619_v9, 1  ;;  %v3832_v48 = vsub.f32 %v3632_v36, %v536_v27  ;;  %v597_v29 = vmul.f32 %v3815_v37, %v3815_v37 }
  0x50   : > { %v665_v51 = vsel %vm448_vm0, %v594_v55, 0.0  ;;  %v667_v53 = vsel %vm448_vm0, %v595_v38, 0.0  ;;  %v699_v31 = vrot.slane %v3823_v39, 1  ;;  %v669_v23 = vsel %vm448_vm0, %v596_v25, 0.0 }
  0x51   : > { %3136 = vrsqrt.f32 %v690_v28  ;;  %v621_v4 = vadd.f32 %v620_v54, %v619_v9  ;;  %v666_v0 = vadd.f32 %v665_v51, %v664_v47  ;;  %v3840_v28 = vsub.s32 0, %v711_v22 }
  0x52   : > { %v657_v21 = vadd.f32 %v656_v46, %v655_v43  ;;  %v3843_v36 = vrot.slane %v766_v40, %v3825_v42  ;;  %v3846_v52 = vsub.f32 %v3639_v50, %v536_v27  ;;  %v598_v9 = vmul.f32 %v3832_v48, %v3832_v48 }
  0x53   : > { %v685_v62 = vmul.f32 0.015625, %v621_v4  ;;  %v668_v49 = vadd.f32 %v667_v53, %v666_v0  ;;  %v671_v30 = vsel %vm448_vm0, %v597_v29, 0.0  ;;  %v3852_v22 = vsub.f32 %v3642_v58, %v536_v27 }
  0x54   : > { %v658_v54 = vrot.slane %v657_v21, 4  ;;  %v3859_v50 = vrot.slane %v3843_v36, %v3840_v28  ;;  %v599_v40 = vmul.f32 %v3846_v52, %v3846_v52  ;;  %v673_v25 = vsel %vm448_vm0, %v598_v9, 0.0 }
  0x55   : > { %v689_v33 = vadd.f32 1e-05, %v685_v62  ;;  %v670_v44 = vadd.f32 %v669_v23, %v668_v49  ;;  %v600_v43 = vmul.f32 %v3852_v22, %v3852_v22 }
  0x56   : > { %v659_v47 = vadd.f32 %v658_v54, %v657_v21 }
  0x57   : > { %3138 = vrsqrt.f32 %v689_v33  ;;  %v672_v55 = vadd.f32 %v671_v30, %v670_v44 }
  0x58   : > { %v660_v49 = vrot.slane %v659_v47, 2 }
  0x59   : > { %v674_v29 = vadd.f32 %v673_v25, %v672_v55 }
  0x5a   : > { %v3906_v54 = vadd.f32 %v660_v49, %v659_v47  ;;  %v436_v49 = vld [vmem:[%s5084_s3 + $0x8] sm:$0xff] }
  0x5b   : > { %v3137_v32 = vpop.eup %3136 }
  0x5c   : > { %v707_v45 = vmul.f32 %v3137_v32, %v699_v31  ;;  %v677_v31 = vsel %vm448_vm0, %v600_v43, 0.0 }
  0x5e   : > { %v3855_v38 = vrot.slane %v707_v45, %v3840_v28 }
  0x60   : > { %v734_v4 = vmul.f32 %v3855_v38, %v3649_v8  ;;  %v735_v58 = vmul.f32 %v3855_v38, %v3652_v10  ;;  %v737_v27 = vmul.f32 %v3855_v38, %v3658_v15  ;;  %v736_v46 = vmul.f32 %v3855_v38, %v3655_v11 }
  0x61   : > { %v675_v10 = vsel %vm448_vm0, %v599_v40, 0.0  ;;  %v739_v15 = vmul.f32 %v3855_v38, %v3664_v18  ;;  %v3888_v11 = vrot.slane %v2748_v3, %v3825_v42  ;;  %v3139_v23 = vpop.eup %3138  ;;  %v738_v43 = vmul.f32 %v3855_v38, %v3661_v17 }
  0x62   : > { %v3875_v51 = vadd.f32 %v3859_v50, %v734_v4  ;;  %v3878_v53 = vadd.f32 %v3859_v50, %v735_v58  ;;  %v3881_v8 = vadd.f32 %v3859_v50, %v737_v27  ;;  %v3894_v21 = vadd.f32 %v3859_v50, %v736_v46 }
  0x63   : > { %v676_v9 = vadd.f32 %v675_v10, %v674_v29  ;;  %v706_v18 = vmul.f32 %v3139_v23, %v3823_v39  ;;  %v3898_v30 = vadd.f32 %v3859_v50, %v739_v15  ;;  %v3903_v44 = vrot.slane %v3888_v11, %v3840_v28 }
  0x64   : > { %v2757_v62 = vmul.f32 -1.442695, %v3875_v51  ;;  %v2758_v0 = vmul.f32 -1.442695, %v3878_v53  ;;  %v2760_v33 = vmul.f32 -1.442695, %v3881_v8  ;;  %v3935_v15 = vadd.f32 %v3859_v50, %v738_v43 }
  0x65   : > { %v678_v3 = vadd.f32 %v677_v31, %v676_v9  ;;  %v713_v32 = vrot.slane %v706_v18, %v3840_v28  ;;  %v2759_v45 = vmul.f32 -1.442695, %v3894_v21  ;;  %v2762_v27 = vmul.f32 -1.442695, %v3898_v30 }
  0x66   : > { %3140 = vpow2.f32 %v2757_v62 }
  0x67   : > { %3142 = vpow2.f32 %v2758_v0  ;;  %v726_v55 = vmul.f32 %v713_v32, %v3695_v57  ;;  %v727_v40 = vmul.f32 %v713_v32, %v3698_v59  ;;  %v729_v25 = vmul.f32 %v713_v32, %v3704_v61 }
  0x68   : > { %3144 = vpow2.f32 %v2760_v33  ;;  %v728_v4 = vmul.f32 %v713_v32, %v3701_v60  ;;  %v731_v58 = vmul.f32 %v713_v32, %v3711_v19  ;;  %v679_v46 = vrot.slane %v678_v3, 4  ;;  %v435_v33 = vld [vmem:[%s5084_s3] sm:$0xff] }
  0x69   : > { %v3917_v29 = vadd.f32 %v3903_v44, %v726_v55  ;;  %v3920_v47 = vadd.f32 %v3903_v44, %v727_v40  ;;  %v3923_v57 = vadd.f32 %v3903_v44, %v729_v25  ;;  %v730_v59 = vmul.f32 %v713_v32, %v3708_v6  ;;  %v437_v25 = vld [vmem:[%s5084_s3 + $0x10] sm:$0xff] }
  0x6a   : > { %v3927_v60 = vadd.f32 %v3903_v44, %v728_v4  ;;  %v741_v61 = vmul.f32 %v3855_v38, %v3683_v34  ;;  %3146 = vpow2.f32 %v2759_v45  ;;  %v733_v62 = vmul.f32 %v713_v32, %v3730_v26  ;;  %v438_v4 = vld [vmem:[%s5084_s3 + $0x18] sm:$0xff] }
  0x6b   : > { %v2749_v17 = vmul.f32 -1.442695, %v3917_v29  ;;  %v2750_v19 = vmul.f32 -1.442695, %v3920_v47  ;;  %v2752_v10 = vmul.f32 -1.442695, %v3923_v57  ;;  %3148 = vpow2.f32 %v2762_v27 }
  0x6c   : > { %v662_v6 = vrot.slane %v3906_v54, 1  ;;  %v3940_v31 = vadd.f32 %v3903_v44, %v731_v58  ;;  %v3943_v34 = vadd.f32 %v3903_v44, %v730_v59  ;;  %v680_v23 = vadd.f32 %v679_v46, %v678_v3 }
  0x6d   : > { %3150 = vpow2.f32 %v2749_v17  ;;  %v2751_v18 = vmul.f32 -1.442695, %v3927_v60  ;;  %v3092_v45 = vpack.c.bf16 %v436_v49, %v435_v33  ;;  %v3953_v40 = vadd.f32 %v3859_v50, %v741_v61  ;;  %v440_v33 = vld [vmem:[%s5084_s3 + $0x28] sm:$0xff] }
  0x6e   : > { %3152 = vpow2.f32 %v2750_v19  ;;  %v681_v3 = vrot.slane %v680_v23, 2  ;;  %v2761_v27 = vmul.f32 -1.442695, %v3935_v15  ;;  %v3963_v43 = vadd.f32 %v3903_v44, %v733_v62  ;;  %v439_v62 = vld [vmem:[%s5084_s3 + $0x20] sm:$0xff] }
  0x6f   : > { %3154 = vpow2.f32 %v2752_v10  ;;  %3093 = vmatprep.subr.bf16.mxu0 %v3092_v45  ;;  %v3096_v46 = vpack.c.bf16 %v438_v4, %v437_v25  ;;  %v2754_v59 = vmul.f32 -1.442695, %v3940_v31  ;;  %v732_v61 = vmul.f32 %v713_v32, %v3714_v12 }
  0x70   : > { %v3141_v0 = vpop.eup %3140  ;;  %v682_v17 = vadd.f32 %v681_v3, %v680_v23  ;;  %3095 = vmatpush3.bf16.msra.mxu0 %v3092_v45  ;;  %v2753_v19 = vmul.f32 -1.442695, %v3943_v34  ;;  %v2764_v10 = vmul.f32 -1.442695, %v3953_v40  ;;  %v3100_v23 = vpack.c.bf16 %v440_v33, %v439_v62 }
  0x71   : > { %v3143_v26 = vpop.eup %3142  ;;  %v939_v9 = vadd.f32 1.0, %v3141_v0  ;;  %3097 = vmatprep.subr.bf16.mxu0 %v3096_v46  ;;  %v740_v0 = vmul.f32 %v3855_v38, %v3675_v7  ;;  %v663_v7 = vadd.f32 %v662_v6, %v3906_v54 }
  0x72   : > { %v940_v55 = vadd.f32 1.0, %v3143_v26  ;;  %v3145_v58 = vpop.eup %3144  ;;  %v683_v32 = vrot.slane %v682_v17, 1  ;;  %v2756_v26 = vmul.f32 -1.442695, %v3963_v43 }
  0x73   : > { %3156 = vrcp.f32 %v939_v9  ;;  %v942_v12 = vadd.f32 1.0, %v3145_v58  ;;  %v3979_v9 = vadd.f32 %v3903_v44, %v732_v61  ;;  %v3983_v45 = vadd.f32 %v3859_v50, %v740_v0  ;;  %v442_v44 = vld [vmem:[%s5084_s3 + $0x38] sm:$0xff]  ;;  %v444_v0 = vld [vmem:[%s5084_s3 + $0x48] sm:$0xff] }
  0x74   : > { %3158 = vrcp.f32 %v940_v55  ;;  %v3147_v49 = vpop.eup %3146  ;;  %3099 = vmatpush3.bf16.msra.mxu0 %v3096_v46  ;;  %v441_v55 = vld [vmem:[%s5084_s3 + $0x30] sm:$0xff]  ;;  %v684_v54 = vadd.f32 %v683_v32, %v682_v17  ;;  %v687_v50 = vmul.f32 0.015625, %v663_v7  ;;  %v443_v17 = vld [vmem:[%s5084_s3 + $0x40] sm:$0xff]  ;;  %v446_v7 = vld [vmem:[%s5084_s3 + $0x58] sm:$0xff] }
  0x75   : > { %3160 = vpow2.f32 %v2751_v18  ;;  %v3149_v38 = vpop.eup %3148  ;;  %3101 = vmatprep.subr.bf16.mxu0 %v3100_v23  ;;  %v3104_v6 = vpack.c.bf16 %v442_v44, %v441_v55  ;;  %v941_v61 = vadd.f32 1.0, %v3147_v49  ;;  %v2763_v33 = vmul.f32 -1.442695, %v3983_v45 }
  0x76   : > { %3162 = vpow2.f32 %v2761_v27  ;;  %v2755_v27 = vmul.f32 -1.442695, %v3979_v9  ;;  %v3108_v32 = vpack.c.bf16 %v444_v0, %v443_v17  ;;  %v691_v49 = vadd.f32 1e-05, %v687_v50 }
  0x77   : > { %3164 = vpow2.f32 %v2754_v59  ;;  %v3151_v18 = vpop.eup %3150 }
  0x78   : > { %3166 = vpow2.f32 %v2753_v19  ;;  %v3153_v3 = vpop.eup %3152  ;;  %v931_v25 = vadd.f32 1.0, %v3151_v18  ;;  %3103 = vmatpush3.bf16.msra.mxu0 %v3100_v23 }
  0x79   : > { %3168 = vpow2.f32 %v2764_v10  ;;  %v3155_v4 = vpop.eup %3154  ;;  %v932_v58 = vadd.f32 1.0, %v3153_v3  ;;  %3105 = vmatprep.subr.bf16.mxu0 %v3104_v6 }
  0x7a   : > { %3170 = vrcp.f32 %v942_v12  ;;  %v934_v59 = vadd.f32 1.0, %v3155_v4  ;;  %v688_v12 = vmul.f32 0.015625, %v684_v54 }
  0x7b   : > { %3172 = vpow2.f32 %v2756_v26  ;;  %v445_v26 = vld [vmem:[%s5084_s3 + $0x50] sm:$0xff] }
  0x7c   : > { %3174 = vrcp.f32 %v931_v25  ;;  %3107 = vmatpush3.bf16.msra.mxu0 %v3104_v6  ;;  %v3112_v55 = vpack.c.bf16 %v446_v7, %v445_v26  ;;  %v692_v54 = vadd.f32 1e-05, %v688_v12 }
  0x7d   : > { %v3157_v46 = vpop.eup %3156  ;;  %3176 = vrcp.f32 %v932_v58  ;;  %3109 = vmatprep.subr.bf16.mxu0 %v3108_v32 }
  0x7e   : > { %v3159_v19 = vpop.eup %3158  ;;  %v3993_v10 = vmul.f32 %v3157_v46, %v3875_v51  ;;  %3178 = vrcp.f32 %v934_v59 }
  0x7f   : > { %v3161_v62 = vpop.eup %3160  ;;  %v4005_v51 = vmul.f32 %v3159_v19, %v3878_v53  ;;  %3180 = vpow2.f32 %v2755_v27  ;;  %v944_v53 = vadd.f32 1.0, %v3149_v38 }
  0x80   : > { %1188 = vrot.lane.b32.xlu1 %v3993_v10, %s3417_s25  ;;  %v933_v23 = vadd.f32 1.0, %v3161_v62  ;;  %v3163_v18 = vpop.eup %3162  ;;  %3182 = vrcp.f32 %v941_v61  ;;  %3111 = vmatpush3.bf16.msra.mxu0 %v3108_v32 }
  0x81   : > { %v3165_v44 = vpop.eup %3164  ;;  %3113 = vmatprep.subr.bf16.mxu0 %v3112_v55  ;;  %v943_v50 = vadd.f32 1.0, %v3163_v18  ;;  %v701_v18 = vrot.slane %v3823_v39, 3 }
  0x82   : > { %3184 = vrcp.f32 %v933_v23  ;;  %v3167_v3 = vpop.eup %3166  ;;  %v936_v25 = vadd.f32 1.0, %v3165_v44 }
  0x83   : > { %3186 = vpow2.f32 %v2763_v33  ;;  %v3169_v6 = vpop.eup %3168  ;;  %v935_v58 = vadd.f32 1.0, %v3167_v3 }
  0x84   : > { %1190 = vrot.lane.b32.xlu1 %v4005_v51, %s3417_s25  ;;  %3188 = vrsqrt.f32 %v691_v49  ;;  %v3171_v4 = vpop.eup %3170  ;;  %3115 = vmatpush3.bf16.msra.mxu0 %v3112_v55  ;;  %v946_v33 = vadd.f32 1.0, %v3169_v6  ;;  %v782_v6 = vcombine.high %v3843_v36, %v3843_v36 }
  0x85   : > { %3190 = vrcp.f32 %v936_v25  ;;  %v3173_v27 = vpop.eup %3172  ;;  %v4030_v23 = vmul.f32 %v3171_v4, %v3881_v8 }
  0x86   : > { %3192 = vrcp.f32 %v944_v53  ;;  %v3175_v46 = vpop.eup %3174  ;;  %v938_v59 = vadd.f32 1.0, %v3173_v27 }
  0x87   : > { %3194 = vrsqrt.f32 %v692_v54  ;;  %v3177_v38 = vpop.eup %3176  ;;  %v4016_v61 = vmul.f32 %v3175_v46, %v3917_v29  ;;  %v700_v29 = vrot.slane %v3823_v39, 2 }
  0x88   : > { %v3179_v19 = vpop.eup %3178  ;;  %3196 = vrcp.f32 %v935_v58  ;;  %v4021_v0 = vmul.f32 %v3177_v38, %v3920_v47  ;;  %v781_v47 = vcombine.high %v3888_v11, %v3888_v11 }
  0x89   : > { %v3181_v17 = vpop.eup %3180  ;;  %1091 = vrot.lane.b32.xlu0 %v4016_v61, %s3418_s12  ;;  %v4024_v62 = vmul.f32 %v3179_v19, %v3923_v57  ;;  %3198 = vrcp.f32 %v943_v50 }
  0x8a   : > { %v3183_v12 = vpop.eup %3182  ;;  %3200 = vrcp.f32 %v938_v59  ;;  %v937_v26 = vadd.f32 1.0, %v3181_v17 }
  0x8b   : > { %1097 = vrot.lane.b32.xlu1 %v4024_v62, %s3418_s12  ;;  %3202 = vrcp.f32 %v946_v33  ;;  %v4052_v39 = vmul.f32 %v3183_v12, %v3894_v21 }
  0x8c   : > { %v3185_v32 = vpop.eup %3184  ;;  %3204 = vrcp.f32 %v937_v26 }
  0x8d   : > { %v3187_v49 = vpop.eup %3186  ;;  %1093 = vrot.lane.b32.xlu0 %v4021_v0, %s3418_s12  ;;  %v4037_v7 = vmul.f32 %v3185_v32, %v3927_v60  ;;  %v4047_v60 = vrot.slane %v781_v47, %v3840_v28 }
  0x8e   : > { %v3189_v57 = vpop.eup %3188  ;;  %v945_v11 = vadd.f32 1.0, %v3187_v49 }
  0x8f   : > { %v3191_v55 = vpop.eup %3190  ;;  %v708_v44 = vmul.f32 %v3189_v57, %v700_v29  ;;  %1194 = vrot.lane.b32.xlu1 %v4030_v23, %s3417_s25 }
  0x90   : > { %v3193_v53 = vpop.eup %3192  ;;  %v4043_v8 = vmul.f32 %v3191_v55, %v3940_v31  ;;  %3206 = vrcp.f32 %v945_v11 }
  0x91   : > { %v3195_v3 = vpop.eup %3194  ;;  %v721_v25 = vrot.slane %v708_v44, %v3840_v28  ;;  %1095 = vrot.lane.b32.xlu0 %v4037_v7, %s3418_s12  ;;  %v4063_v21 = vmul.f32 %v3193_v53, %v3898_v30 }
  0x92   : > { %v709_v54 = vmul.f32 %v3195_v3, %v701_v18  ;;  %v3197_v31 = vpop.eup %3196 }
  0x93   : > { %v743_v4 = vmul.f32 %v721_v25, %v3747_v56  ;;  %v742_v58 = vmul.f32 %v721_v25, %v3744_v5  ;;  %v745_v27 = vmul.f32 %v721_v25, %v3753_v14  ;;  %v744_v50 = vmul.f32 %v721_v25, %v3750_v13  ;;  %v3199_v46 = vpop.eup %3198  ;;  %1101 = vrot.lane.b32.xlu1 %v4043_v8, %s3418_s12 }
  0x94   : > { %v747_v59 = vmul.f32 %v721_v25, %v3760_v24  ;;  %v746_v36 = vmul.f32 %v721_v25, %v3756_v16  ;;  %v3201_v38 = vpop.eup %3200  ;;  %v4082_v24 = vmul.f32 %v3197_v31, %v3943_v34  ;;  %v798_v16 = vrot.slane %v782_v6, %v3840_v28 }
  0x95   : > { %v4068_v56 = vadd.f32 %v4047_v60, %v743_v4  ;;  %v4071_v5 = vadd.f32 %v4047_v60, %v742_v58  ;;  %v4074_v13 = vadd.f32 %v4047_v60, %v745_v27  ;;  %v4077_v14 = vadd.f32 %v4047_v60, %v744_v50  ;;  %1192 = vrot.lane.b32.xlu0 %v4052_v39, %s3417_s25  ;;  %v3203_v12 = vpop.eup %3202 }
  0x96   : > { %v725_v33 = vrot.slane %v709_v54, %v3840_v28  ;;  %v4092_v29 = vmul.f32 %v3199_v46, %v3935_v15  ;;  %v4095_v34 = vmul.f32 %v3201_v38, %v3963_v43  ;;  %v4099_v49 = vadd.f32 %v4047_v60, %v747_v59  ;;  %v3205_v18 = vpop.eup %3204 }
  0x97   : > { %v2766_v30 = vmul.f32 -1.442695, %v4068_v56  ;;  %v2765_v19 = vmul.f32 -1.442695, %v4071_v5  ;;  %v2768_v17 = vmul.f32 -1.442695, %v4074_v13  ;;  %1198 = vrot.lane.b32.xlu1 %v4063_v21, %s3417_s25  ;;  %v4102_v47 = vadd.f32 %v4047_v60, %v746_v36 }
  0x98   : > { %v2767_v32 = vmul.f32 -1.442695, %v4077_v14  ;;  %v751_v26 = vmul.f32 %v725_v33, %v3803_v35  ;;  %v750_v15 = vmul.f32 %v725_v33, %v3800_v41  ;;  %v753_v43 = vmul.f32 %v725_v33, %v3809_v2 }
  0x99   : > { %3208 = vpow2.f32 %v2766_v30  ;;  %1099 = vrot.lane.b32.xlu0 %v4082_v24, %s3418_s12  ;;  %v752_v57 = vmul.f32 %v725_v33, %v3806_v1  ;;  %v4111_v55 = vmul.f32 %v3203_v12, %v3953_v40  ;;  %v749_v44 = vmul.f32 %v721_v25, %v3786_v63 }
  0x9a   : > { %3210 = vpow2.f32 %v2765_v19  ;;  %v4114_v53 = vadd.f32 %v798_v16, %v751_v26  ;;  %v4118_v35 = vadd.f32 %v798_v16, %v750_v15  ;;  %v4120_v41 = vadd.f32 %v798_v16, %v753_v43  ;;  %v3207_v3 = vpop.eup %3206 }
  0x9b   : > { %3212 = vpow2.f32 %v2768_v17  ;;  %1105 = vrot.lane.b32.xlu1 %v4095_v34, %s3418_s12  ;;  %v4122_v2 = vadd.f32 %v798_v16, %v752_v57  ;;  %v2770_v1 = vmul.f32 -1.442695, %v4099_v49  ;;  %v748_v40 = vmul.f32 %v721_v25, %v3776_v20 }
  0x9c   : > { %3214 = vpow2.f32 %v2767_v32  ;;  %v755_v11 = vmul.f32 %v725_v33, %v3832_v48  ;;  %v754_v63 = vmul.f32 %v725_v33, %v3815_v37  ;;  %v4131_v54 = vmul.f32 %v3205_v18, %v3979_v9 }
  0x9d   : > { %1196 = vrot.lane.b32.xlu0 %v4092_v29, %s3417_s25  ;;  %v2769_v6 = vmul.f32 -1.442695, %v4102_v47  ;;  %v757_v58 = vmul.f32 %v725_v33, %v3852_v22  ;;  %v4142_v20 = vadd.f32 %v4047_v60, %v749_v44  ;;  %v756_v37 = vmul.f32 %v725_v33, %v3846_v52 }
  0x9e   : > { %v4134_v31 = vadd.f32 %v798_v16, %v755_v11  ;;  %v4136_v4 = vadd.f32 %v798_v16, %v754_v63  ;;  %3216 = vpow2.f32 %v2770_v1  ;;  %v4146_v48 = vadd.f32 %v4047_v60, %v748_v40 }
  0x9f   : > { %1202 = vrot.lane.b32.xlu1 %v4111_v55, %s3417_s25  ;;  %v4148_v9 = vadd.f32 %v798_v16, %v757_v58  ;;  %v4153_v25 = vmul.f32 %v3207_v3, %v3983_v45  ;;  %3218 = vpow2.f32 %v2769_v6  ;;  %v4155_v22 = vadd.f32 %v798_v16, %v756_v37 }
  0xa0   : > { %v2772_v60 = vmul.f32 -1.442695, %v4142_v20  ;;  %v2771_v36 = vmul.f32 -1.442695, %v4146_v48  ;;  %v2774_v17 = vmul.f32 -1.442695, %v4114_v53 }
  0xa1   : > { %1103 = vrot.lane.b32.xlu0 %v4131_v54, %s3418_s12  ;;  %v2773_v33 = vmul.f32 -1.442695, %v4118_v35  ;;  %v2776_v1 = vmul.f32 -1.442695, %v4120_v41 }
  0xa3   : > { %v3209_v27 = vpop.eup %3208  ;;  %1109 = vrot.lane.b32.xlu1 %v4005_v51, %s3418_s12 }
  0xa4   : > { %v3211_v50 = vpop.eup %3210  ;;  %v948_v52 = vadd.f32 1.0, %v3209_v27 }
  0xa5   : > { %v3213_v46 = vpop.eup %3212  ;;  %v947_v59 = vadd.f32 1.0, %v3211_v50  ;;  %1200 = vrot.lane.b32.xlu0 %v4153_v25, %s3417_s25 }
  0xa6   : > { %v3215_v38 = vpop.eup %3214  ;;  %3220 = vrcp.f32 %v948_v52  ;;  %v950_v45 = vadd.f32 1.0, %v3213_v46 }
  0xa7   : > { %3222 = vrcp.f32 %v947_v59  ;;  %v949_v16 = vadd.f32 1.0, %v3215_v38 }
  0xa8   : > { %3224 = vpow2.f32 %v2772_v60  ;;  %v3217_v30 = vpop.eup %3216  ;;  %v2777_v60 = vmul.f32 -1.442695, %v4136_v4 }
  0xa9   : > { %3226 = vpow2.f32 %v2771_v36  ;;  %1107 = vrot.lane.b32.xlu0 %v3993_v10, %s3418_s12  ;;  %v3219_v19 = vpop.eup %3218  ;;  %v952_v12 = vadd.f32 1.0, %v3217_v30  ;;  %v2780_v30 = vmul.f32 -1.442695, %v4148_v9 }
  0xaa   : > { %3228 = vrcp.f32 %v950_v45  ;;  %v951_v32 = vadd.f32 1.0, %v3219_v19 }
  0xab   : > { %3230 = vrcp.f32 %v949_v16 }
  0xac   : > { %3232 = vpow2.f32 %v2774_v17 }
  0xad   : > { %3234 = vpow2.f32 %v2773_v33 }
  0xae   : > { %3236 = vrcp.f32 %v952_v12 }
  0xaf   : > { %3238 = vrcp.f32 %v951_v32 }
  0xb0   : > { %v3221_v26 = vpop.eup %3220  ;;  %3240 = vpow2.f32 %v2776_v1 }
  0xb1   : > { %v3223_v15 = vpop.eup %3222  ;;  %v4168_v43 = vmul.f32 %v3221_v26, %v4068_v56  ;;  %v2775_v56 = vmul.f32 -1.442695, %v4122_v2 }
  0xb2   : > { %v3225_v57 = vpop.eup %3224  ;;  %v4171_v18 = vmul.f32 %v3223_v15, %v4071_v5 }
  0xb3   : > { %v3227_v44 = vpop.eup %3226  ;;  %1206 = vrot.lane.b32.xlu1 %v4168_v43, %s3417_s25  ;;  %v954_v63 = vadd.f32 1.0, %v3225_v57  ;;  %3242 = vpow2.f32 %v2775_v56 }
  0xb4   : > { %v3229_v40 = vpop.eup %3228  ;;  %1204 = vrot.lane.b32.xlu0 %v4171_v18, %s3417_s25  ;;  %v953_v3 = vadd.f32 1.0, %v3227_v44 }
  0xb5   : > { %v3231_v11 = vpop.eup %3230  ;;  %v4182_v5 = vmul.f32 %v3229_v40, %v4074_v13  ;;  %3244 = vrcp.f32 %v954_v63  ;;  %v2778_v13 = vmul.f32 -1.442695, %v4134_v31 }
  0xb6   : > { %v4187_v6 = vmul.f32 %v3231_v11, %v4077_v14  ;;  %v3233_v58 = vpop.eup %3232  ;;  %3246 = vrcp.f32 %v953_v3 }
  0xb7   : > { %1113 = vrot.lane.b32.xlu1 %v4030_v23, %s3418_s12  ;;  %v3235_v37 = vpop.eup %3234  ;;  %v956_v52 = vadd.f32 1.0, %v3233_v58  ;;  %3248 = vpow2.f32 %v2778_v13 }
  0xb8   : > { %1111 = vrot.lane.b32.xlu0 %v4052_v39, %s3418_s12  ;;  %v3237_v27 = vpop.eup %3236  ;;  %v955_v46 = vadd.f32 1.0, %v3235_v37 }
  0xb9   : > { %v3239_v50 = vpop.eup %3238  ;;  %v4198_v14 = vmul.f32 %v3237_v27, %v4099_v49  ;;  %3250 = vrcp.f32 %v956_v52  ;;  %v3419_v52 = vmov 0.0  }
  0xba   : > { %v4203_v59 = vmul.f32 %v3239_v50, %v4102_v47  ;;  %v3241_v36 = vpop.eup %3240  ;;  %3252 = vpow2.f32 %v2777_v60  ;;  %v2779_v47 = vmul.f32 -1.442695, %v4155_v22 }
  0xbb   : > { %1210 = vrot.lane.b32.xlu1 %v4182_v5, %s3417_s25  ;;  %3254 = vrcp.f32 %v955_v46  ;;  %v958_v49 = vadd.f32 1.0, %v3241_v36 }
  0xbc   : > { %1208 = vrot.lane.b32.xlu0 %v4187_v6, %s3417_s25 }
  0xbd   : > { %v3243_v38 = vpop.eup %3242  ;;  %3256 = vrcp.f32 %v958_v49 }
  0xbe   : > { %v957_v17 = vadd.f32 1.0, %v3243_v38  ;;  %3258 = vpow2.f32 %v2780_v30 }
  0xbf   : > { %1117 = vrot.lane.b32.xlu1 %v4063_v21, %s3418_s12  ;;  %v3245_v45 = vpop.eup %3244  ;;  %3260 = vpow2.f32 %v2779_v47 }
  0xc0   : > { %1115 = vrot.lane.b32.xlu0 %v4092_v29, %s3418_s12  ;;  %v3247_v16 = vpop.eup %3246  ;;  %v4214_v19 = vmul.f32 %v3245_v45, %v4142_v20  ;;  %3262 = vrcp.f32 %v957_v17 }
  0xc1   : > { %v4219_v33 = vmul.f32 %v3247_v16, %v4146_v48  ;;  %v3249_v12 = vpop.eup %3248 }
  0xc2   : > { %v960_v15 = vadd.f32 1.0, %v3249_v12 }
  0xc3   : > { %1214 = vrot.lane.b32.xlu1 %v4198_v14, %s3417_s25  ;;  %v3251_v32 = vpop.eup %3250 }
  0xc4   : > { %1212 = vrot.lane.b32.xlu0 %v4203_v59, %s3417_s25  ;;  %v3253_v26 = vpop.eup %3252  ;;  %v1052_v48 = vmul.f32 %v3251_v32, %v4114_v53  ;;  %3264 = vrcp.f32 %v960_v15 }
  0xc5   : > { %v3255_v20 = vpop.eup %3254  ;;  %v959_v57 = vadd.f32 1.0, %v3253_v26 }
  0xc6   : > { %v1051_v44 = vmul.f32 %v3255_v20, %v4118_v35 }
  0xc7   : > { %1121 = vrot.lane.b32.xlu1 %v4111_v55, %s3418_s12  ;;  %v3257_v1 = vpop.eup %3256  ;;  %3266 = vrcp.f32 %v959_v57 }
  0xc8   : > { %1119 = vrot.lane.b32.xlu0 %v4153_v25, %s3418_s12  ;;  %v3259_v40 = vpop.eup %3258  ;;  %v1054_v53 = vmul.f32 %v3257_v1, %v4120_v41 }
  0xc9   : > { %v3261_v11 = vpop.eup %3260  ;;  %v962_v63 = vadd.f32 1.0, %v3259_v40 }
  0xca   : > { %v3263_v56 = vpop.eup %3262  ;;  %v961_v3 = vadd.f32 1.0, %v3261_v11 }
  0xcb   : > { %1218 = vrot.lane.b32.xlu1 %v4214_v19, %s3417_s25  ;;  %v1053_v35 = vmul.f32 %v3263_v56, %v4122_v2  ;;  %3268 = vrcp.f32 %v962_v63 }
  0xcc   : > { %1216 = vrot.lane.b32.xlu0 %v4219_v33, %s3417_s25  ;;  %3270 = vrcp.f32 %v961_v3 }
  0xce   : > { %v3265_v58 = vpop.eup %3264 }
  0xcf   : > { %1125 = vrot.lane.b32.xlu1 %v4168_v43, %s3418_s12  ;;  %v1056_v27 = vmul.f32 %v3265_v58, %v4134_v31 }
  0xd0   : > { %1123 = vrot.lane.b32.xlu0 %v4171_v18, %s3418_s12 }
  0xd1   : > { %v3267_v37 = vpop.eup %3266 }
  0xd2   : > { %v1055_v41 = vmul.f32 %v3267_v37, %v4136_v4 }
  0xd3   : > { %1222 = vrot.lane.b32.xlu1 %v1052_v48, %s3417_s25 }
  0xd4   : > { %1220 = vrot.lane.b32.xlu0 %v1051_v44, %s3417_s25 }
  0xd5   : > { %v3269_v2 = vpop.eup %3268 }
  0xd6   : > { %v3271_v13 = vpop.eup %3270  ;;  %v1058_v50 = vmul.f32 %v3269_v2, %v4148_v9 }
  0xd7   : > { %1129 = vrot.lane.b32.xlu1 %v4182_v5, %s3418_s12  ;;  %v1057_v31 = vmul.f32 %v3271_v13, %v4155_v22 }
  0xd8   : > { %1127 = vrot.lane.b32.xlu0 %v4187_v6, %s3418_s12 }
  0xdb   : > { %1226 = vrot.lane.b32.xlu1 %v1054_v53, %s3417_s25 }
  0xdc   : > { %1224 = vrot.lane.b32.xlu0 %v1053_v35, %s3417_s25 }
  0xdf   : > { %1133 = vrot.lane.b32.xlu1 %v4198_v14, %s3418_s12 }
  0xe0   : > { %1131 = vrot.lane.b32.xlu0 %v4203_v59, %s3418_s12 }
  0xe3   : > { %1230 = vrot.lane.b32.xlu1 %v1056_v27, %s3417_s25 }
  0xe4   : > { %1228 = vrot.lane.b32.xlu0 %v1055_v41, %s3417_s25 }
  0xe7   : > { %1137 = vrot.lane.b32.xlu1 %v4214_v19, %s3418_s12 }
  0xe8   : > { %1135 = vrot.lane.b32.xlu0 %v4219_v33, %s3418_s12 }
  0xeb   : > { %1234 = vrot.lane.b32.xlu1 %v1058_v50, %s3417_s25 }
  0xec   : > { %1232 = vrot.lane.b32.xlu0 %v1057_v31, %s3417_s25 }
  0xef   : > { %1141 = vrot.lane.b32.xlu1 %v1052_v48, %s3418_s12 }
  0xf0   : > { %1139 = vrot.lane.b32.xlu0 %v1051_v44, %s3418_s12 }
  0xf2   : > { %v1189_v4 = vpop.permute.xlu1 %1188 }
  0xf3   : > { %1143 = vrot.lane.b32.xlu1 %v1053_v35, %s3418_s12 }
  0xf4   : > { %1236 = vrot.lane.b32.xlu0 %v3419_v52, %s3417_s25 }
  0xf6   : > { %v1191_v9 = vpop.permute.xlu1 %1190 }
  0xf7   : > { %1147 = vrot.lane.b32.xlu1 %v1055_v41, %s3418_s12 }
  0xf8   : > { %1145 = vrot.lane.b32.xlu0 %v1054_v53, %s3418_s12 }
  0xfb   : > { %1151 = vrot.lane.b32.xlu1 %v1057_v31, %s3418_s12  ;;  %v1092_v22 = vpop.permute.xlu0 %1091 }
  0xfc   : > { %1149 = vrot.lane.b32.xlu0 %v1056_v27, %s3418_s12  ;;  %v1263_v60 = vsel %vm448_vm0, 0.0, %v1092_v22 }
  0xfd   : > { %v1296_v46 = vsel %vm1295_vm1, %v1263_v60, %v1189_v4  ;;  %v1098_v36 = vpop.permute.xlu1 %1097 }
  0xfe   : > { %2988 = vmatprep.mubr.msk.f32.mxu0 %vm1334_vm2, %v1296_v46  ;;  %v1266_v47 = vsel %vm448_vm0, 0.0, %v1098_v36 }
  0xff   : > { %v1094_v38 = vpop.permute.xlu0 %1093 }
 0x100   : > { %1153 = vrot.lane.b32.xlu0 %v1058_v50, %s3418_s12  ;;  %v1264_v45 = vsel %vm448_vm0, 0.0, %v1094_v38 }
 0x101   : > { %v1297_v49 = vsel %vm1295_vm1, %v1264_v45, %v1191_v9  ;;  %v1195_v16 = vpop.permute.xlu1 %1194 }
 0x102   : > { %2989 = vmatmul.mubr.msk.f32.vlgmr.msra.gmra.mrb[0].mxu0 %vm1334_vm2, %v1297_v49  ;;  %v1299_v32 = vsel %vm1295_vm1, %v1266_v47, %v1195_v16 }
 0x103   : > { %v1096_v30 = vpop.permute.xlu0 %1095 }
 0x104   : > { %v1265_v12 = vsel %vm448_vm0, 0.0, %v1096_v30 }
 0x105   : > { %v1102_v17 = vpop.permute.xlu1 %1101 }
 0x106   : > { %v1268_v57 = vsel %vm448_vm0, 0.0, %v1102_v17 }
 0x107   : > { %v1193_v26 = vpop.permute.xlu0 %1192 }
 0x108   : > { %v1298_v20 = vsel %vm1295_vm1, %v1265_v12, %v1193_v26 }
 0x109   : > { %2991 = vmatprep.mubr.msk.f32.mxu0 %vm1334_vm2, %v1298_v20  ;;  %v1199_v15 = vpop.permute.xlu1 %1198 }
 0x10a   : > { %2992 = vmatmul.mubr.msk.f32.gmra.mrb[2].mxu0 %vm1334_vm2, %v1299_v32  ;;  %v1301_v40 = vsel %vm1295_vm1, %v1268_v57, %v1199_v15 }
 0x10b   : > { %v1100_v48 = vpop.permute.xlu0 %1099 }
 0x10c   : > { %v1267_v1 = vsel %vm448_vm0, 0.0, %v1100_v48 }
 0x10d   : > { %v1106_v44 = vpop.permute.xlu1 %1105 }
 0x10e   : > { %v1270_v53 = vsel %vm448_vm0, 0.0, %v1106_v44 }
 0x10f   : > { %v1197_v11 = vpop.permute.xlu0 %1196 }
 0x110   : > { %v1300_v56 = vsel %vm1295_vm1, %v1267_v1, %v1197_v11 }
 0x111   : > { %2994 = vmatprep.mubr.msk.f32.mxu0 %vm1334_vm2, %v1300_v56  ;;  %v1203_v3 = vpop.permute.xlu1 %1202 }
 0x112   : > { %2995 = vmatmul.mubr.msk.f32.gmra.mrb[4].mxu0 %vm1334_vm2, %v1301_v40  ;;  %v1303_v58 = vsel %vm1295_vm1, %v1270_v53, %v1203_v3 }
 0x113   : > { %v1104_v63 = vpop.permute.xlu0 %1103 }
 0x114   : > { %v1269_v35 = vsel %vm448_vm0, 0.0, %v1104_v63 }
 0x115   : > { %v1110_v41 = vpop.permute.xlu1 %1109 }
 0x116   : > { %v1272_v13 = vsel %vm448_vm0, %v4021_v0, %v1110_v41 }
 0x117   : > { %v1201_v37 = vpop.permute.xlu0 %1200 }
 0x118   : > { %v1302_v27 = vsel %vm1295_vm1, %v1269_v35, %v1201_v37 }
 0x119   : > { %2997 = vmatprep.mubr.msk.f32.mxu0 %vm1334_vm2, %v1302_v27 }
 0x11a   : > { %2998 = vmatmul.mubr.msk.f32.gmra.mrb[6].mxu0 %vm1334_vm2, %v1303_v58 }
 0x11b   : > { %v1108_v2 = vpop.permute.xlu0 %1107 }
 0x11c   : > { %v1271_v31 = vsel %vm448_vm0, %v4016_v61, %v1108_v2 }
 0x125   : > { %v1207_v50 = vpop.permute.xlu1 %1206 }
 0x126   : > { %v1305_v4 = vsel %vm1295_vm1, %v1272_v13, %v1207_v50  ;;  %v1205_v52 = vpop.permute.xlu0 %1204 }
 0x127   : > { %v1304_v9 = vsel %vm1295_vm1, %v1271_v31, %v1205_v52 }
 0x128   : > { %3000 = vmatprep.mubr.msk.f32.mxu0 %vm1334_vm2, %v1304_v9 }
 0x129   : > { %3001 = vmatmul.mubr.msk.f32.gmra.mrb[8].mxu0 %vm1334_vm2, %v1305_v4  ;;  %v1114_v22 = vpop.permute.xlu1 %1113 }
 0x12a   : > { %v1112_v60 = vpop.permute.xlu0 %1111  ;;  %v1274_v46 = vsel %vm448_vm0, %v4024_v62, %v1114_v22 }
 0x12b   : > { %v1273_v0 = vsel %vm448_vm0, %v4037_v7, %v1112_v60 }
 0x12d   : > { %v1211_v36 = vpop.permute.xlu1 %1210 }
 0x12e   : > { %v1307_v61 = vsel %vm1295_vm1, %v1274_v46, %v1211_v36  ;;  %v1209_v38 = vpop.permute.xlu0 %1208 }
 0x12f   : > { %v1306_v45 = vsel %vm1295_vm1, %v1273_v0, %v1209_v38 }
 0x130   : > { %3003 = vmatprep.mubr.msk.f32.mxu0 %vm1334_vm2, %v1306_v45 }
 0x131   : > { %3004 = vmatmul.mubr.msk.f32.gmra.mrb[10].mxu0 %vm1334_vm2, %v1307_v61  ;;  %v1118_v49 = vpop.permute.xlu1 %1117 }
 0x132   : > { %v1116_v16 = vpop.permute.xlu0 %1115  ;;  %v1276_v30 = vsel %vm448_vm0, %v4043_v8, %v1118_v49 }
 0x133   : > { %v1275_v62 = vsel %vm448_vm0, %v4082_v24, %v1116_v16 }
 0x135   : > { %v1215_v47 = vpop.permute.xlu1 %1214 }
 0x136   : > { %v1309_v7 = vsel %vm1295_vm1, %v1276_v30, %v1215_v47  ;;  %v1213_v17 = vpop.permute.xlu0 %1212 }
 0x137   : > { %v1308_v12 = vsel %vm1295_vm1, %v1275_v62, %v1213_v17 }
 0x138   : > { %3006 = vmatprep.mubr.msk.f32.mxu0 %vm1334_vm2, %v1308_v12 }
 0x139   : > { %3007 = vmatmul.mubr.msk.f32.gmra.mrb[12].mxu0 %vm1334_vm2, %v1309_v7  ;;  %v1122_v32 = vpop.permute.xlu1 %1121 }
 0x13a   : > { %v1120_v26 = vpop.permute.xlu0 %1119  ;;  %v1278_v20 = vsel %vm448_vm0, %v4095_v34, %v1122_v32 }
 0x13b   : > { %v1277_v8 = vsel %vm448_vm0, %v4131_v54, %v1120_v26 }
 0x13d   : > { %v1219_v15 = vpop.permute.xlu1 %1218 }
 0x13e   : > { %v1311_v24 = vsel %vm1295_vm1, %v1278_v20, %v1219_v15  ;;  %v1217_v48 = vpop.permute.xlu0 %1216 }
 0x13f   : > { %v1310_v57 = vsel %vm1295_vm1, %v1277_v8, %v1217_v48 }
 0x140   : > { %3009 = vmatprep.mubr.msk.f32.mxu0 %vm1334_vm2, %v1310_v57 }
 0x141   : > { %3010 = vmatmul.mubr.msk.f32.gmra.mrb[14].mxu0 %vm1334_vm2, %v1311_v24  ;;  %v1126_v44 = vpop.permute.xlu1 %1125 }
 0x142   : > { %v1124_v1 = vpop.permute.xlu0 %1123  ;;  %v1280_v40 = vsel %vm448_vm0, %v4005_v51, %v1126_v44 }
 0x143   : > { %v1279_v34 = vsel %vm448_vm0, %v3993_v10, %v1124_v1 }
 0x145   : > { %v1223_v11 = vpop.permute.xlu1 %1222 }
 0x146   : > { %v1313_v54 = vsel %vm1295_vm1, %v1280_v40, %v1223_v11  ;;  %v1221_v56 = vpop.permute.xlu0 %1220  ;;  %v1658_v11 = vld [vmem:[%s5088_s7] sm:$0xff] }
 0x147   : > { %v1312_v63 = vsel %vm1295_vm1, %v1279_v34, %v1221_v56  ;;  %v1659_v34 = vld [vmem:[%s5088_s7 + $0x8] sm:$0xff] }
 0x148   : > { %3012 = vmatprep.mubr.msk.f32.mxu0 %vm1334_vm2, %v1312_v63  ;;  %v3116_v56 = vpack.c.bf16 %v1659_v34, %v1658_v11 }
 0x149   : > { %3013 = vmatmul.mubr.msk.f32.gmra.mrb[16].mxu0 %vm1334_vm2, %v1313_v54  ;;  %v1130_v53 = vpop.permute.xlu1 %1129 }
 0x14a   : > { %v1128_v3 = vpop.permute.xlu0 %1127  ;;  %v1282_v35 = vsel %vm448_vm0, %v4030_v23, %v1130_v53  ;;  %3117 = vmatprep.subr.bf16.mxu1 %v3116_v56 }
 0x14b   : > { %v1281_v51 = vsel %vm448_vm0, %v4052_v39, %v1128_v3  ;;  %3119 = vmatpush3.bf16.msra.mxu1 %v3116_v56 }
 0x14d   : > { %v1227_v58 = vpop.permute.xlu1 %1226 }
 0x14e   : > { %v1315_v10 = vsel %vm1295_vm1, %v1282_v35, %v1227_v58  ;;  %v1225_v37 = vpop.permute.xlu0 %1224  ;;  %v1660_v35 = vld [vmem:[%s5088_s7 + $0x10] sm:$0xff]  ;;  %v1661_v58 = vld [vmem:[%s5088_s7 + $0x18] sm:$0xff] }
 0x14f   : > { %v1314_v27 = vsel %vm1295_vm1, %v1281_v51, %v1225_v37 }
 0x150   : > { %3015 = vmatprep.mubr.msk.f32.mxu0 %vm1334_vm2, %v1314_v27 }
 0x151   : > { %3016 = vmatmul.mubr.msk.f32.gmra.mrb[18].mxu0 %vm1334_vm2, %v1315_v10  ;;  %v1134_v41 = vpop.permute.xlu1 %1133  ;;  %v3120_v10 = vpack.c.bf16 %v1661_v58, %v1660_v35 }
 0x152   : > { %v1132_v2 = vpop.permute.xlu0 %1131  ;;  %v1284_v13 = vsel %vm448_vm0, %v4063_v21, %v1134_v41 }
 0x153   : > { %v1283_v23 = vsel %vm448_vm0, %v4092_v29, %v1132_v2  ;;  %3121 = vmatprep.subr.bf16.mxu1 %v3120_v10 }
 0x154   : > { %3123 = vmatpush3.bf16.msra.mxu1 %v3120_v10 }
 0x155   : > { %v1231_v50 = vpop.permute.xlu1 %1230 }
 0x156   : > { %v1317_v39 = vsel %vm1295_vm1, %v1284_v13, %v1231_v50  ;;  %v1229_v31 = vpop.permute.xlu0 %1228 }
 0x157   : > { %v1316_v4 = vsel %vm1295_vm1, %v1283_v23, %v1229_v31 }
 0x158   : > { %3018 = vmatprep.mubr.msk.f32.mxu0 %vm1334_vm2, %v1316_v4 }
 0x159   : > { %3019 = vmatmul.mubr.msk.f32.gmra.mrb[20].mxu0 %vm1334_vm2, %v1317_v39  ;;  %v1138_v52 = vpop.permute.xlu1 %1137 }
 0x15a   : > { %v1136_v9 = vpop.permute.xlu0 %1135  ;;  %v1286_v22 = vsel %vm448_vm0, %v4111_v55, %v1138_v52 }
 0x15b   : > { %v1285_v21 = vsel %vm448_vm0, %v4153_v25, %v1136_v9 }
 0x15d   : > { %v1235_v60 = vpop.permute.xlu1 %1234 }
 0x15e   : > { %v1319_v29 = vsel %vm1295_vm1, %v1286_v22, %v1235_v60  ;;  %v1233_v46 = vpop.permute.xlu0 %1232 }
 0x15f   : > { %v1318_v36 = vsel %vm1295_vm1, %v1285_v21, %v1233_v46 }
 0x160   : > { %3021 = vmatprep.mubr.msk.f32.mxu0 %vm1334_vm2, %v1318_v36 }
 0x161   : > { %3022 = vmatmul.mubr.msk.f32.gmra.mrb[22].mxu0 %vm1334_vm2, %v1319_v29  ;;  %v1142_v0 = vpop.permute.xlu1 %1141 }
 0x162   : > { %v1140_v61 = vpop.permute.xlu0 %1139  ;;  %v1288_v38 = vsel %vm448_vm0, %v4168_v43, %v1142_v0 }
 0x163   : > { %v1287_v55 = vsel %vm448_vm0, %v4171_v18, %v1140_v61 }
 0x165   : > { %v1144_v45 = vpop.permute.xlu1 %1143 }
 0x166   : > { %v1289_v25 = vsel %vm448_vm0, %v4187_v6, %v1144_v45  ;;  %v1237_v49 = vpop.permute.xlu0 %1236 }
 0x167   : > { %v1320_v16 = vsel %vm1295_vm1, %v1287_v55, %v1237_v49  ;;  %v1321_v30 = vsel %vm1295_vm1, %v1288_v38, %v1237_v49  ;;  %v1322_v47 = vsel %vm1295_vm1, %v1289_v25, %v1237_v49 }
 0x168   : > { %3024 = vmatprep.mubr.msk.f32.mxu0 %vm1334_vm2, %v1320_v16 }
 0x169   : > { %3025 = vmatmul.mubr.msk.f32.gmra.mrb[24].mxu0 %vm1334_vm2, %v1321_v30  ;;  %v1148_v62 = vpop.permute.xlu1 %1147 }
 0x16a   : > { %v1291_v43 = vsel %vm448_vm0, %v4203_v59, %v1148_v62  ;;  %3027 = vmatprep.mubr.msk.f32.mxu0 %vm1334_vm2, %v1322_v47  ;;  %v1146_v18 = vpop.permute.xlu0 %1145 }
 0x16b   : > { %v1290_v6 = vsel %vm448_vm0, %v4182_v5, %v1146_v18  ;;  %v1324_v7 = vsel %vm1295_vm1, %v1291_v43, %v1237_v49 }
 0x16c   : > { %v1323_v17 = vsel %vm1295_vm1, %v1290_v6, %v1237_v49 }
 0x16d   : > { %3028 = vmatmul.mubr.msk.f32.gmra.mrb[26].mxu0 %vm1334_vm2, %v1323_v17  ;;  %v1152_v12 = vpop.permute.xlu1 %1151 }
 0x16e   : > { %v1293_v32 = vsel %vm448_vm0, %v4219_v33, %v1152_v12  ;;  %3030 = vmatprep.mubr.msk.f32.mxu0 %vm1334_vm2, %v1324_v7  ;;  %v1150_v26 = vpop.permute.xlu0 %1149 }
 0x16f   : > { %v1292_v59 = vsel %vm448_vm0, %v4198_v14, %v1150_v26  ;;  %v1326_v20 = vsel %vm1295_vm1, %v1293_v32, %v1237_v49  ;;  %v4389_v14 = vld [vmem:[%s5085_s4] ss:$0 sm:$0xff] }
 0x170   : > { %v1325_v5 = vsel %vm1295_vm1, %v1292_v59, %v1237_v49 }
 0x171   : > { %3031 = vmatmul.mubr.msk.f32.gmra.mrb[28].mxu0 %vm1334_vm2, %v1325_v5 }
 0x172   : > { %3033 = vmatprep.mubr.msk.f32.mxu0 %vm1334_vm2, %v1326_v20  ;;  %v1154_v15 = vpop.permute.xlu0 %1153 }
 0x173   : > { %v1294_v8 = vsel %vm448_vm0, %v4214_v19, %v1154_v15 }
 0x174   : > { %v1327_v33 = vsel %vm1295_vm1, %v1294_v8, %v1237_v49 }
 0x175   : > { %3034 = vmatmul.mubr.msk.f32.gmra.mrb[30].mxu0 %vm1334_vm2, %v1327_v33 }
 0x1d5   : > { %v2990_v24 = vpop.f32.mrb[0].mxu0 }
 0x1d6   : > { %v1503_v48 = vadd.f32 %v2990_v24, %v4389_v14  ;;  %v1497_v57 = vpop.f32.mrb[1].mxu0 }
 0x1d7   : > { %v1498_v44 = vadd.f32 %v4389_v14, %v1497_v57 }
 0x1d8   : > { %v1664_v1 = vsel %vm448_vm0, %v1503_v48, 0.0 }
 0x1d9   : > { %v1663_v40 = vsel %vm448_vm0, %v1498_v44, 0.0 }
 0x1da   : > { %v1665_v19 = vadd.f32 %v1664_v1, %v1663_v40 }
 0x1dd   : > { %v2993_v54 = vpop.f32.mrb[2].mxu0 }
 0x1de   : > { %v1507_v63 = vpop.f32.mrb[3].mxu0  ;;  %v1513_v53 = vadd.f32 %v2993_v54, %v4389_v14 }
 0x1df   : > { %v1508_v3 = vadd.f32 %v4389_v14, %v1507_v63 }
 0x1e0   : > { %v1668_v27 = vsel %vm448_vm0, %v1513_v53, 0.0 }
 0x1e1   : > { %v1666_v51 = vsel %vm448_vm0, %v1508_v3, 0.0 }
 0x1e2   : > { %v1667_v37 = vadd.f32 %v1666_v51, %v1665_v19 }
 0x1e4   : > { %v1669_v41 = vadd.f32 %v1668_v27, %v1667_v37 }
 0x1e5   : > { %v2996_v2 = vpop.f32.mrb[4].mxu0 }
 0x1e6   : > { %v1517_v13 = vpop.f32.mrb[5].mxu0  ;;  %v1523_v50 = vadd.f32 %v2996_v2, %v4389_v14 }
 0x1e7   : > { %v1518_v23 = vadd.f32 %v4389_v14, %v1517_v13 }
 0x1e8   : > { %v1672_v4 = vsel %vm448_vm0, %v1523_v50, 0.0 }
 0x1e9   : > { %v1670_v39 = vsel %vm448_vm0, %v1518_v23, 0.0 }
 0x1ea   : > { %v1671_v31 = vadd.f32 %v1670_v39, %v1669_v41 }
 0x1ec   : > { %v1673_v52 = vadd.f32 %v1672_v4, %v1671_v31 }
 0x1ed   : > { %v2999_v9 = vpop.f32.mrb[6].mxu0 }
 0x1ee   : > { %v1527_v22 = vpop.f32.mrb[7].mxu0  ;;  %v1533_v60 = vadd.f32 %v2999_v9, %v4389_v14 }
 0x1ef   : > { %v1528_v21 = vadd.f32 %v4389_v14, %v1527_v22 }
 0x1f0   : > { %v1676_v36 = vsel %vm448_vm0, %v1533_v60, 0.0 }
 0x1f1   : > { %v1674_v29 = vsel %vm448_vm0, %v1528_v21, 0.0 }
 0x1f2   : > { %v1675_v46 = vadd.f32 %v1674_v29, %v1673_v52 }
 0x1f4   : > { %v1677_v0 = vadd.f32 %v1676_v36, %v1675_v46 }
 0x1f6   : > { %v1678_v61 = vrot.slane %v1677_v0, 4 }
 0x1f8   : > { %v1679_v38 = vadd.f32 %v1678_v61, %v1677_v0 }
 0x1fa   : > { %v1680_v45 = vrot.slane %v1679_v38, 2 }
 0x1fc   : > { %v3002_v55 = vpop.f32.mrb[8].mxu0  ;;  %v1681_v25 = vadd.f32 %v1680_v45, %v1679_v38 }
 0x1fd   : > { %v4420_v49 = vadd.f32 %v3002_v55, %v4389_v14  ;;  %v1537_v16 = vpop.f32.mrb[9].mxu0 }
 0x1fe   : > { %v4423_v30 = vadd.f32 %v4389_v14, %v1537_v16  ;;  %v1682_v47 = vrot.slane %v1681_v25, 1 }
 0x1ff   : > { %v1685_v62 = vsel %vm448_vm0, %v4420_v49, 0.0 }
 0x200   : > { %v1684_v43 = vsel %vm448_vm0, %v4423_v30, 0.0  ;;  %v1683_v18 = vadd.f32 %v1682_v47, %v1681_v25 }
 0x201   : > { %v1686_v6 = vadd.f32 %v1685_v62, %v1684_v43 }
 0x202   : > { %v1747_v7 = vmul.f32 0.015625, %v1683_v18 }
 0x204   : > { %v3005_v17 = vpop.f32.mrb[10].mxu0  ;;  %v4429_v12 = vsub.f32 %v1498_v44, %v1747_v7  ;;  %v4431_v32 = vsub.f32 %v1503_v48, %v1747_v7  ;;  %v4433_v26 = vsub.f32 %v1508_v3, %v1747_v7  ;;  %v4435_v59 = vsub.f32 %v1513_v53, %v1747_v7 }
 0x205   : > { %v1547_v20 = vpop.f32.mrb[11].mxu0  ;;  %v4437_v5 = vsub.f32 %v1518_v23, %v1747_v7  ;;  %v4439_v15 = vsub.f32 %v1523_v50, %v1747_v7  ;;  %v4441_v8 = vsub.f32 %v1528_v21, %v1747_v7  ;;  %v4443_v33 = vsub.f32 %v1533_v60, %v1747_v7 }
 0x206   : > { %v1783_v24 = vmul.f32 %v4429_v12, %v4429_v12  ;;  %v1784_v48 = vmul.f32 %v4431_v32, %v4431_v32  ;;  %v1785_v57 = vmul.f32 %v4433_v26, %v4433_v26  ;;  %v1786_v44 = vmul.f32 %v4435_v59, %v4435_v59 }
 0x207   : > { %v1787_v11 = vmul.f32 %v4437_v5, %v4437_v5  ;;  %v4459_v54 = vadd.f32 %v3005_v17, %v4389_v14  ;;  %v4462_v56 = vadd.f32 %v4389_v14, %v1547_v20  ;;  %v1788_v3 = vmul.f32 %v4439_v15, %v4439_v15 }
 0x208   : > { %v1815_v1 = vsel %vm448_vm0, %v1783_v24, 0.0  ;;  %v1816_v40 = vsel %vm448_vm0, %v1784_v48, 0.0  ;;  %v1818_v34 = vsel %vm448_vm0, %v1785_v57, 0.0  ;;  %v1820_v35 = vsel %vm448_vm0, %v1786_v44, 0.0 }
 0x209   : > { %v1817_v19 = vadd.f32 %v1816_v40, %v1815_v1  ;;  %v1687_v58 = vsel %vm448_vm0, %v4462_v56, 0.0  ;;  %v1789_v41 = vmul.f32 %v4441_v8, %v4441_v8  ;;  %v1822_v2 = vsel %vm448_vm0, %v1787_v11, 0.0 }
 0x20a   : > { %v1688_v37 = vadd.f32 %v1687_v58, %v1686_v6  ;;  %v1689_v13 = vsel %vm448_vm0, %v4459_v54, 0.0  ;;  %v1790_v4 = vmul.f32 %v4443_v33, %v4443_v33  ;;  %v1824_v52 = vsel %vm448_vm0, %v1788_v3, 0.0 }
 0x20b   : > { %v1819_v63 = vadd.f32 %v1818_v34, %v1817_v19  ;;  %v1826_v60 = vsel %vm448_vm0, %v1789_v41, 0.0 }
 0x20c   : > { %v3008_v53 = vpop.f32.mrb[12].mxu0  ;;  %v1690_v39 = vadd.f32 %v1689_v13, %v1688_v37  ;;  %v1828_v0 = vsel %vm448_vm0, %v1790_v4, 0.0 }
 0x20d   : > { %v1557_v51 = vpop.f32.mrb[13].mxu0  ;;  %v1821_v10 = vadd.f32 %v1820_v35, %v1819_v63  ;;  %v1563_v50 = vadd.f32 %v3008_v53, %v4389_v14 }
 0x20e   : > { %v1558_v27 = vadd.f32 %v4389_v14, %v1557_v51 }
 0x20f   : > { %v1823_v23 = vadd.f32 %v1822_v2, %v1821_v10  ;;  %v1693_v21 = vsel %vm448_vm0, %v1563_v50, 0.0 }
 0x210   : > { %v1691_v31 = vsel %vm448_vm0, %v1558_v27, 0.0 }
 0x211   : > { %v1825_v9 = vadd.f32 %v1824_v52, %v1823_v23  ;;  %v1692_v22 = vadd.f32 %v1691_v31, %v1690_v39 }
 0x213   : > { %v1827_v29 = vadd.f32 %v1826_v60, %v1825_v9  ;;  %v1694_v36 = vadd.f32 %v1693_v21, %v1692_v22  ;;  %v1656_v22 = vld [vmem:[%s391_s26] sm:$0xf] }
 0x214   : > { %v3011_v46 = vpop.f32.mrb[14].mxu0 }
 0x215   : > { %v1567_v61 = vpop.f32.mrb[15].mxu0  ;;  %v1829_v38 = vadd.f32 %v1828_v0, %v1827_v29  ;;  %v1573_v45 = vadd.f32 %v3011_v46, %v4389_v14  ;;  %v4541_v0 = vadd.f32 1.0, %v1656_v22 }
 0x216   : > { %v1568_v55 = vadd.f32 %v4389_v14, %v1567_v61 }
 0x217   : > { %v1830_v25 = vrot.slane %v1829_v38, 4  ;;  %v1697_v43 = vsel %vm448_vm0, %v1573_v45, 0.0 }
 0x218   : > { %v1695_v16 = vsel %vm448_vm0, %v1568_v55, 0.0 }
 0x219   : > { %v1696_v47 = vadd.f32 %v1695_v16, %v1694_v36  ;;  %v1831_v62 = vadd.f32 %v1830_v25, %v1829_v38  ;;  %v4533_v36 = vld.sshfl [vmem:[%s395_s29] sm:$0x33 pattern:$0x75316420] }
 0x21b   : > { %v1698_v18 = vadd.f32 %v1697_v43, %v1696_v47  ;;  %v1832_v6 = vrot.slane %v1831_v62, 2 }
 0x21c   : > { %v3014_v7 = vpop.f32.mrb[16].mxu0 }
 0x21d   : > { %v1699_v17 = vrot.slane %v1698_v18, 4  ;;  %v4488_v20 = vadd.f32 %v3014_v7, %v4389_v14  ;;  %v1577_v24 = vpop.f32.mrb[17].mxu0  ;;  %v1833_v48 = vadd.f32 %v1832_v6, %v1831_v62 }
 0x21e   : > { %v4491_v57 = vadd.f32 %v4389_v14, %v1577_v24 }
 0x21f   : > { %v1700_v44 = vadd.f32 %v1699_v17, %v1698_v18  ;;  %v1706_v1 = vsel %vm448_vm0, %v4488_v20, 0.0  ;;  %v1834_v40 = vrot.slane %v1833_v48, 1 }
 0x220   : > { %v1705_v19 = vsel %vm448_vm0, %v4491_v57, 0.0 }
 0x221   : > { %v1701_v11 = vrot.slane %v1700_v44, 2  ;;  %v1707_v34 = vadd.f32 %v1706_v1, %v1705_v19  ;;  %v1835_v63 = vadd.f32 %v1834_v40, %v1833_v48 }
 0x223   : > { %v1702_v53 = vadd.f32 %v1701_v11, %v1700_v44  ;;  %v1899_v3 = vmul.f32 0.015625, %v1835_v63 }
 0x224   : > { %v3017_v35 = vpop.f32.mrb[18].mxu0 }
 0x225   : > { %v1703_v58 = vrot.slane %v1702_v53, 1  ;;  %v1587_v51 = vpop.f32.mrb[19].mxu0  ;;  %v1903_v10 = vadd.f32 1e-05, %v1899_v3  ;;  %v4511_v39 = vadd.f32 %v3017_v35, %v4389_v14 }
 0x226   : > { %v4498_v37 = vadd.f32 %v4389_v14, %v1587_v51 }
 0x227   : > { %v1704_v41 = vadd.f32 %v1703_v58, %v1702_v53  ;;  %3272 = vrsqrt.f32 %v1903_v10  ;;  %v1710_v16 = vsel %vm448_vm0, %v4511_v39, 0.0 }
 0x228   : > { %v1708_v2 = vsel %vm448_vm0, %v4498_v37, 0.0 }
 0x229   : > { %v1748_v13 = vmul.f32 0.015625, %v1704_v41  ;;  %v1709_v23 = vadd.f32 %v1708_v2, %v1707_v34 }
 0x22b   : > { %v4514_v31 = vsub.f32 %v4423_v30, %v1748_v13  ;;  %v4517_v4 = vsub.f32 %v4420_v49, %v1748_v13  ;;  %v4520_v52 = vsub.f32 %v4462_v56, %v1748_v13  ;;  %v4523_v9 = vsub.f32 %v4459_v54, %v1748_v13 }
 0x22c   : > { %v4525_v60 = vsub.f32 %v1558_v27, %v1748_v13  ;;  %v4527_v21 = vsub.f32 %v1563_v50, %v1748_v13  ;;  %v4529_v29 = vsub.f32 %v1568_v55, %v1748_v13  ;;  %v4531_v46 = vsub.f32 %v1573_v45, %v1748_v13  ;;  %v3020_v30 = vpop.f32.mrb[20].mxu0 }
 0x22d   : > { %v1791_v49 = vmul.f32 %v4514_v31, %v4514_v31  ;;  %v1792_v56 = vmul.f32 %v4517_v4, %v4517_v4  ;;  %v1793_v54 = vmul.f32 %v4520_v52, %v4520_v52  ;;  %v1597_v27 = vpop.f32.mrb[21].mxu0  ;;  %v1794_v50 = vmul.f32 %v4523_v9, %v4523_v9 }
 0x22e   : > { %v4549_v45 = vrot.slane %v4533_v36, %v3825_v42  ;;  %v1795_v55 = vmul.f32 %v4525_v60, %v4525_v60  ;;  %v4557_v62 = vadd.f32 %v3020_v30, %v4389_v14  ;;  %v4560_v43 = vadd.f32 %v4389_v14, %v1597_v27 }
 0x22f   : > { %v1836_v61 = vsel %vm448_vm0, %v1791_v49, 0.0  ;;  %v1837_v38 = vsel %vm448_vm0, %v1792_v56, 0.0  ;;  %v1839_v47 = vsel %vm448_vm0, %v1793_v54, 0.0  ;;  %v1711_v18 = vadd.f32 %v1710_v16, %v1709_v23 }
 0x230   : > { %v1838_v25 = vadd.f32 %v1837_v38, %v1836_v61  ;;  %v1796_v7 = vmul.f32 %v4527_v21, %v4527_v21  ;;  %v1797_v48 = vmul.f32 %v4529_v29, %v4529_v29  ;;  %v1841_v44 = vsel %vm448_vm0, %v1794_v50, 0.0 }
 0x231   : > { %v3273_v6 = vpop.eup %3272  ;;  %v1712_v1 = vsel %vm448_vm0, %v4560_v43, 0.0  ;;  %v4572_v40 = vrot.slane %v4549_v45, %v3840_v28  ;;  %v1798_v19 = vmul.f32 %v4531_v46, %v4531_v46  ;;  %v1843_v3 = vsel %vm448_vm0, %v1795_v55, 0.0 }
 0x232   : > { %v1840_v17 = vadd.f32 %v1839_v47, %v1838_v25  ;;  %v1920_v24 = vmul.f32 %v3273_v6, %v4541_v0  ;;  %v1713_v34 = vadd.f32 %v1712_v1, %v1711_v18  ;;  %v1714_v35 = vsel %vm448_vm0, %v4557_v62, 0.0 }
 0x233   : > { %v1845_v41 = vsel %vm448_vm0, %v1796_v7, 0.0  ;;  %v1847_v22 = vsel %vm448_vm0, %v1797_v48, 0.0 }
 0x234   : > { %v1842_v11 = vadd.f32 %v1841_v44, %v1840_v17  ;;  %v3023_v63 = vpop.f32.mrb[22].mxu0  ;;  %v1927_v53 = vrot.slane %v1920_v24, %v3840_v28  ;;  %v1715_v13 = vadd.f32 %v1714_v35, %v1713_v34 }
 0x235   : > { %v4581_v58 = vadd.f32 %v3023_v63, %v4389_v14  ;;  %v1607_v51 = vpop.f32.mrb[23].mxu0 }
 0x236   : > { %v1844_v10 = vadd.f32 %v1843_v3, %v1842_v11  ;;  %v4585_v2 = vadd.f32 %v4389_v14, %v1607_v51  ;;  %v1946_v23 = vmul.f32 %v1927_v53, %v4441_v8  ;;  %v1940_v30 = vmul.f32 %v1927_v53, %v4429_v12 }
 0x237   : > { %v1941_v49 = vmul.f32 %v1927_v53, %v4431_v32  ;;  %v1942_v27 = vmul.f32 %v1927_v53, %v4433_v26  ;;  %v1943_v50 = vmul.f32 %v1927_v53, %v4435_v59  ;;  %v1718_v8 = vsel %vm448_vm0, %v4581_v58, 0.0 }
 0x238   : > { %v1846_v56 = vadd.f32 %v1845_v41, %v1844_v10  ;;  %v1716_v54 = vsel %vm448_vm0, %v4585_v2, 0.0  ;;  %v4596_v61 = vadd.f32 %v4572_v40, %v1946_v23  ;;  %v4601_v55 = vadd.f32 %v4572_v40, %v1940_v30 }
 0x239   : > { %v1717_v38 = vadd.f32 %v1716_v54, %v1715_v13  ;;  %v4604_v32 = vadd.f32 %v4572_v40, %v1941_v49  ;;  %v4607_v25 = vadd.f32 %v4572_v40, %v1942_v27  ;;  %v1944_v26 = vmul.f32 %v1927_v53, %v4437_v5 }
 0x23a   : > { %v1848_v12 = vadd.f32 %v1847_v22, %v1846_v56  ;;  %v1849_v59 = vsel %vm448_vm0, %v1798_v19, 0.0  ;;  %v4612_v47 = vadd.f32 %v4572_v40, %v1943_v50  ;;  %v2821_v18 = vmul.f32 -1.442695, %v4596_v61 }
 0x23b   : > { %v1719_v16 = vadd.f32 %v1718_v8, %v1717_v38  ;;  %v2815_v17 = vmul.f32 -1.442695, %v4601_v55  ;;  %v4620_v1 = vadd.f32 %v4572_v40, %v1944_v26  ;;  %v1945_v5 = vmul.f32 %v1927_v53, %v4439_v15 }
 0x23c   : > { %v1850_v6 = vadd.f32 %v1849_v59, %v1848_v12  ;;  %v3026_v7 = vpop.f32.mrb[24].mxu0  ;;  %v2816_v34 = vmul.f32 -1.442695, %v4604_v32  ;;  %v2817_v63 = vmul.f32 -1.442695, %v4607_v25  ;;  %3274 = vpow2.f32 %v2821_v18 }
 0x23d   : > { %v1720_v24 = vrot.slane %v1719_v16, 4  ;;  %v4617_v48 = vadd.f32 %v3026_v7, %v4389_v14  ;;  %v1617_v44 = vpop.f32.mrb[25].mxu0  ;;  %v2818_v51 = vmul.f32 -1.442695, %v4612_v47  ;;  %v4632_v10 = vadd.f32 %v4572_v40, %v1945_v5 }
 0x23e   : > { %v1851_v19 = vrot.slane %v1850_v6, 4  ;;  %v4624_v11 = vadd.f32 %v4389_v14, %v1617_v44  ;;  %v1947_v23 = vmul.f32 %v1927_v53, %v4443_v33  ;;  %3276 = vpow2.f32 %v2815_v17 }
 0x23f   : > { %v1721_v3 = vadd.f32 %v1720_v24, %v1719_v16  ;;  %v1727_v35 = vsel %vm448_vm0, %v4617_v48, 0.0  ;;  %v2819_v56 = vmul.f32 -1.442695, %v4620_v1  ;;  %3278 = vpow2.f32 %v2816_v34 }
 0x240   : > { %v1852_v41 = vadd.f32 %v1851_v19, %v1850_v6  ;;  %v1726_v15 = vsel %vm448_vm0, %v4624_v11, 0.0  ;;  %v3029_v13 = vpop.f32.mrb[26].mxu0  ;;  %3280 = vpow2.f32 %v2817_v63  ;;  %v2820_v38 = vmul.f32 -1.442695, %v4632_v10 }
 0x241   : > { %v1722_v22 = vrot.slane %v1721_v3, 2  ;;  %v1728_v30 = vadd.f32 %v1727_v35, %v1726_v15  ;;  %v1627_v49 = vpop.f32.mrb[27].mxu0  ;;  %v4639_v27 = vadd.f32 %v3029_v13, %v4389_v14  ;;  %v4646_v33 = vadd.f32 %v4572_v40, %v1947_v23 }
 0x242   : > { %v1853_v54 = vrot.slane %v1852_v41, 2  ;;  %v4642_v50 = vadd.f32 %v4389_v14, %v1627_v49  ;;  %3282 = vpow2.f32 %v2818_v51  ;;  %v1913_v15 = vrot.slane %v4541_v0, 1 }
 0x243   : > { %v1723_v8 = vadd.f32 %v1722_v22, %v1721_v3  ;;  %3284 = vpow2.f32 %v2819_v56  ;;  %v1731_v7 = vsel %vm448_vm0, %v4639_v27, 0.0  ;;  %v2822_v40 = vmul.f32 -1.442695, %v4646_v33 }
 0x244   : > { %v1854_v53 = vadd.f32 %v1853_v54, %v1852_v41  ;;  %v1729_v12 = vsel %vm448_vm0, %v4642_v50, 0.0  ;;  %v3032_v26 = vpop.f32.mrb[28].mxu0  ;;  %3286 = vpow2.f32 %v2820_v38 }
 0x245   : > { %v1724_v59 = vrot.slane %v1723_v8, 1  ;;  %v1730_v16 = vadd.f32 %v1729_v12, %v1728_v30  ;;  %v1637_v18 = vpop.f32.mrb[29].mxu0  ;;  %v4660_v13 = vadd.f32 %v3032_v26, %v4389_v14  ;;  %3288 = vpow2.f32 %v2822_v40 }
 0x246   : > { %v1855_v6 = vrot.slane %v1854_v53, 1  ;;  %v4653_v17 = vadd.f32 %v4389_v14, %v1637_v18  ;;  %v3275_v51 = vpop.eup %3274 }
 0x247   : > { %v1725_v24 = vadd.f32 %v1724_v59, %v1723_v8  ;;  %v1732_v44 = vadd.f32 %v1731_v7, %v1730_v16  ;;  %v1980_v16 = vcombine.high %v4533_v36, %v4533_v36  ;;  %v2151_v40 = vadd.f32 1.0, %v3275_v51 }
 0x248   : > { %v1856_v5 = vadd.f32 %v1855_v6, %v1854_v53  ;;  %v1733_v19 = vsel %vm448_vm0, %v4653_v17, 0.0  ;;  %v3035_v34 = vpop.f32.mrb[30].mxu0  ;;  %v3277_v23 = vpop.eup %3276 }
 0x249   : > { %v1749_v63 = vmul.f32 0.015625, %v1725_v24  ;;  %v1734_v3 = vadd.f32 %v1733_v19, %v1732_v44  ;;  %v1647_v35 = vpop.f32.mrb[31].mxu0  ;;  %v3279_v54 = vpop.eup %3278  ;;  %v2145_v59 = vadd.f32 1.0, %v3277_v23  ;;  %v1735_v44 = vsel %vm448_vm0, %v4660_v13, 0.0 }
 0x24a   : > { %v1900_v41 = vmul.f32 0.015625, %v1856_v5  ;;  %v3281_v12 = vpop.eup %3280  ;;  %v2146_v7 = vadd.f32 1.0, %v3279_v54  ;;  %v4704_v5 = vadd.f32 %v3035_v34, %v4389_v14 }
 0x24b   : > { %v4663_v22 = vsub.f32 %v4491_v57, %v1749_v63  ;;  %v4666_v30 = vsub.f32 %v4488_v20, %v1749_v63  ;;  %v4669_v49 = vsub.f32 %v4498_v37, %v1749_v63  ;;  %v4672_v56 = vsub.f32 %v4511_v39, %v1749_v63 }
 0x24c   : > { %v1904_v8 = vadd.f32 1e-05, %v1900_v41  ;;  %v4675_v38 = vsub.f32 %v4560_v43, %v1749_v63  ;;  %v4678_v53 = vsub.f32 %v4557_v62, %v1749_v63  ;;  %v4681_v57 = vsub.f32 %v4585_v2, %v1749_v63  ;;  %v3283_v26 = vpop.eup %3282 }
 0x24d   : > { %v4684_v20 = vsub.f32 %v4581_v58, %v1749_v63  ;;  %v1799_v37 = vmul.f32 %v4663_v22, %v4663_v22  ;;  %v1800_v39 = vmul.f32 %v4666_v30, %v4666_v30  ;;  %v1801_v43 = vmul.f32 %v4669_v49, %v4669_v49  ;;  %v3285_v58 = vpop.eup %3284 }
 0x24e   : > { %3290 = vrsqrt.f32 %v1904_v8  ;;  %v1802_v62 = vmul.f32 %v4672_v56, %v4672_v56  ;;  %v4695_v2 = vadd.f32 %v4389_v14, %v1647_v35  ;;  %v3287_v19 = vpop.eup %3286  ;;  %v1803_v63 = vmul.f32 %v4675_v38, %v4675_v38 }
 0x24f   : > { %v1857_v18 = vsel %vm448_vm0, %v1799_v37, 0.0  ;;  %v1858_v6 = vsel %vm448_vm0, %v1800_v39, 0.0  ;;  %v1804_v36 = vmul.f32 %v4678_v53, %v4678_v53  ;;  %v1860_v35 = vsel %vm448_vm0, %v1801_v43, 0.0  ;;  %v3289_v37 = vpop.eup %3288 }
 0x250   : > { %v1859_v24 = vadd.f32 %v1858_v6, %v1857_v18  ;;  %v1862_v41 = vsel %vm448_vm0, %v1802_v62, 0.0  ;;  %v1736_v51 = vadd.f32 %v1735_v44, %v1734_v3  ;;  %v1737_v54 = vsel %vm448_vm0, %v4695_v2, 0.0 }
 0x251   : > { %3292 = vrcp.f32 %v2145_v59  ;;  %v2147_v14 = vadd.f32 1.0, %v3281_v12  ;;  %v2148_v34 = vadd.f32 1.0, %v3283_v26  ;;  %v2149_v8 = vadd.f32 1.0, %v3285_v58 }
 0x252   : > { %v1861_v23 = vadd.f32 %v1860_v35, %v1859_v24  ;;  %3294 = vrcp.f32 %v2146_v7  ;;  %v1738_v18 = vadd.f32 %v1737_v54, %v1736_v51  ;;  %v2150_v6 = vadd.f32 1.0, %v3287_v19 }
 0x253   : > { %3296 = vrcp.f32 %v2151_v40  ;;  %v1805_v43 = vmul.f32 %v4681_v57, %v4681_v57  ;;  %v1864_v62 = vsel %vm448_vm0, %v1803_v63, 0.0  ;;  %v1739_v3 = vsel %vm448_vm0, %v4704_v5, 0.0 }
 0x254   : > { %v1863_v39 = vadd.f32 %v1862_v41, %v1861_v23  ;;  %3298 = vrcp.f32 %v2147_v14  ;;  %v1740_v59 = vadd.f32 %v1739_v3, %v1738_v18  ;;  %v4720_v12 = vrot.slane %v1980_v16, %v3825_v42 }
 0x255   : > { %3300 = vrcp.f32 %v2148_v34  ;;  %v1806_v26 = vmul.f32 %v4684_v20, %v4684_v20  ;;  %v1866_v58 = vsel %vm448_vm0, %v1804_v36, 0.0  ;;  %v2152_v19 = vadd.f32 1.0, %v3289_v37 }
 0x256   : > { %v1865_v24 = vadd.f32 %v1864_v62, %v1863_v39  ;;  %3302 = vrcp.f32 %v2149_v8  ;;  %v1741_v44 = vrot.slane %v1740_v59, 4  ;;  %v1868_v35 = vsel %vm448_vm0, %v1805_v43, 0.0 }
 0x257   : > { %3304 = vrcp.f32 %v2150_v6  ;;  %v4733_v16 = vrot.slane %v4720_v12, %v3840_v28  ;;  %v1870_v36 = vsel %vm448_vm0, %v1806_v26, 0.0 }
 0x258   : > { %v3291_v7 = vpop.eup %3290  ;;  %v1867_v40 = vadd.f32 %v1866_v58, %v1865_v24  ;;  %v1742_v23 = vadd.f32 %v1741_v44, %v1740_v59  ;;  %3306 = vrcp.f32 %v2152_v19 }
 0x259   : > { %v1921_v63 = vmul.f32 %v3291_v7, %v1913_v15 }
 0x25a   : > { %v1869_v41 = vadd.f32 %v1868_v35, %v1867_v40  ;;  %v1743_v14 = vrot.slane %v1742_v23, 2 }
 0x25b   : > { %v4729_v42 = vrot.slane %v1921_v63, %v3840_v28  ;;  %v3293_v51 = vpop.eup %3292 }
 0x25c   : > { %v1871_v54 = vadd.f32 %v1870_v36, %v1869_v41  ;;  %v3295_v34 = vpop.eup %3294  ;;  %v2241_v8 = vmul.f32 %v3293_v51, %v4601_v55  ;;  %v1744_v43 = vadd.f32 %v1743_v14, %v1742_v23 }
 0x25d   : > { %v1954_v15 = vmul.f32 %v4729_v42, %v4529_v29  ;;  %v1948_v37 = vmul.f32 %v4729_v42, %v4514_v31  ;;  %v1949_v39 = vmul.f32 %v4729_v42, %v4517_v4  ;;  %v3297_v18 = vpop.eup %3296  ;;  %v2242_v62 = vmul.f32 %v3295_v34, %v4604_v32 }
 0x25e   : > { %v1872_v6 = vrot.slane %v1871_v54, 4  ;;  %v1950_v3 = vmul.f32 %v4729_v42, %v4520_v52  ;;  %v3299_v24 = vpop.eup %3298  ;;  %3044 = vmatprep.mubr.msk.f32.mxu1 %vm448_vm0, %v2241_v8  ;;  %v1951_v31 = vmul.f32 %v4729_v42, %v4523_v9  ;;  %v1745_v26 = vrot.slane %v1744_v43, 1 }
 0x25f   : > { %v4748_v29 = vadd.f32 %v4733_v16, %v1948_v37  ;;  %v4751_v55 = vadd.f32 %v4733_v16, %v1949_v39  ;;  %v3301_v4 = vpop.eup %3300  ;;  %v4756_v59 = vadd.f32 %v4733_v16, %v1954_v15  ;;  %3045 = vmatmul.mubr.msk.f32.vlgmr.msra.gmra.mrb[0].mxu1 %vm448_vm0, %v2242_v62  ;;  %v2243_v52 = vmul.f32 %v3299_v24, %v4607_v25 }
 0x260   : > { %v1873_v32 = vadd.f32 %v1872_v6, %v1871_v54  ;;  %v3303_v58 = vpop.eup %3302  ;;  %v1746_v63 = vadd.f32 %v1745_v26, %v1744_v43  ;;  %v2244_v9 = vmul.f32 %v3301_v4, %v4612_v47  ;;  %v2247_v41 = vmul.f32 %v3297_v18, %v4596_v61 }
 0x261   : > { %v2823_v7 = vmul.f32 -1.442695, %v4748_v29  ;;  %v2824_v40 = vmul.f32 -1.442695, %v4751_v55  ;;  %v3305_v44 = vpop.eup %3304  ;;  %3047 = vmatprep.mubr.msk.f32.mxu1 %vm448_vm0, %v2243_v52  ;;  %v2245_v35 = vmul.f32 %v3303_v58, %v4620_v1  ;;  %v4767_v23 = vadd.f32 %v4733_v16, %v1950_v3 }
 0x262   : > { %v1874_v19 = vrot.slane %v1873_v32, 2  ;;  %v1952_v25 = vmul.f32 %v4729_v42, %v4525_v60  ;;  %v2829_v36 = vmul.f32 -1.442695, %v4756_v59  ;;  %v1750_v54 = vmul.f32 0.015625, %v1746_v63  ;;  %v3307_v14 = vpop.eup %3306 }
 0x263   : > { %3048 = vmatmul.mubr.msk.f32.gmra.mrb[2].mxu1 %vm448_vm0, %v2244_v9  ;;  %3308 = vpow2.f32 %v2823_v7  ;;  %v2246_v47 = vmul.f32 %v3305_v44, %v4632_v10  ;;  %v4776_v61 = vadd.f32 %v4733_v16, %v1951_v31  ;;  %v1953_v1 = vmul.f32 %v4729_v42, %v4527_v21 }
 0x264   : > { %v1875_v51 = vadd.f32 %v1874_v19, %v1873_v32  ;;  %3050 = vmatprep.mubr.msk.f32.mxu1 %vm448_vm0, %v2245_v35  ;;  %3310 = vpow2.f32 %v2824_v40  ;;  %v4781_v34 = vsub.f32 %v4624_v11, %v1750_v54  ;;  %v4784_v15 = vsub.f32 %v4617_v48, %v1750_v54 }
 0x265   : > { %v4787_v8 = vsub.f32 %v4642_v50, %v1750_v54  ;;  %v4790_v10 = vsub.f32 %v4639_v27, %v1750_v54  ;;  %v4793_v37 = vsub.f32 %v4653_v17, %v1750_v54  ;;  %v4796_v39 = vsub.f32 %v4660_v13, %v1750_v54 }
 0x266   : > { %v1876_v60 = vrot.slane %v1875_v51, 1  ;;  %v4799_v21 = vsub.f32 %v4695_v2, %v1750_v54  ;;  %v4802_v18 = vsub.f32 %v4704_v5, %v1750_v54  ;;  %v1807_v48 = vmul.f32 %v4781_v34, %v4781_v34 }
 0x267   : > { %v1808_v27 = vmul.f32 %v4784_v15, %v4784_v15  ;;  %3051 = vmatmul.mubr.msk.f32.gmra.mrb[4].mxu1 %vm448_vm0, %v2246_v47  ;;  %v1809_v50 = vmul.f32 %v4787_v8, %v4787_v8  ;;  %v2825_v17 = vmul.f32 -1.442695, %v4767_v23  ;;  %3312 = vpow2.f32 %v2829_v36 }
 0x268   : > { %v1877_v11 = vadd.f32 %v1876_v60, %v1875_v51  ;;  %3053 = vmatprep.mubr.msk.f32.mxu1 %vm448_vm0, %v2247_v41  ;;  %v1878_v2 = vsel %vm448_vm0, %v1807_v48, 0.0  ;;  %v2248_v5 = vmul.f32 %v3307_v14, %v4646_v33  ;;  %v1810_v6 = vmul.f32 %v4790_v10, %v4790_v10 }
 0x269   : > { %v1879_v43 = vsel %vm448_vm0, %v1808_v27, 0.0  ;;  %v2826_v62 = vmul.f32 -1.442695, %v4776_v61  ;;  %v4820_v3 = vadd.f32 %v4733_v16, %v1952_v25  ;;  %v1811_v4 = vmul.f32 %v4793_v37, %v4793_v37 }
 0x26a   : > { %v1901_v13 = vmul.f32 0.015625, %v1877_v11  ;;  %v1880_v31 = vadd.f32 %v1879_v43, %v1878_v2  ;;  %v1881_v32 = vsel %vm448_vm0, %v1809_v50, 0.0  ;;  %3314 = vpow2.f32 %v2825_v17 }
 0x26b   : > { %3054 = vmatmul.mubr.msk.f32.gmra.mrb[6].mxu1 %vm448_vm0, %v2248_v5  ;;  %v4827_v33 = vadd.f32 %v4733_v16, %v1953_v1  ;;  %v1812_v52 = vmul.f32 %v4796_v39, %v4796_v39  ;;  %v1955_v7 = vmul.f32 %v4729_v42, %v4531_v46  ;;  %v1883_v44 = vsel %vm448_vm0, %v1810_v6, 0.0 }
 0x26c   : > { %v1905_v24 = vadd.f32 1e-05, %v1901_v13  ;;  %v1882_v58 = vadd.f32 %v1881_v32, %v1880_v31  ;;  %v2827_v63 = vmul.f32 -1.442695, %v4820_v3  ;;  %v1813_v36 = vmul.f32 %v4799_v21, %v4799_v21 }
 0x26d   : > { %v3309_v26 = vpop.eup %3308  ;;  %v2828_v41 = vmul.f32 -1.442695, %v4827_v33  ;;  %v4837_v25 = vadd.f32 %v4733_v16, %v1955_v7  ;;  %v1885_v51 = vsel %vm448_vm0, %v1811_v4, 0.0  ;;  %v1814_v54 = vmul.f32 %v4802_v18, %v4802_v18 }
 0x26e   : > { %3316 = vrsqrt.f32 %v1905_v24  ;;  %v3311_v40 = vpop.eup %3310  ;;  %v2153_v19 = vadd.f32 1.0, %v3309_v26  ;;  %v1884_v9 = vadd.f32 %v1883_v44, %v1882_v58  ;;  %v1887_v47 = vsel %vm448_vm0, %v1812_v52, 0.0 }
 0x26f   : > { %3318 = vpow2.f32 %v2826_v62  ;;  %v2154_v35 = vadd.f32 1.0, %v3311_v40  ;;  %v2830_v42 = vmul.f32 -1.442695, %v4837_v25  ;;  %v1914_v16 = vrot.slane %v4541_v0, 2 }
 0x270   : > { %3320 = vrcp.f32 %v2153_v19  ;;  %v1886_v46 = vadd.f32 %v1885_v51, %v1884_v9  ;;  %v1889_v60 = vsel %vm448_vm0, %v1813_v36, 0.0  ;;  %v1995_v50 = vcombine.high %v4549_v45, %v4549_v45 }
 0x271   : > { %3322 = vrcp.f32 %v2154_v35  ;;  %v3313_v1 = vpop.eup %3312  ;;  %v1891_v17 = vsel %vm448_vm0, %v1814_v54, 0.0 }
 0x272   : > { %3324 = vpow2.f32 %v2827_v63  ;;  %v1888_v14 = vadd.f32 %v1887_v47, %v1886_v46  ;;  %v2159_v27 = vadd.f32 1.0, %v3313_v1  ;;  %v2008_v32 = vrot.slane %v1995_v50, %v3840_v28 }
 0x273   : > { %3326 = vpow2.f32 %v2828_v41 }
 0x274   : > { %3328 = vpow2.f32 %v2830_v42  ;;  %v1890_v11 = vadd.f32 %v1889_v60, %v1888_v14  ;;  %v3315_v48 = vpop.eup %3314 }
 0x275   : > { %v2155_v5 = vadd.f32 1.0, %v3315_v48 }
 0x276   : > { %v1892_v2 = vadd.f32 %v1891_v17, %v1890_v11 }
 0x277   : > { %3330 = vrcp.f32 %v2155_v5 }
 0x278   : > { %v3317_v13 = vpop.eup %3316  ;;  %v1893_v62 = vrot.slane %v1892_v2, 4  ;;  %3332 = vrcp.f32 %v2159_v27 }
 0x279   : > { %v3319_v6 = vpop.eup %3318  ;;  %v1922_v43 = vmul.f32 %v3317_v13, %v1914_v16 }
 0x27a   : > { %v2156_v24 = vadd.f32 1.0, %v3319_v6  ;;  %v3321_v31 = vpop.eup %3320  ;;  %v1894_v52 = vadd.f32 %v1893_v62, %v1892_v2 }
 0x27b   : > { %v1935_v4 = vrot.slane %v1922_v43, %v3840_v28  ;;  %v3323_v26 = vpop.eup %3322  ;;  %v2249_v45 = vmul.f32 %v3321_v31, %v4748_v29 }
 0x27c   : > { %3334 = vrcp.f32 %v2156_v24  ;;  %v3325_v58 = vpop.eup %3324  ;;  %v2250_v40 = vmul.f32 %v3323_v26, %v4751_v55  ;;  %v1895_v9 = vrot.slane %v1894_v52, 2 }
 0x27d   : > { %v1962_v7 = vmul.f32 %v1935_v4, %v4681_v57  ;;  %v1956_v44 = vmul.f32 %v1935_v4, %v4663_v22  ;;  %v1957_v19 = vmul.f32 %v1935_v4, %v4666_v30  ;;  %v3327_v63 = vpop.eup %3326  ;;  %3056 = vmatprep.mubr.msk.f32.mxu1 %vm448_vm0, %v2249_v45  ;;  %v2157_v35 = vadd.f32 1.0, %v3325_v58 }
 0x27e   : > { %v1958_v41 = vmul.f32 %v1935_v4, %v4669_v49  ;;  %v1959_v36 = vmul.f32 %v1935_v4, %v4672_v56  ;;  %v3329_v29 = vpop.eup %3328  ;;  %3057 = vmatmul.mubr.msk.f32.gmra.mrb[8].mxu1 %vm448_vm0, %v2250_v40  ;;  %v2158_v57 = vadd.f32 1.0, %v3327_v63  ;;  %v1896_v30 = vadd.f32 %v1895_v9, %v1894_v52 }
 0x27f   : > { %v4861_v51 = vadd.f32 %v2008_v32, %v1962_v7  ;;  %v4864_v55 = vadd.f32 %v2008_v32, %v1956_v44  ;;  %v4866_v22 = vadd.f32 %v2008_v32, %v1957_v19  ;;  %3336 = vrcp.f32 %v2157_v35 }
 0x280   : > { %v2160_v46 = vadd.f32 1.0, %v3329_v29  ;;  %v4868_v42 = vadd.f32 %v2008_v32, %v1958_v41  ;;  %3338 = vrcp.f32 %v2158_v57  ;;  %v1897_v54 = vrot.slane %v1896_v30, 1 }
 0x281   : > { %v2831_v49 = vmul.f32 -1.442695, %v4864_v55  ;;  %v2832_v56 = vmul.f32 -1.442695, %v4866_v22  ;;  %v4873_v1 = vadd.f32 %v2008_v32, %v1959_v36  ;;  %v1960_v14 = vmul.f32 %v1935_v4, %v4675_v38  ;;  %v3331_v11 = vpop.eup %3330 }
 0x282   : > { %v2833_v47 = vmul.f32 -1.442695, %v4868_v42  ;;  %3340 = vrcp.f32 %v2160_v46  ;;  %v1961_v16 = vmul.f32 %v1935_v4, %v4678_v53  ;;  %v1963_v60 = vmul.f32 %v1935_v4, %v4684_v20  ;;  %v3333_v17 = vpop.eup %3332 }
 0x283   : > { %v2837_v48 = vmul.f32 -1.442695, %v4861_v51  ;;  %v1898_v27 = vadd.f32 %v1897_v54, %v1896_v30  ;;  %3342 = vpow2.f32 %v2831_v49  ;;  %v2834_v50 = vmul.f32 -1.442695, %v4873_v1 }
 0x284   : > { %v2251_v13 = vmul.f32 %v3331_v11, %v4767_v23  ;;  %3344 = vpow2.f32 %v2832_v56  ;;  %v4881_v2 = vadd.f32 %v2008_v32, %v1960_v14  ;;  %v4883_v5 = vadd.f32 %v2008_v32, %v1961_v16 }
 0x285   : > { %v1902_v6 = vmul.f32 0.015625, %v1898_v27  ;;  %3346 = vpow2.f32 %v2833_v47  ;;  %v4885_v53 = vadd.f32 %v2008_v32, %v1963_v60  ;;  %v2255_v52 = vmul.f32 %v3333_v17, %v4756_v59 }
 0x286   : > { %v3335_v38 = vpop.eup %3334  ;;  %3059 = vmatprep.mubr.msk.f32.mxu1 %vm448_vm0, %v2251_v13  ;;  %3348 = vpow2.f32 %v2834_v50  ;;  %v2835_v43 = vmul.f32 -1.442695, %v4881_v2  ;;  %v2836_v62 = vmul.f32 -1.442695, %v4883_v5  ;;  %v1996_v41 = vcombine.high %v4720_v12, %v4720_v12 }
 0x287   : > { %v2252_v20 = vmul.f32 %v3335_v38, %v4776_v61  ;;  %3350 = vpow2.f32 %v2837_v48  ;;  %v1906_v23 = vadd.f32 1e-05, %v1902_v6  ;;  %v2838_v24 = vmul.f32 -1.442695, %v4885_v53 }
 0x288   : > { %3352 = vpow2.f32 %v2835_v43  ;;  %v2012_v56 = vrot.slane %v1996_v41, %v3840_v28 }
 0x289   : > { %3060 = vmatmul.mubr.msk.f32.gmra.mrb[10].mxu1 %vm448_vm0, %v2252_v20  ;;  %v3337_v31 = vpop.eup %3336  ;;  %3354 = vrsqrt.f32 %v1906_v23 }
 0x28a   : > { %v3339_v4 = vpop.eup %3338  ;;  %v2253_v32 = vmul.f32 %v3337_v31, %v4820_v3  ;;  %3356 = vpow2.f32 %v2836_v62 }
 0x28b   : > { %v2254_v61 = vmul.f32 %v3339_v4, %v4827_v33  ;;  %3358 = vpow2.f32 %v2838_v24  ;;  %v1915_v33 = vrot.slane %v4541_v0, 3 }
 0x28c   : > { %v3341_v26 = vpop.eup %3340  ;;  %3062 = vmatprep.mubr.msk.f32.mxu1 %vm448_vm0, %v2253_v32 }
 0x28d   : > { %v3343_v45 = vpop.eup %3342  ;;  %3063 = vmatmul.mubr.msk.f32.gmra.mrb[12].mxu1 %vm448_vm0, %v2254_v61  ;;  %v2256_v44 = vmul.f32 %v3341_v26, %v4837_v25 }
 0x28e   : > { %v3345_v58 = vpop.eup %3344  ;;  %3065 = vmatprep.mubr.msk.f32.mxu1 %vm448_vm0, %v2255_v52  ;;  %v2161_v7 = vadd.f32 1.0, %v3343_v45 }
 0x28f   : > { %v3347_v40 = vpop.eup %3346  ;;  %v2162_v3 = vadd.f32 1.0, %v3345_v58 }
 0x290   : > { %v3349_v19 = vpop.eup %3348  ;;  %3360 = vrcp.f32 %v2161_v7  ;;  %v2163_v63 = vadd.f32 1.0, %v3347_v40 }
 0x291   : > { %v3351_v9 = vpop.eup %3350  ;;  %3066 = vmatmul.mubr.msk.f32.gmra.mrb[14].mxu1 %vm448_vm0, %v2256_v44  ;;  %3362 = vrcp.f32 %v2162_v3  ;;  %v2164_v59 = vadd.f32 1.0, %v3349_v19 }
 0x292   : > { %v3353_v35 = vpop.eup %3352  ;;  %3364 = vrcp.f32 %v2163_v63  ;;  %v2167_v57 = vadd.f32 1.0, %v3351_v9 }
 0x293   : > { %v3355_v36 = vpop.eup %3354  ;;  %3366 = vrcp.f32 %v2164_v59  ;;  %v2165_v29 = vadd.f32 1.0, %v3353_v35 }
 0x294   : > { %v3357_v25 = vpop.eup %3356  ;;  %v1923_v30 = vmul.f32 %v3355_v36, %v1915_v33 }
 0x295   : > { %v3359_v46 = vpop.eup %3358  ;;  %3368 = vrcp.f32 %v2165_v29  ;;  %v2166_v0 = vadd.f32 1.0, %v3357_v25 }
 0x296   : > { %v1939_v49 = vrot.slane %v1923_v30, %v3840_v28  ;;  %v2168_v54 = vadd.f32 1.0, %v3359_v46 }
 0x297   : > { %3370 = vrcp.f32 %v2166_v0 }
 0x298   : > { %3372 = vrcp.f32 %v2167_v57  ;;  %v1970_v47 = vmul.f32 %v1939_v49, %v4799_v21  ;;  %v1964_v12 = vmul.f32 %v1939_v49, %v4781_v34  ;;  %v1965_v14 = vmul.f32 %v1939_v49, %v4784_v15 }
 0x299   : > { %v1966_v16 = vmul.f32 %v1939_v49, %v4787_v8  ;;  %v1967_v60 = vmul.f32 %v1939_v49, %v4790_v10  ;;  %v1968_v11 = vmul.f32 %v1939_v49, %v4793_v37  ;;  %v1969_v48 = vmul.f32 %v1939_v49, %v4796_v39 }
 0x29a   : > { %v3361_v27 = vpop.eup %3360  ;;  %v4913_v50 = vadd.f32 %v2012_v56, %v1970_v47  ;;  %3374 = vrcp.f32 %v2168_v54  ;;  %v4915_v28 = vadd.f32 %v2012_v56, %v1964_v12  ;;  %v4917_v17 = vadd.f32 %v2012_v56, %v1965_v14 }
 0x29b   : > { %v3363_v21 = vpop.eup %3362  ;;  %v2257_v34 = vmul.f32 %v3361_v27, %v4864_v55  ;;  %v4920_v15 = vadd.f32 %v2012_v56, %v1966_v16  ;;  %v4922_v8 = vadd.f32 %v2012_v56, %v1967_v60  ;;  %v4924_v10 = vadd.f32 %v2012_v56, %v1968_v11 }
 0x29c   : > { %v3365_v37 = vpop.eup %3364  ;;  %v2845_v39 = vmul.f32 -1.442695, %v4913_v50  ;;  %v2258_v13 = vmul.f32 %v3363_v21, %v4866_v22  ;;  %v2839_v38 = vmul.f32 -1.442695, %v4915_v28  ;;  %v2840_v6 = vmul.f32 -1.442695, %v4917_v17 }
 0x29d   : > { %v3367_v20 = vpop.eup %3366  ;;  %3068 = vmatprep.mubr.msk.f32.mxu1 %vm448_vm0, %v2257_v34  ;;  %v2259_v55 = vmul.f32 %v3365_v37, %v4868_v42  ;;  %v2841_v43 = vmul.f32 -1.442695, %v4920_v15  ;;  %v2842_v62 = vmul.f32 -1.442695, %v4922_v8  ;;  %v4935_v23 = vadd.f32 %v2012_v56, %v1969_v48 }
 0x29e   : > { %3376 = vpow2.f32 %v2845_v39  ;;  %3069 = vmatmul.mubr.msk.f32.gmra.mrb[16].mxu1 %vm448_vm0, %v2258_v13  ;;  %v1971_v22 = vmul.f32 %v1939_v49, %v4802_v18  ;;  %v2843_v31 = vmul.f32 -1.442695, %v4924_v10  ;;  %v2260_v4 = vmul.f32 %v3367_v20, %v4873_v1 }
 0x29f   : > { %v3369_v24 = vpop.eup %3368  ;;  %3071 = vmatprep.mubr.msk.f32.mxu1 %vm448_vm0, %v2259_v55  ;;  %3378 = vpow2.f32 %v2839_v38  ;;  %v2844_v42 = vmul.f32 -1.442695, %v4935_v23 }
 0x2a0   : > { %3380 = vpow2.f32 %v2840_v6  ;;  %v4942_v32 = vadd.f32 %v2012_v56, %v1971_v22  ;;  %v2261_v26 = vmul.f32 %v3369_v24, %v4881_v2 }
 0x2a1   : > { %v3371_v61 = vpop.eup %3370  ;;  %3382 = vpow2.f32 %v2841_v43 }
 0x2a2   : > { %v3373_v52 = vpop.eup %3372  ;;  %3072 = vmatmul.mubr.msk.f32.gmra.mrb[18].mxu1 %vm448_vm0, %v2260_v4  ;;  %3384 = vpow2.f32 %v2842_v62  ;;  %v2846_v18 = vmul.f32 -1.442695, %v4942_v32  ;;  %v2262_v1 = vmul.f32 %v3371_v61, %v4883_v5 }
 0x2a3   : > { %3074 = vmatprep.mubr.msk.f32.mxu1 %vm448_vm0, %v2261_v26  ;;  %3386 = vpow2.f32 %v2843_v31  ;;  %v2263_v58 = vmul.f32 %v3373_v52, %v4861_v51 }
 0x2a4   : > { %v3375_v45 = vpop.eup %3374  ;;  %3388 = vpow2.f32 %v2844_v42 }
 0x2a5   : > { %3390 = vpow2.f32 %v2846_v18  ;;  %v2264_v7 = vmul.f32 %v3375_v45, %v4885_v53 }
 0x2a6   : > { %3075 = vmatmul.mubr.msk.f32.gmra.mrb[20].mxu1 %vm448_vm0, %v2262_v1 }
 0x2a7   : > { %3077 = vmatprep.mubr.msk.f32.mxu1 %vm448_vm0, %v2263_v58 }
 0x2a8   : > { %v3377_v2 = vpop.eup %3376 }
 0x2a9   : > { %v3379_v40 = vpop.eup %3378  ;;  %v2175_v53 = vadd.f32 1.0, %v3377_v2 }
 0x2aa   : > { %v3381_v44 = vpop.eup %3380  ;;  %3078 = vmatmul.mubr.msk.f32.gmra.mrb[22].mxu1 %vm448_vm0, %v2264_v7  ;;  %v2169_v3 = vadd.f32 1.0, %v3379_v40 }
 0x2ab   : > { %v3383_v19 = vpop.eup %3382  ;;  %v2170_v33 = vadd.f32 1.0, %v3381_v44 }
 0x2ac   : > { %v3385_v63 = vpop.eup %3384  ;;  %3392 = vrcp.f32 %v2169_v3  ;;  %v2171_v5 = vadd.f32 1.0, %v3383_v19 }
 0x2ad   : > { %v3387_v9 = vpop.eup %3386  ;;  %3394 = vrcp.f32 %v2170_v33  ;;  %v2172_v51 = vadd.f32 1.0, %v3385_v63 }
 0x2ae   : > { %v3389_v59 = vpop.eup %3388  ;;  %3396 = vrcp.f32 %v2171_v5  ;;  %v2173_v35 = vadd.f32 1.0, %v3387_v9 }
 0x2af   : > { %3398 = vrcp.f32 %v2172_v51  ;;  %v2174_v41 = vadd.f32 1.0, %v3389_v59  ;;  %v3391_v36 = vpop.eup %3390 }
 0x2b0   : > { %3400 = vrcp.f32 %v2173_v35  ;;  %v2176_v29 = vadd.f32 1.0, %v3391_v36 }
 0x2b1   : > { %3402 = vrcp.f32 %v2174_v41 }
 0x2b2   : > { %3404 = vrcp.f32 %v2175_v53 }
 0x2b3   : > { %3406 = vrcp.f32 %v2176_v29 }
 0x2b6   : > { %v3393_v25 = vpop.eup %3392 }
 0x2b7   : > { %v3395_v57 = vpop.eup %3394  ;;  %v2265_v30 = vmul.f32 %v3393_v25, %v4915_v28  ;;  %v4973_v28 = vld [vmem:[%s5089_s8] ss:$0 sm:$0xff] }
 0x2b8   : > { %v3397_v46 = vpop.eup %3396  ;;  %v2266_v0 = vmul.f32 %v3395_v57, %v4917_v17 }
 0x2b9   : > { %v3399_v49 = vpop.eup %3398  ;;  %3080 = vmatprep.mubr.msk.f32.mxu1 %vm448_vm0, %v2265_v30  ;;  %v2267_v56 = vmul.f32 %v3397_v46, %v4920_v15 }
 0x2ba   : > { %v3401_v54 = vpop.eup %3400  ;;  %3081 = vmatmul.mubr.msk.f32.gmra.mrb[24].mxu1 %vm448_vm0, %v2266_v0  ;;  %v2268_v47 = vmul.f32 %v3399_v49, %v4922_v8 }
 0x2bb   : > { %3083 = vmatprep.mubr.msk.f32.mxu1 %vm448_vm0, %v2267_v56  ;;  %v3403_v12 = vpop.eup %3402  ;;  %v2269_v14 = vmul.f32 %v3401_v54, %v4924_v10 }
 0x2bc   : > { %v3405_v16 = vpop.eup %3404  ;;  %v2270_v60 = vmul.f32 %v3403_v12, %v4935_v23 }
 0x2bd   : > { %v3407_v11 = vpop.eup %3406  ;;  %v2271_v48 = vmul.f32 %v3405_v16, %v4913_v50 }
 0x2be   : > { %3084 = vmatmul.mubr.msk.f32.gmra.mrb[26].mxu1 %vm448_vm0, %v2268_v47  ;;  %v2272_v27 = vmul.f32 %v3407_v11, %v4942_v32 }
 0x2bf   : > { %3086 = vmatprep.mubr.msk.f32.mxu1 %vm448_vm0, %v2269_v14 }
 0x2c2   : > { %3087 = vmatmul.mubr.msk.f32.gmra.mrb[28].mxu1 %vm448_vm0, %v2270_v60 }
 0x2c3   : > { %3089 = vmatprep.mubr.msk.f32.mxu1 %vm448_vm0, %v2271_v48 }
 0x2c6   : > { %3090 = vmatmul.mubr.msk.f32.gmra.mrb[30].mxu1 %vm448_vm0, %v2272_v27 }
 0x332   : > { %v3046_v50 = vpop.f32.mrb[0].mxu1 }
 0x333   : > { %v2447_v17 = vadd.f32 %v3046_v50, %v4973_v28  ;;  %v2441_v21 = vpop.f32.mrb[1].mxu1 }
 0x334   : > { %v2442_v34 = vadd.f32 %v4973_v28, %v2441_v21 }
 0x335   : > { %2601 = vst.msk [vmem:[%s4980_s16 + $0x8] sm:$0xff] %vm1295_vm1, %v2447_v17 }
 0x336   : > { %2600 = vst.msk [vmem:[%s4980_s16] sm:$0xff] %vm1295_vm1, %v2442_v34  ;;  %v3049_v15 = vpop.f32.mrb[2].mxu1 }
 0x337   : > { %v2457_v8 = vadd.f32 %v3049_v15, %v4973_v28  ;;  %v2451_v10 = vpop.f32.mrb[3].mxu1 }
 0x338   : > { %v2452_v37 = vadd.f32 %v4973_v28, %v2451_v10 }
 0x339   : > { %2603 = vst.msk [vmem:[%s4980_s16 + $0x18] sm:$0xff] %vm1295_vm1, %v2457_v8 }
 0x33a   : > { %2602 = vst.msk [vmem:[%s4980_s16 + $0x10] sm:$0xff] %vm1295_vm1, %v2452_v37  ;;  %v3052_v39 = vpop.f32.mrb[4].mxu1 }
 0x33b   : > { %v2467_v13 = vadd.f32 %v3052_v39, %v4973_v28  ;;  %v2461_v38 = vpop.f32.mrb[5].mxu1 }
 0x33c   : > { %v2462_v6 = vadd.f32 %v4973_v28, %v2461_v38 }
 0x33d   : > { %2605 = vst.msk [vmem:[%s4980_s16 + $0x28] sm:$0xff] %vm1295_vm1, %v2467_v13 }
 0x33e   : > { %2604 = vst.msk [vmem:[%s4980_s16 + $0x20] sm:$0xff] %vm1295_vm1, %v2462_v6  ;;  %v3055_v20 = vpop.f32.mrb[6].mxu1 }
 0x33f   : > { %v2477_v55 = vadd.f32 %v3055_v20, %v4973_v28  ;;  %v2471_v43 = vpop.f32.mrb[7].mxu1 }
 0x340   : > { %v2472_v62 = vadd.f32 %v4973_v28, %v2471_v43 }
 0x341   : > { %2607 = vst.msk [vmem:[%s4980_s16 + $0x38] sm:$0xff] %vm1295_vm1, %v2477_v55 }
 0x342   : > { %2606 = vst.msk [vmem:[%s4980_s16 + $0x30] sm:$0xff] %vm1295_vm1, %v2472_v62 }
 0x351   : > { %v3058_v23 = vpop.f32.mrb[8].mxu1 }
 0x352   : > { %v2487_v22 = vadd.f32 %v3058_v23, %v4973_v28  ;;  %v2481_v24 = vpop.f32.mrb[9].mxu1 }
 0x353   : > { %v2482_v31 = vadd.f32 %v4973_v28, %v2481_v24 }
 0x354   : > { %2609 = vst.msk [vmem:[%s4980_s16 + $0x48] sm:$0xff] %vm1295_vm1, %v2487_v22 }
 0x355   : > { %2608 = vst.msk [vmem:[%s4980_s16 + $0x40] sm:$0xff] %vm1295_vm1, %v2482_v31 }
 0x35c   : > { %v3061_v4 = vpop.f32.mrb[10].mxu1 }
 0x35d   : > { %v2497_v42 = vadd.f32 %v3061_v4, %v4973_v28  ;;  %v2491_v32 = vpop.f32.mrb[11].mxu1 }
 0x35e   : > { %v2492_v61 = vadd.f32 %v4973_v28, %v2491_v32 }
 0x35f   : > { %2611 = vst.msk [vmem:[%s4980_s16 + $0x58] sm:$0xff] %vm1295_vm1, %v2497_v42 }
 0x360   : > { %2610 = vst.msk [vmem:[%s4980_s16 + $0x50] sm:$0xff] %vm1295_vm1, %v2492_v61  ;;  %v3064_v26 = vpop.f32.mrb[12].mxu1 }
 0x361   : > { %v2507_v52 = vadd.f32 %v3064_v26, %v4973_v28  ;;  %v2501_v18 = vpop.f32.mrb[13].mxu1 }
 0x362   : > { %v2502_v45 = vadd.f32 %v4973_v28, %v2501_v18 }
 0x363   : > { %2613 = vst.msk [vmem:[%s4980_s16 + $0x68] sm:$0xff] %vm1295_vm1, %v2507_v52 }
 0x364   : > { %2612 = vst.msk [vmem:[%s4980_s16 + $0x60] sm:$0xff] %vm1295_vm1, %v2502_v45  ;;  %v3067_v1 = vpop.f32.mrb[14].mxu1 }
 0x365   : > { %v2517_v58 = vadd.f32 %v3067_v1, %v4973_v28  ;;  %v2511_v2 = vpop.f32.mrb[15].mxu1 }
 0x366   : > { %v2512_v7 = vadd.f32 %v4973_v28, %v2511_v2 }
 0x367   : > { %2615 = vst.msk [vmem:[%s4980_s16 + $0x78] sm:$0xff] %vm1295_vm1, %v2517_v58 }
 0x368   : > { %2614 = vst.msk [vmem:[%s4980_s16 + $0x70] sm:$0xff] %vm1295_vm1, %v2512_v7 }
 0x371   : > { %v3070_v40 = vpop.f32.mrb[16].mxu1 }
 0x372   : > { %v2527_v44 = vadd.f32 %v3070_v40, %v4973_v28  ;;  %v2521_v3 = vpop.f32.mrb[17].mxu1 }
 0x373   : > { %v2522_v19 = vadd.f32 %v4973_v28, %v2521_v3 }
 0x374   : > { %2617 = vst.msk [vmem:[%s4980_s16 + $0x88] sm:$0xff] %vm1295_vm1, %v2527_v44 }
 0x375   : > { %2616 = vst.msk [vmem:[%s4980_s16 + $0x80] sm:$0xff] %vm1295_vm1, %v2522_v19  ;;  %v3073_v33 = vpop.f32.mrb[18].mxu1 }
 0x376   : > { %v2537_v63 = vadd.f32 %v3073_v33, %v4973_v28  ;;  %v2531_v5 = vpop.f32.mrb[19].mxu1 }
 0x377   : > { %v2532_v9 = vadd.f32 %v4973_v28, %v2531_v5 }
 0x378   : > { %2619 = vst.msk [vmem:[%s4980_s16 + $0x98] sm:$0xff] %vm1295_vm1, %v2537_v63 }
 0x379   : > { %2618 = vst.msk [vmem:[%s4980_s16 + $0x90] sm:$0xff] %vm1295_vm1, %v2532_v9  ;;  %v3076_v51 = vpop.f32.mrb[20].mxu1 }
 0x37a   : > { %v2547_v59 = vadd.f32 %v3076_v51, %v4973_v28  ;;  %v2541_v35 = vpop.f32.mrb[21].mxu1 }
 0x37b   : > { %v2542_v41 = vadd.f32 %v4973_v28, %v2541_v35 }
 0x37c   : > { %2621 = vst.msk [vmem:[%s4980_s16 + $0xa8] sm:$0xff] %vm1295_vm1, %v2547_v59 }
 0x37d   : > { %2620 = vst.msk [vmem:[%s4980_s16 + $0xa0] sm:$0xff] %vm1295_vm1, %v2542_v41  ;;  %v3079_v36 = vpop.f32.mrb[22].mxu1 }
 0x37e   : > { %v2557_v53 = vadd.f32 %v3079_v36, %v4973_v28  ;;  %v2551_v29 = vpop.f32.mrb[23].mxu1 }
 0x37f   : > { %v2552_v25 = vadd.f32 %v4973_v28, %v2551_v29 }
 0x380   : > { %2623 = vst.msk [vmem:[%s4980_s16 + $0xb8] sm:$0xff] %vm1295_vm1, %v2557_v53 }
 0x381   : > { %2622 = vst.msk [vmem:[%s4980_s16 + $0xb0] sm:$0xff] %vm1295_vm1, %v2552_v25 }
 0x38d   : > { %v3082_v57 = vpop.f32.mrb[24].mxu1 }
 0x38e   : > { %v2567_v30 = vadd.f32 %v3082_v57, %v4973_v28  ;;  %v2561_v46 = vpop.f32.mrb[25].mxu1 }
 0x38f   : > { %v2562_v0 = vadd.f32 %v4973_v28, %v2561_v46 }
 0x390   : > { %2625 = vst.msk [vmem:[%s4980_s16 + $0xc8] sm:$0xff] %vm1295_vm1, %v2567_v30 }
 0x391   : > { %2624 = vst.msk [vmem:[%s4980_s16 + $0xc0] sm:$0xff] %vm1295_vm1, %v2562_v0  ;;  %v3085_v49 = vpop.f32.mrb[26].mxu1 }
 0x392   : > { %v2577_v56 = vadd.f32 %v3085_v49, %v4973_v28  ;;  %v2571_v54 = vpop.f32.mrb[27].mxu1 }
 0x393   : > { %v2572_v47 = vadd.f32 %v4973_v28, %v2571_v54 }
 0x394   : > { %2627 = vst.msk [vmem:[%s4980_s16 + $0xd8] sm:$0xff] %vm1295_vm1, %v2577_v56 }
 0x395   : > { %2626 = vst.msk [vmem:[%s4980_s16 + $0xd0] sm:$0xff] %vm1295_vm1, %v2572_v47  ;;  %v3088_v12 = vpop.f32.mrb[28].mxu1 }
 0x396   : > { %v2587_v14 = vadd.f32 %v3088_v12, %v4973_v28  ;;  %v2581_v16 = vpop.f32.mrb[29].mxu1 }
 0x397   : > { %v2582_v60 = vadd.f32 %v4973_v28, %v2581_v16 }
 0x398   : > { %2629 = vst.msk [vmem:[%s4980_s16 + $0xe8] sm:$0xff] %vm1295_vm1, %v2587_v14 }
 0x399   : > { %2628 = vst.msk [vmem:[%s4980_s16 + $0xe0] sm:$0xff] %vm1295_vm1, %v2582_v60  ;;  %v3091_v11 = vpop.f32.mrb[30].mxu1 }
 0x39a   : > { %v2597_v48 = vadd.f32 %v3091_v11, %v4973_v28  ;;  %v2591_v27 = vpop.f32.mrb[31].mxu1 }
 0x39b   : > { %v2592_v50 = vadd.f32 %v4973_v28, %v2591_v27 }
 0x39c   : > { %2631 = vst.msk [vmem:[%s4980_s16 + $0xf8] sm:$0xff] %vm1295_vm1, %v2597_v48 }
 0x39d   : > { %2630 = vst.msk [vmem:[%s4980_s16 + $0xf0] sm:$0xff] %vm1295_vm1, %v2592_v50 }
 0x39e PF: > { %s19_s30 = sadd.s32 1, %s3414_s30  }
 0x39f   : > { %p16_p4 = scmp.ge.s32.totalorder %s19_s30, 4  }
 0x3a1   :  { %18 = sbr.rel (!%p16_p4) target bundleno = 1 (0x1), region = 98 }

// kernel: _lambda_.2
= control target key start
LH: loop header
LB: loop body
LE: loop exit
PB: predicated region body
PF: predicated region fallthrough
CT: control target
= control target key end

     0   :  { %14 = vsyncpa [#allocation3], 0  ;;  %s5669_s0 = inlined_call_operand.hbm [shape: f32[2,4,64,64], index: 0, kind: input, shape index: {}]   ;;  %s5670_s1 = inlined_call_operand.vmem [shape: f32[2,4,64], index: 1, kind: input, shape index: {}]   ;;  %s5671_s2 = inlined_call_operand.vmem [shape: f32[2,4,64], index: 2, kind: input, shape index: {}]   ;;  %s5672_s3 = inlined_call_operand.vmem [shape: f32[64,32], index: 3, kind: input, shape index: {}]   ;;  %s5673_s4 = inlined_call_operand.vmem [shape: f32[1,32], index: 4, kind: input, shape index: {}]   ;;  %s5674_s5 = inlined_call_operand.vmem [shape: f32[2,4,32], index: 5, kind: input, shape index: {}]   ;;  %s5675_s6 = inlined_call_operand.vmem [shape: f32[2,4,32], index: 6, kind: input, shape index: {}]   ;;  %s5676_s7 = inlined_call_operand.vmem [shape: f32[96,32], index: 7, kind: input, shape index: {}]   ;;  %s5677_s8 = inlined_call_operand.vmem [shape: f32[1,32], index: 8, kind: input, shape index: {}]   ;;  %s5678_s9 = inlined_call_operand.vmem [shape: f32[2,4,64,32], index: 9, kind: output, shape index: {}]  }
   0x1   :  { %16 = vsyncpa [#allocation3 + $0x1], 0  ;;  %s3842_s30 = smov 0   ;;  %s3844_s10 = smov 0  }
   0x2   :  { %s3846_s11 = smov 0   ;;  %s3848_s12 = smov 0  }
   0x3 LB: > { %s3861_s13 = sadd.s32 4294967295, %s3779_s12   ;;  %s3864_s14 = sadd.s32 1, %s3779_s12   ;;  %s3779_s12 = sphi %s3848_s12, %s5729_s12   ;;  %s3775_s11 = sphi %s3846_s11, %s5728_s11   ;;  %s3771_s10 = sphi %s3844_s10, %s5727_s10   ;;  %s3767_s30 = sphi %s3842_s30, %s5726_s30  }
   0x4   : > { %s26_s15 = ssub.s32 %s3779_s12, %s3864_s14  ;;  %s29_s16 = sadd.s32 1, %s3775_s11 }
   0x5   : > { %p27_p0 = scmp.eq.s32.totalorder %s26_s15, 0  ;;  %p36_p1 = scmp.ne.s32.totalorder %s3775_s11, %s3771_s10 }
   0x6   : > { %p37_p2 = scmp.eq.s32.totalorder %s3779_s12, 0  ;;  %p42_p3 = scmp.ne.s32.totalorder %s3771_s10, %s3767_s30 }
   0x7   : > { %s3874_s17 = scalar_select %p27_p0, %s3775_s11, %s29_s16  }
   0x8   : > { %p38_p4 = por %p37_p2, %p36_p1  ;;  %p43_p5 = scmp.eq.s32.totalorder %s3861_s13, 0 }
   0x9   : > { %p3406_p6 = scmp.lt.s32.totalorder %s3779_s12, 2  ;;  %s292_s19 = sand.u32 1, %s3775_s11  }
   0xa   : > { %p3878_p7 = por %p43_p5, %p42_p3  ;;  %s2981_s20 = sshll.u32 %s292_s19, 8 }
   0xb   : > { %s3126_s21 = sshll.u32 %s3779_s12, 12  ;;  %s296_s25 = scalar_lea.vmem [#allocation2], %s2981_s20 }
   0xc   : > { %s3887_s24 = scalar_lea.hbm %s5669_s0, %s3126_s21  ;;  %s303_s26 = sshll.u32 %s296_s25, 4  ;;  %s3889_s26 = int_to_ptr.vmem [resolvable:$true] %s303_s26 }
   0xd   : > { %p3891_p8 = pnand %p3406_p6, %p38_p4  ;;  %s3896_s28 = scalar_lea.sflag [#allocation3], %s292_s19 }
   0xe   : > { %s3715_s29 = scalar_lea.hbm %s3887_s24, 4096  ;;  %s3720_s16 = scalar_lea.hbm %s5669_s0, 8192 }
   0xf   : > { %p3716_p10 = scmp.ne.s32.totalorder %s3887_s24, %s3715_s29  ;;  %p3717_p11 = pneg %p3891_p8 }
  0x10   : > { %p3721_p0 = scmp.lt.u32.totalorder %s3887_s24, %s5669_s0  ;;  %p3722_p1 = scmp.lt.u32.totalorder %s3720_s16, %s3715_s29 }
  0x11   : > { %p3718_p12 = pnand %p3717_p11, %p3716_p10  ;;  %p3724_p3 = scmp.lt.u32.totalorder %s3715_s29, %s3887_s24 }
  0x12   : > { %p3723_p2 = por %p3722_p1, %p3721_p0 }
  0x13   : > { %p3719_p13 = pneg %p3718_p12 }
  0x14   : > { %p3725_p4 = por %p3724_p3, %p3723_p2 }
  0x16   : > { %p3726_p5 = pnand %p3725_p4, %p3719_p13 }
  0x18   : > { %3729 = shalt.err (!%p3726_p5)
}
  0x19   : > { %s3730_s19 = scalar_lea.vmem %s3889_s26, 4096  ;;  %s3781_s22 = smov [#allocation2]  }
  0x1a   : > { %p3731_p6 = scmp.ne.s32.totalorder %s3889_s26, %s3730_s19  ;;  %s3735_s23 = sshll.u32 %s3781_s22, 4  ;;  %s3736_s23 = int_to_ptr.vmem [resolvable:$false] %s3735_s23 }
  0x1b   : > { %s3737_s25 = scalar_lea.vmem %s3736_s23, 8192  ;;  %p3738_p9 = scmp.lt.s32.totalorder %s3889_s26, %s3736_s23 }
  0x1c   : > { %p3733_p10 = pnand %p3731_p6, %p3717_p11  ;;  %p3739_p0 = scmp.lt.s32.totalorder %s3737_s25, %s3730_s19 }
  0x1e   : > { %p3734_p12 = pneg %p3733_p10  ;;  %p3740_p1 = por %p3739_p0, %p3738_p9 }
  0x20   : > { %p3741_p2 = pnand %p3740_p1, %p3734_p12 }
  0x22   : > { %3744 = shalt.err (!%p3741_p2)
}
  0x23   : > { %s3782_s29 = smov 128   ;;  %s3783_s30 = smov 8  }
  0x24   : > { %3405 = dma.hbm_to_vmem [thread:$0]  (!%p3891_p8), %s3887_s24, 4096, %s3889_s26, %s3896_s28, %s3782_s29, %s3782_s29, %s3783_s30  }
  0x25   : > { %p339_p11 = scmp.lt.s32.totalorder %s3779_s12, 3  ;;  %p5695_p13 = scmp.ge.s32.totalorder %s3779_s12, 1 }
  0x27   : > { %p340_p3 = pnand %p5695_p13, %p339_p11 }
  0x29   : > { %343 = sbr.rel (%p340_p3) target bundleno = 1242 (0x4da), region = 56 }
  0x30   : > { %s345_s15 = sand.u32 1, %s3771_s10  }
  0x31   : > { %s2985_s16 = sshll.u32 %s345_s15, 8  ;;  %s346_s20 = scalar_lea.sflag [#allocation3], %s345_s15 }
  0x32   : > { %s3928_s21 = scalar_lea.vmem [#allocation2], %s2985_s16 }
  0x33   : > { %3762 = dma.done.wait (%p3878_p7), %s346_s20, 4096  }
  0x34   : > { %3764 = vsyncadd (%p3878_p7), %s346_s20, 4294963200  ;;  %vm464_vm0 = vcmask 523264   ;;  %v3935_v0 = vld [vmem:[%s3928_s21] sm:$0xff]  ;;  %v3938_v1 = vld [vmem:[%s3928_s21 + $0x8] sm:$0xff]  ;;  %vm553_vm1 = vcmask 1041409   ;;  %vm555_vm2 = vcmask 1042434  }
  0x35   : > { %v3941_v2 = vld [vmem:[%s3928_s21 + $0x10] sm:$0xff]  ;;  %v3944_v3 = vld [vmem:[%s3928_s21 + $0x18] sm:$0xff]  ;;  %v465_v4 = vsel %vm464_vm0, %v3935_v0, 0.0  ;;  %v466_v5 = vsel %vm464_vm0, %v3938_v1, 0.0  ;;  %v3953_v7 = vld [vmem:[%s3928_s21 + $0x20] sm:$0xff]  ;;  %vm557_vm3 = vcmask 1043459  }
  0x36   : > { %v468_v6 = vsel %vm464_vm0, %v3941_v2, 0.0  ;;  %v3956_v8 = vld [vmem:[%s3928_s21 + $0x40] sm:$0xff]  ;;  %v467_v9 = vadd.f32 %v466_v5, %v465_v4  ;;  %v3959_v10 = vld [vmem:[%s3928_s21 + $0x48] sm:$0xff]  ;;  %v3962_v11 = vld [vmem:[%s3928_s21 + $0x50] sm:$0xff]  ;;  %v470_v13 = vsel %vm464_vm0, %v3944_v3, 0.0  ;;  %v472_v23 = vsel %vm464_vm0, %v3953_v7, 0.0 }
  0x37   : > { %v3965_v12 = vld [vmem:[%s3928_s21 + $0x58] sm:$0xff]  ;;  %v486_v14 = vsel %vm464_vm0, %v3956_v8, 0.0  ;;  %v3972_v15 = vld [vmem:[%s3928_s21 + $0x28] sm:$0xff]  ;;  %v3975_v16 = vld [vmem:[%s3928_s21 + $0x30] sm:$0xff]  ;;  %v487_v18 = vsel %vm464_vm0, %v3959_v10, 0.0  ;;  %v489_v19 = vsel %vm464_vm0, %v3962_v11, 0.0 }
  0x38   : > { %v469_v17 = vadd.f32 %v468_v6, %v467_v9  ;;  %v3982_v20 = vld [vmem:[%s3928_s21 + $0x60] sm:$0xff]  ;;  %v3988_v22 = vld [vmem:[%s3928_s21 + $0x88] sm:$0xff]  ;;  %v488_v24 = vadd.f32 %v487_v18, %v486_v14  ;;  %v3996_v26 = vld [vmem:[%s3928_s21 + $0x90] sm:$0xff]  ;;  %v491_v29 = vsel %vm464_vm0, %v3965_v12, 0.0  ;;  %v474_v34 = vsel %vm464_vm0, %v3972_v15, 0.0  ;;  %s3784_s12 = smov 65  }
  0x39   : > { %v3985_v21 = vld [vmem:[%s3928_s21 + $0x80] sm:$0xff]  ;;  %v3993_v25 = vld [vmem:[%s3928_s21 + $0x68] sm:$0xff]  ;;  %v3999_v27 = vld [vmem:[%s3928_s21 + $0x98] sm:$0xff]  ;;  %v508_v31 = vsel %vm464_vm0, %v3988_v22, 0.0  ;;  %v510_v37 = vsel %vm464_vm0, %v3996_v26, 0.0  ;;  %v476_v42 = vsel %vm464_vm0, %v3975_v16, 0.0 }
  0x3a   : > { %v471_v28 = vadd.f32 %v470_v13, %v469_v17  ;;  %v507_v30 = vsel %vm464_vm0, %v3985_v21, 0.0  ;;  %v4008_v32 = vld [vmem:[%s3928_s21 + $0x38] sm:$0xff]  ;;  %v4011_v33 = vld [vmem:[%s3928_s21 + $0xa0] sm:$0xff]  ;;  %v490_v35 = vadd.f32 %v489_v19, %v488_v24  ;;  %v4021_v39 = vld [vmem:[%s3928_s21 + $0xc8] sm:$0xff]  ;;  %v493_v43 = vsel %vm464_vm0, %v3982_v20, 0.0  ;;  %s3785_s18 = smov 127  }
  0x3b   : > { %v509_v36 = vadd.f32 %v508_v31, %v507_v30  ;;  %v4018_v38 = vld [vmem:[%s3928_s21 + $0xc0] sm:$0xff]  ;;  %v4024_v40 = vld [vmem:[%s3928_s21 + $0xd0] sm:$0xff]  ;;  %v512_v44 = vsel %vm464_vm0, %v3999_v27, 0.0  ;;  %v4036_v46 = vld [vmem:[%s3928_s21 + $0xa8] sm:$0xff]  ;;  %v495_v49 = vsel %vm464_vm0, %v3993_v25, 0.0  ;;  %v514_v53 = vsel %vm464_vm0, %v4011_v33, 0.0 }
  0x3c   : > { %v473_v41 = vadd.f32 %v472_v23, %v471_v28  ;;  %v4033_v45 = vld [vmem:[%s3928_s21 + $0x70] sm:$0xff]  ;;  %v4039_v47 = vld [vmem:[%s3928_s21 + $0xd8] sm:$0xff]  ;;  %v492_v48 = vadd.f32 %v491_v29, %v490_v35  ;;  %v528_v51 = vsel %vm464_vm0, %v4018_v38, 0.0  ;;  %v529_v54 = vsel %vm464_vm0, %v4021_v39, 0.0  ;;  %v4058_v58 = vld [vmem:[%s3928_s21 + $0xe0] sm:$0xff]  ;;  %s3786_s24 = smov 1  }
  0x3d   : > { %v511_v50 = vadd.f32 %v510_v37, %v509_v36  ;;  %v531_v55 = vsel %vm464_vm0, %v4024_v40, 0.0  ;;  %v4052_v56 = vld [vmem:[%s3928_s21 + $0x78] sm:$0xff]  ;;  %v4055_v57 = vld [vmem:[%s3928_s21 + $0xb0] sm:$0xff]  ;;  %v478_v59 = vsel %vm464_vm0, %v4008_v32, 0.0  ;;  %v530_v62 = vadd.f32 %v529_v54, %v528_v51  ;;  %v4072_v13 = vld [vmem:[%s3928_s21 + $0xe8] sm:$0xff]  ;;  %s3787_s26 = smov 63  }
  0x3e   : > { %v475_v52 = vadd.f32 %v474_v34, %v473_v41  ;;  %v494_v60 = vadd.f32 %v493_v43, %v492_v48  ;;  %v497_v4 = vsel %vm464_vm0, %v4033_v45, 0.0  ;;  %v516_v5 = vsel %vm464_vm0, %v4036_v46, 0.0  ;;  %v4069_v9 = vld [vmem:[%s3928_s21 + $0xb8] sm:$0xff]  ;;  %v4081_v29 = vld [vmem:[%s3928_s21 + $0xf0] sm:$0xff]  ;;  %p400_p7 = scmp.lt.s32.totalorder %s3861_s13, 1  ;;  %s3790_s16 = smov 64  }
  0x3f   : > { %v513_v61 = vadd.f32 %v512_v44, %v511_v50  ;;  %v533_v6 = vsel %vm464_vm0, %v4039_v47, 0.0  ;;  %v532_v18 = vadd.f32 %v531_v55, %v530_v62  ;;  %v499_v23 = vsel %vm464_vm0, %v4052_v56, 0.0  ;;  %v4088_v41 = vld [vmem:[%s3928_s21 + $0xf8] sm:$0xff] }
  0x40   : > { %v477_v63 = vadd.f32 %v476_v42, %v475_v52  ;;  %v496_v14 = vadd.f32 %v495_v49, %v494_v60  ;;  %v518_v24 = vsel %vm464_vm0, %v4055_v57, 0.0  ;;  %v535_v28 = vsel %vm464_vm0, %v4058_v58, 0.0  ;;  %5696 = vst [vmem:[#allocation5_spill] sm:$0xff] %v4088_v41  ;;  %s5731_s13 = smov (!%p400_p7, %s3861_s13), 1 }
  0x41   : > { %v515_v17 = vadd.f32 %v514_v53, %v513_v61  ;;  %v534_v34 = vadd.f32 %v533_v6, %v532_v18  ;;  %v520_v36 = vsel %vm464_vm0, %v4069_v9, 0.0  ;;  %v537_v37 = vsel %vm464_vm0, %v4072_v13, 0.0  ;;  %s4367_s27 = sshll.u32 %s5731_s13, 2 }
  0x42   : > { %v479_v19 = vadd.f32 %v478_v59, %v477_v63  ;;  %v498_v30 = vadd.f32 %v497_v4, %v496_v14  ;;  %v539_v49 = vsel %vm464_vm0, %v4081_v29, 0.0  ;;  %v541_v54 = vsel %vm464_vm0, %v4088_v41, 0.0  ;;  %s403_s22 = scalar_lea.vmem %s5670_s1, %s4367_s27  ;;  %s407_s29 = scalar_lea.vmem %s5671_s2, %s4367_s27 }
  0x43   : > { %v517_v31 = vadd.f32 %v516_v5, %v515_v17  ;;  %v536_v44 = vadd.f32 %v535_v28, %v534_v34  ;;  %vm573_vm4 = vcmask 7168   ;;  %vm565_vm5 = vcmask 515072  }
  0x44   : > { %v480_v35 = vrot.slane %v479_v19, 4  ;;  %v500_v42 = vadd.f32 %v499_v23, %v498_v30  ;;  %vm1624_vm7 = vcmask 261120   ;;  %vm2509_vm8 = vcmask 785408  }
  0x45   : > { %v519_v43 = vadd.f32 %v518_v24, %v517_v31  ;;  %v538_v52 = vadd.f32 %v537_v37, %v536_v44 }
  0x46   : > { %v481_v48 = vadd.f32 %v480_v35, %v479_v19  ;;  %v501_v50 = vrot.slane %v500_v42, 4 }
  0x47   : > { %v521_v51 = vadd.f32 %v520_v36, %v519_v43  ;;  %v540_v60 = vadd.f32 %v539_v49, %v538_v52 }
  0x48   : > { %v482_v53 = vrot.slane %v481_v48, 2  ;;  %v502_v55 = vadd.f32 %v501_v50, %v500_v42  ;;  %v575_v50 = vlaneseq }
  0x49   : > { %v522_v59 = vrot.slane %v521_v51, 4  ;;  %v542_v4 = vadd.f32 %v541_v54, %v540_v60 }
  0x4a   : > { %v483_v61 = vadd.f32 %v482_v53, %v481_v48  ;;  %v503_v62 = vrot.slane %v502_v55, 2  ;;  %v576_v54 = vand.u32 127, %v575_v50 }
  0x4b   : > { %v523_v63 = vadd.f32 %v522_v59, %v521_v51  ;;  %v543_v17 = vrot.slane %v542_v4, 4 }
  0x4c   : > { %v484_v5 = vrot.slane %v483_v61, 1  ;;  %v504_v6 = vadd.f32 %v503_v62, %v502_v55  ;;  %v3788_v62 = vmov 1966171168  }
  0x4d   : > { %v524_v14 = vrot.slane %v523_v63, 2  ;;  %v544_v24 = vadd.f32 %v543_v17, %v542_v4 }
  0x4e   : > { %v485_v18 = vadd.f32 %v484_v5, %v483_v61  ;;  %v505_v19 = vrot.slane %v504_v6, 1 }
  0x4f   : > { %v525_v23 = vadd.f32 %v524_v14, %v523_v63  ;;  %v545_v31 = vrot.slane %v544_v24, 2  ;;  %v640_v63 = vunpack.c.l.s4 %v3788_v62 }
  0x50   : > { %v506_v28 = vadd.f32 %v505_v19, %v504_v6 }
  0x51   : > { %v526_v30 = vrot.slane %v525_v23, 1  ;;  %v546_v35 = vadd.f32 %v545_v31, %v544_v24 }
  0x52   : > { %v554_v36 = vsel %vm553_vm1, %v506_v28, %v485_v18 }
  0x53   : > { %v527_v34 = vadd.f32 %v526_v30, %v525_v23  ;;  %v547_v37 = vrot.slane %v546_v35, 1  ;;  %v581_v23 = vand.u32 1, %v576_v54 }
  0x55   : > { %v556_v42 = vsel %vm555_vm2, %v527_v34, %v554_v36  ;;  %v548_v43 = vadd.f32 %v547_v37, %v546_v35  ;;  %vm4105_vm6 = vcmp.eq.s32.totalorder %v581_v23, 0 }
  0x57   : > { %v558_v44 = vsel %vm557_vm3, %v548_v43, %v556_v42  ;;  %v641_v42 = vunpack.c.0.s8 %v640_v63 }
  0x58   : > { %567 = vrot.lane.b32.xlu1 %v558_v44, %s3784_s12  ;;  %559 = vrot.lane.b32.xlu0 %v558_v44, %s3785_s18 }
  0x5c   : > { %570 = vrot.lane.b32.xlu1 %v558_v44, %s3786_s24  ;;  %562 = vrot.lane.b32.xlu0 %v558_v44, %s3787_s26  ;;  %v643_v44 = vshrl.u32 %v575_v50, 7 }
  0x5e   : > { %v4112_v50 = vsub.s32 %v641_v42, %v643_v44 }
  0xca   : > { %v568_v48 = vpop.permute.xlu1 %567  ;;  %v560_v49 = vpop.permute.xlu0 %559 }
  0xce   : > { %v571_v51 = vpop.permute.xlu1 %570  ;;  %v563_v52 = vpop.permute.xlu0 %562 }
  0xcf   : > { %v574_v53 = vsel %vm573_vm4, %v568_v48, %v571_v51  ;;  %v566_v55 = vsel %vm565_vm5, %v560_v49, %v563_v52 }
  0xd0   : > { %v603_v59 = vrot.slane %v574_v53, 1  ;;  %v604_v60 = vrot.slane %v574_v53, 2  ;;  %v605_v61 = vrot.slane %v574_v53, 3  ;;  %v591_v4 = vrot.slane %v566_v55, 1 }
  0xd1   : > { %v592_v5 = vrot.slane %v566_v55, 2  ;;  %v593_v6 = vrot.slane %v566_v55, 3  ;;  %v610_v35 = vadd.f32 %v574_v53, %v485_v18  ;;  %v598_v48 = vadd.f32 %v566_v55, %v485_v18 }
  0xd2   : > { %v611_v14 = vadd.f32 %v603_v59, %v506_v28  ;;  %v612_v17 = vadd.f32 %v604_v60, %v527_v34  ;;  %v613_v19 = vadd.f32 %v605_v61, %v548_v43  ;;  %v599_v24 = vadd.f32 %v591_v4, %v506_v28  ;;  %v2992_v59 = vld.sshfl [vmem:[%s407_s29] sm:$0x33 pattern:$0x75316420] }
  0xd3   : > { %v600_v30 = vadd.f32 %v592_v5, %v527_v34  ;;  %v601_v31 = vadd.f32 %v593_v6, %v548_v43  ;;  %v4118_v61 = vsub.s32 0, %v643_v44 }
  0xd4   : > { %v629_v36 = vrot.slane %v611_v14, 7  ;;  %v631_v37 = vrot.slane %v612_v17, 6  ;;  %v618_v49 = vrot.slane %v599_v24, 7  ;;  %v633_v62 = vrot.slane %v613_v19, 5 }
  0xd5   : > { %v620_v51 = vrot.slane %v600_v30, 6  ;;  %v622_v34 = vrot.slane %v601_v31, 5 }
  0xd6   : > { %v630_v52 = vsel %vm553_vm1, %v629_v36, %v610_v35  ;;  %v619_v28 = vsel %vm553_vm1, %v618_v49, %v598_v48 }
  0xd7   : > { %v632_v41 = vsel %vm555_vm2, %v631_v37, %v630_v52  ;;  %v621_v53 = vsel %vm555_vm2, %v620_v51, %v619_v28 }
  0xd8   : > { %v634_v43 = vsel %vm557_vm3, %v633_v62, %v632_v41  ;;  %v623_v18 = vsel %vm557_vm3, %v622_v34, %v621_v53 }
  0xd9   : > { %v636_v54 = vsel %vm4105_vm6, %v623_v18, %v634_v43 }
  0xda   : > { %v637_v55 = vmul.f32 0.0078125, %v636_v54 }
  0xdc   : > { %v645_v60 = vrot.slane %v637_v55, %v4112_v50 }
  0xde   : > { %v646_v63 = vcombine.high %v645_v60, %v645_v60  ;;  %v653_v4 = vrot.slane %v645_v60, %v4112_v50 }
  0xe0   : > { %v660_v5 = vrot.slane %v646_v63, %v4112_v50  ;;  %v661_v41 = vcombine.high %v653_v4, %v653_v4  ;;  %v666_v6 = vrot.slane %v653_v4, %v4118_v61 }
  0xe2   : > { %v662_v14 = vcombine.high %v660_v5, %v660_v5  ;;  %v670_v17 = vrot.slane %v660_v5, %v4118_v61  ;;  %v674_v19 = vrot.slane %v661_v41, %v4118_v61  ;;  %v4126_v23 = vsub.f32 %v3935_v0, %v666_v6 }
  0xe3   : > { %v4129_v24 = vsub.f32 %v3938_v1, %v666_v6  ;;  %v4132_v30 = vsub.f32 %v3941_v2, %v666_v6  ;;  %v4135_v31 = vsub.f32 %v3944_v3, %v666_v6  ;;  %v4139_v36 = vsub.f32 %v3953_v7, %v666_v6 }
  0xe4   : > { %v678_v35 = vrot.slane %v662_v14, %v4118_v61  ;;  %v4142_v37 = vsub.f32 %v3972_v15, %v666_v6  ;;  %v4145_v0 = vsub.f32 %v3975_v16, %v666_v6  ;;  %v4148_v1 = vsub.f32 %v4008_v32, %v666_v6 }
  0xe5   : > { %v4151_v2 = vsub.f32 %v3956_v8, %v670_v17  ;;  %v4154_v3 = vsub.f32 %v3959_v10, %v670_v17  ;;  %v4157_v42 = vsub.f32 %v3962_v11, %v670_v17  ;;  %v4160_v7 = vsub.f32 %v3965_v12, %v670_v17 }
  0xe6   : > { %v4163_v15 = vsub.f32 %v3982_v20, %v670_v17  ;;  %v4166_v16 = vsub.f32 %v3993_v25, %v670_v17  ;;  %v4169_v32 = vsub.f32 %v4033_v45, %v670_v17  ;;  %v4172_v8 = vsub.f32 %v4052_v56, %v670_v17 }
  0xe7   : > { %v4175_v10 = vsub.f32 %v3985_v21, %v674_v19  ;;  %v4178_v11 = vsub.f32 %v3988_v22, %v674_v19  ;;  %v4181_v12 = vsub.f32 %v3996_v26, %v674_v19  ;;  %v4184_v20 = vsub.f32 %v3999_v27, %v674_v19 }
  0xe8   : > { %v4187_v25 = vsub.f32 %v4011_v33, %v674_v19  ;;  %v4190_v45 = vsub.f32 %v4036_v46, %v674_v19  ;;  %v4193_v56 = vsub.f32 %v4055_v57, %v674_v19  ;;  %v4196_v21 = vsub.f32 %v4069_v9, %v674_v19 }
  0xe9   : > { %5699 = vst [vmem:[#allocation6_spill] sm:$0xff] %v4184_v20  ;;  %v4199_v22 = vsub.f32 %v4018_v38, %v678_v35  ;;  %v4202_v26 = vsub.f32 %v4021_v39, %v678_v35  ;;  %v4205_v27 = vsub.f32 %v4024_v40, %v678_v35  ;;  %v4208_v33 = vsub.f32 %v4039_v47, %v678_v35  ;;  %v5709_v38 = vld [vmem:[#allocation5_spill] sm:$0xff] }
  0xea   : > { %5700 = vst [vmem:[#allocation7_spill] sm:$0xff] %v4187_v25  ;;  %5701 = vst [vmem:[#allocation8_spill] sm:$0xff] %v4190_v45  ;;  %v4211_v46 = vsub.f32 %v4058_v58, %v678_v35  ;;  %v4214_v57 = vsub.f32 %v4072_v13, %v678_v35  ;;  %v4217_v9 = vsub.f32 %v4081_v29, %v678_v35 }
  0xeb   : > { %5702 = vst [vmem:[#allocation9_spill] sm:$0xff] %v4193_v56  ;;  %5703 = vst [vmem:[#allocation10_spill] sm:$0xff] %v4196_v21  ;;  %v4220_v44 = vsub.f32 %v5709_v38, %v678_v35  ;;  %v715_v39 = vmul.f32 %v4126_v23, %v4126_v23  ;;  %v716_v40 = vmul.f32 %v4129_v24, %v4129_v24 }
  0xec   : > { %5704 = vst [vmem:[#allocation11_spill] sm:$0xff] %v4199_v22  ;;  %5705 = vst [vmem:[#allocation12_spill] sm:$0xff] %v4202_v26  ;;  %v717_v47 = vmul.f32 %v4132_v30, %v4132_v30  ;;  %v718_v58 = vmul.f32 %v4135_v31, %v4135_v31  ;;  %v719_v13 = vmul.f32 %v4139_v36, %v4139_v36 }
  0xed   : > { %5706 = vst [vmem:[#allocation13_spill] sm:$0xff] %v4208_v33  ;;  %5707 = vst [vmem:[#allocation14_spill] sm:$0xff] %v4211_v46  ;;  %v720_v29 = vmul.f32 %v4142_v37, %v4142_v37  ;;  %v721_v48 = vmul.f32 %v4145_v0, %v4145_v0  ;;  %v722_v49 = vmul.f32 %v4148_v1, %v4148_v1  ;;  %v747_v5 = vsel %vm464_vm0, %v715_v39, 0.0 }
  0xee   : > { %5708 = vst [vmem:[#allocation15_spill] sm:$0xff] %v4214_v57  ;;  %v723_v51 = vmul.f32 %v4151_v2, %v4151_v2  ;;  %v724_v52 = vmul.f32 %v4154_v3, %v4154_v3  ;;  %v725_v62 = vmul.f32 %v4157_v42, %v4157_v42  ;;  %v726_v28 = vmul.f32 %v4160_v7, %v4160_v7 }
  0xef   : > { %v727_v34 = vmul.f32 %v4163_v15, %v4163_v15  ;;  %v728_v43 = vmul.f32 %v4166_v16, %v4166_v16  ;;  %v729_v53 = vmul.f32 %v4169_v32, %v4169_v32  ;;  %v730_v18 = vmul.f32 %v4172_v8, %v4172_v8 }
  0xf0   : > { %v731_v54 = vmul.f32 %v4175_v10, %v4175_v10  ;;  %v732_v55 = vmul.f32 %v4178_v11, %v4178_v11  ;;  %v733_v60 = vmul.f32 %v4181_v12, %v4181_v12  ;;  %v734_v63 = vmul.f32 %v4184_v20, %v4184_v20 }
  0xf1   : > { %v735_v4 = vmul.f32 %v4187_v25, %v4187_v25  ;;  %v748_v41 = vsel %vm464_vm0, %v716_v40, 0.0  ;;  %v736_v6 = vmul.f32 %v4190_v45, %v4190_v45  ;;  %v737_v14 = vmul.f32 %v4193_v56, %v4193_v56 }
  0xf2   : > { %v4272_v17 = vmul.f32 %v4196_v21, %v4196_v21  ;;  %v749_v19 = vadd.f32 %v748_v41, %v747_v5  ;;  %v739_v35 = vmul.f32 %v4199_v22, %v4199_v22  ;;  %v750_v38 = vsel %vm464_vm0, %v717_v47, 0.0 }
  0xf3   : > { %v768_v39 = vsel %vm464_vm0, %v723_v51, 0.0  ;;  %v769_v40 = vsel %vm464_vm0, %v724_v52, 0.0  ;;  %v740_v45 = vmul.f32 %v4202_v26, %v4202_v26  ;;  %v741_v56 = vmul.f32 %v4205_v27, %v4205_v27 }
  0xf4   : > { %v751_v25 = vadd.f32 %v750_v38, %v749_v19  ;;  %v770_v20 = vadd.f32 %v769_v40, %v768_v39  ;;  %v742_v5 = vmul.f32 %v4208_v33, %v4208_v33  ;;  %v752_v41 = vsel %vm464_vm0, %v718_v58, 0.0 }
  0xf5   : > { %v771_v22 = vsel %vm464_vm0, %v725_v62, 0.0  ;;  %v789_v47 = vsel %vm464_vm0, %v731_v54, 0.0  ;;  %v743_v51 = vmul.f32 %v4211_v46, %v4211_v46  ;;  %v790_v26 = vsel %vm464_vm0, %v732_v55, 0.0 }
  0xf6   : > { %v753_v52 = vadd.f32 %v752_v41, %v751_v25  ;;  %v772_v21 = vadd.f32 %v771_v22, %v770_v20  ;;  %v744_v19 = vmul.f32 %v4214_v57, %v4214_v57  ;;  %v754_v38 = vsel %vm464_vm0, %v719_v13, 0.0 }
  0xf7   : > { %v773_v39 = vsel %vm464_vm0, %v726_v28, 0.0  ;;  %v791_v40 = vadd.f32 %v790_v26, %v789_v47  ;;  %v756_v62 = vsel %vm464_vm0, %v720_v29, 0.0  ;;  %v792_v54 = vsel %vm464_vm0, %v733_v60, 0.0 }
  0xf8   : > { %v755_v58 = vadd.f32 %v754_v38, %v753_v52  ;;  %v774_v33 = vadd.f32 %v773_v39, %v772_v21  ;;  %v775_v46 = vsel %vm464_vm0, %v727_v34, 0.0  ;;  %v810_v20 = vsel %vm464_vm0, %v739_v35, 0.0 }
  0xf9   : > { %v793_v25 = vadd.f32 %v792_v54, %v791_v40  ;;  %v811_v22 = vsel %vm464_vm0, %v740_v45, 0.0  ;;  %v794_v13 = vsel %vm464_vm0, %v734_v63, 0.0  ;;  %v758_v26 = vsel %vm464_vm0, %v721_v48, 0.0 }
  0xfa   : > { %v757_v55 = vadd.f32 %v756_v62, %v755_v58  ;;  %v776_v41 = vadd.f32 %v775_v46, %v774_v33  ;;  %v812_v57 = vadd.f32 %v811_v22, %v810_v20  ;;  %v777_v28 = vsel %vm464_vm0, %v728_v43, 0.0 }
  0xfb   : > { %v795_v29 = vadd.f32 %v794_v13, %v793_v25  ;;  %v813_v21 = vsel %vm464_vm0, %v741_v56, 0.0  ;;  %v796_v34 = vsel %vm464_vm0, %v735_v4, 0.0  ;;  %v760_v35 = vsel %vm464_vm0, %v722_v49, 0.0 }
  0xfc   : > { %v759_v60 = vadd.f32 %v758_v26, %v757_v55  ;;  %v778_v47 = vadd.f32 %v777_v28, %v776_v41  ;;  %v814_v52 = vadd.f32 %v813_v21, %v812_v57  ;;  %v779_v45 = vsel %vm464_vm0, %v729_v53, 0.0 }
  0xfd   : > { %v797_v33 = vadd.f32 %v796_v34, %v795_v29  ;;  %v815_v46 = vsel %vm464_vm0, %v742_v5, 0.0  ;;  %v798_v48 = vsel %vm464_vm0, %v736_v6, 0.0  ;;  %v745_v56 = vmul.f32 %v4217_v9, %v4217_v9 }
  0xfe   : > { %v761_v63 = vadd.f32 %v760_v35, %v759_v60  ;;  %v780_v38 = vadd.f32 %v779_v45, %v778_v47  ;;  %v816_v43 = vadd.f32 %v815_v46, %v814_v52  ;;  %v781_v39 = vsel %vm464_vm0, %v730_v18, 0.0 }
  0xff   : > { %v799_v40 = vadd.f32 %v798_v48, %v797_v33  ;;  %v817_v57 = vsel %vm464_vm0, %v743_v51, 0.0  ;;  %v800_v53 = vsel %vm464_vm0, %v737_v14, 0.0  ;;  %v746_v5 = vmul.f32 %v4220_v44, %v4220_v44 }
 0x100   : > { %v762_v4 = vrot.slane %v761_v63, 4  ;;  %v782_v49 = vadd.f32 %v781_v39, %v780_v38  ;;  %v818_v58 = vadd.f32 %v817_v57, %v816_v43  ;;  %v819_v6 = vsel %vm464_vm0, %v744_v19, 0.0 }
 0x101   : > { %v801_v62 = vadd.f32 %v800_v53, %v799_v40  ;;  %v802_v20 = vsel %vm464_vm0, %v4272_v17, 0.0  ;;  %v821_v51 = vsel %vm464_vm0, %v745_v56, 0.0  ;;  %v823_v26 = vsel %vm464_vm0, %v746_v5, 0.0  ;;  %v456_v53 = vld [vmem:[%s5672_s3 + $0x8] sm:$0xff] }
 0x102   : > { %v763_v54 = vadd.f32 %v762_v4, %v761_v63  ;;  %v783_v25 = vrot.slane %v782_v49, 4  ;;  %v820_v18 = vadd.f32 %v819_v6, %v818_v58  ;;  %v457_v58 = vld [vmem:[%s5672_s3 + $0x10] sm:$0xff] }
 0x103   : > { %v803_v22 = vadd.f32 %v802_v20, %v801_v62  ;;  %v458_v62 = vld [vmem:[%s5672_s3 + $0x18] sm:$0xff] }
 0x104   : > { %v764_v55 = vrot.slane %v763_v54, 2  ;;  %v784_v41 = vadd.f32 %v783_v25, %v782_v49  ;;  %v822_v13 = vadd.f32 %v821_v51, %v820_v18  ;;  %v455_v49 = vld [vmem:[%s5672_s3] sm:$0xff]  ;;  %v3352_v6 = vpack.c.bf16 %v458_v62, %v457_v58  ;;  %v460_v25 = vld [vmem:[%s5672_s3 + $0x28] sm:$0xff]  ;;  %v461_v18 = vld [vmem:[%s5672_s3 + $0x30] sm:$0xff] }
 0x105   : > { %v804_v14 = vrot.slane %v803_v22, 4  ;;  %v3348_v5 = vpack.c.bf16 %v456_v53, %v455_v49 }
 0x106   : > { %v765_v28 = vadd.f32 %v764_v55, %v763_v54  ;;  %v785_v29 = vrot.slane %v784_v41, 2  ;;  %v824_v21 = vadd.f32 %v823_v26, %v822_v13  ;;  %v459_v54 = vld [vmem:[%s5672_s3 + $0x20] sm:$0xff] }
 0x107   : > { %v805_v60 = vadd.f32 %v804_v14, %v803_v22  ;;  %3349 = vmatprep.subr.bf16.mxu0 %v3348_v5  ;;  %v3356_v20 = vpack.c.bf16 %v460_v25, %v459_v54  ;;  %v462_v22 = vld [vmem:[%s5672_s3 + $0x38] sm:$0xff] }
 0x108   : > { %v766_v19 = vrot.slane %v765_v28, 1  ;;  %v786_v47 = vadd.f32 %v785_v29, %v784_v41  ;;  %v825_v34 = vrot.slane %v824_v21, 4  ;;  %3351 = vmatpush3.bf16.msra.mxu0 %v3348_v5  ;;  %v3360_v51 = vpack.c.bf16 %v462_v22, %v461_v18 }
 0x109   : > { %v806_v52 = vrot.slane %v805_v60, 2  ;;  %3353 = vmatprep.subr.bf16.mxu0 %v3352_v6 }
 0x10a   : > { %v787_v35 = vrot.slane %v786_v47, 1  ;;  %v826_v17 = vadd.f32 %v825_v34, %v824_v21  ;;  %v767_v33 = vadd.f32 %v766_v19, %v765_v28 }
 0x10b   : > { %v807_v45 = vadd.f32 %v806_v52, %v805_v60 }
 0x10c   : > { %v788_v46 = vadd.f32 %v787_v35, %v786_v47  ;;  %v827_v63 = vrot.slane %v826_v17, 2  ;;  %3355 = vmatpush3.bf16.msra.mxu0 %v3352_v6 }
 0x10d   : > { %v808_v38 = vrot.slane %v807_v45, 1  ;;  %3357 = vmatprep.subr.bf16.mxu0 %v3356_v20 }
 0x10e   : > { %v828_v48 = vadd.f32 %v827_v63, %v826_v17  ;;  %v835_v43 = vsel %vm553_vm1, %v788_v46, %v767_v33 }
 0x10f   : > { %v809_v56 = vadd.f32 %v808_v38, %v807_v45 }
 0x110   : > { %v829_v39 = vrot.slane %v828_v48, 1  ;;  %3359 = vmatpush3.bf16.msra.mxu0 %v3356_v20  ;;  %v453_v20 = vld [vmem:[%s403_s22] sm:$0xf] }
 0x111   : > { %v836_v40 = vsel %vm555_vm2, %v809_v56, %v835_v43  ;;  %3361 = vmatprep.subr.bf16.mxu0 %v3360_v51  ;;  %v902_v18 = vadd.f32 1.0, %v453_v20 }
 0x112   : > { %v830_v57 = vadd.f32 %v829_v39, %v828_v48 }
 0x114   : > { %v837_v4 = vsel %vm557_vm3, %v830_v57, %v836_v40  ;;  %3363 = vmatpush3.bf16.msra.mxu0 %v3360_v51 }
 0x115   : > { %841 = vrot.lane.b32.xlu1 %v837_v4, %s3787_s26  ;;  %838 = vrot.lane.b32.xlu0 %v837_v4, %s3785_s18  ;;  %s411_s26 = scalar_lea.vmem %s5674_s5, %s4367_s27  ;;  %s3791_s18 = smov 32  }
 0x119   : > { %848 = vrot.lane.b32.xlu1 %v837_v4, %s3786_s24  ;;  %845 = vrot.lane.b32.xlu0 %v837_v4, %s3784_s12  ;;  %s415_s12 = scalar_lea.vmem %s5675_s6, %s4367_s27 }
 0x187   : > { %v842_v55 = vpop.permute.xlu1 %841  ;;  %v839_v41 = vpop.permute.xlu0 %838 }
 0x188   : > { %v844_v13 = vsel %vm565_vm5, %v839_v41, %v842_v55  ;;  %v989_v41 = vcombine.high %v2992_v59, %v2992_v59 }
 0x189   : > { %v853_v14 = vrot.slane %v844_v13, 1  ;;  %v854_v26 = vrot.slane %v844_v13, 2  ;;  %v855_v28 = vrot.slane %v844_v13, 3  ;;  %v860_v34 = vadd.f32 %v844_v13, %v767_v33 }
 0x18a   : > { %v4379_v13 = vrot.slane %v2992_v59, %v4112_v50 }
 0x18b   : > { %v861_v29 = vadd.f32 %v853_v14, %v788_v46  ;;  %v862_v21 = vadd.f32 %v854_v26, %v809_v56  ;;  %v849_v60 = vpop.permute.xlu1 %848  ;;  %v846_v19 = vpop.permute.xlu0 %845  ;;  %v863_v38 = vadd.f32 %v855_v28, %v830_v57 }
 0x18c   : > { %v851_v47 = vsel %vm573_vm4, %v846_v19, %v849_v60  ;;  %v1009_v60 = vrot.slane %v4379_v13, %v4118_v61  ;;  %v1004_v59 = vcombine.high %v4379_v13, %v4379_v13 }
 0x18d   : > { %v880_v52 = vrot.slane %v861_v29, 7  ;;  %v865_v35 = vrot.slane %v851_v47, 1  ;;  %v882_v17 = vrot.slane %v862_v21, 6  ;;  %v866_v45 = vrot.slane %v851_v47, 2 }
 0x18e   : > { %v867_v63 = vrot.slane %v851_v47, 3  ;;  %v872_v4 = vadd.f32 %v851_v47, %v767_v33  ;;  %v884_v5 = vrot.slane %v863_v38, 5  ;;  %v4390_v21 = vrot.slane %v989_v41, %v4112_v50 }
 0x18f   : > { %v881_v48 = vsel %vm553_vm1, %v880_v52, %v860_v34  ;;  %v873_v43 = vadd.f32 %v865_v35, %v788_v46  ;;  %v874_v39 = vadd.f32 %v866_v45, %v809_v56 }
 0x190   : > { %v875_v40 = vadd.f32 %v867_v63, %v830_v57  ;;  %v883_v53 = vsel %vm555_vm2, %v882_v17, %v881_v48  ;;  %v4409_v48 = vrot.slane %v4390_v21, %v4118_v61  ;;  %v1005_v13 = vcombine.high %v4390_v21, %v4390_v21 }
 0x191   : > { %v891_v49 = vrot.slane %v873_v43, 7  ;;  %v893_v58 = vrot.slane %v874_v39, 6  ;;  %v885_v25 = vsel %vm557_vm3, %v884_v5, %v883_v53 }
 0x192   : > { %v895_v6 = vrot.slane %v875_v40, 5 }
 0x193   : > { %v892_v62 = vsel %vm553_vm1, %v891_v49, %v872_v4 }
 0x194   : > { %v894_v54 = vsel %vm555_vm2, %v893_v58, %v892_v62 }
 0x195   : > { %v896_v46 = vsel %vm557_vm3, %v895_v6, %v894_v54 }
 0x196   : > { %v898_v33 = vsel %vm4105_vm6, %v885_v25, %v896_v46 }
 0x197   : > { %v899_v56 = vmul.f32 0.0078125, %v898_v33 }
 0x199   : > { %v900_v57 = vadd.f32 1e-05, %v899_v56 }
 0x19b   : > { %3449 = vrsqrt.f32 %v900_v57 }
 0x1a5   : > { %v3450_v22 = vpop.eup %3449 }
 0x1a6   : > { %v903_v51 = vmul.f32 %v3450_v22, %v902_v18 }
 0x1a8   : > { %v911_v55 = vrot.slane %v903_v51, %v4112_v50 }
 0x1aa   : > { %v912_v14 = vcombine.high %v911_v55, %v911_v55  ;;  %v4382_v26 = vrot.slane %v911_v55, %v4112_v50 }
 0x1ac   : > { %v4385_v28 = vrot.slane %v912_v14, %v4112_v50  ;;  %v932_v29 = vrot.slane %v4382_v26, %v4118_v61  ;;  %v927_v20 = vcombine.high %v4382_v26, %v4382_v26 }
 0x1ae   : > { %v4396_v19 = vrot.slane %v4385_v28, %v4118_v61  ;;  %v949_v47 = vmul.f32 %v932_v29, %v4126_v23  ;;  %v950_v34 = vmul.f32 %v932_v29, %v4129_v24  ;;  %v951_v52 = vmul.f32 %v932_v29, %v4132_v30 }
 0x1af   : > { %v952_v35 = vmul.f32 %v932_v29, %v4135_v31  ;;  %v953_v17 = vmul.f32 %v932_v29, %v4139_v36  ;;  %v954_v63 = vmul.f32 %v932_v29, %v4142_v37  ;;  %v955_v38 = vmul.f32 %v932_v29, %v4145_v0 }
 0x1b0   : > { %v4403_v45 = vadd.f32 %v1009_v60, %v949_v47  ;;  %v4411_v43 = vadd.f32 %v1009_v60, %v950_v34  ;;  %v4413_v23 = vadd.f32 %v1009_v60, %v951_v52  ;;  %v956_v37 = vmul.f32 %v932_v29, %v4148_v1 }
 0x1b1   : > { %v4415_v24 = vadd.f32 %v1009_v60, %v952_v35  ;;  %v4417_v30 = vadd.f32 %v1009_v60, %v953_v17  ;;  %v4420_v36 = vadd.f32 %v1009_v60, %v954_v63  ;;  %v4422_v39 = vadd.f32 %v1009_v60, %v955_v38 }
 0x1b2   : > { %v2993_v31 = vmul.f32 -1.442695, %v4403_v45  ;;  %v2994_v0 = vmul.f32 -1.442695, %v4411_v43  ;;  %v2995_v40 = vmul.f32 -1.442695, %v4413_v23  ;;  %v957_v49 = vmul.f32 %v4396_v19, %v4151_v2 }
 0x1b3   : > { %v2996_v4 = vmul.f32 -1.442695, %v4415_v24  ;;  %v2997_v53 = vmul.f32 -1.442695, %v4417_v30  ;;  %v2998_v58 = vmul.f32 -1.442695, %v4420_v36  ;;  %v4433_v62 = vadd.f32 %v1009_v60, %v956_v37 }
 0x1b4   : > { %3451 = vpow2.f32 %v2993_v31  ;;  %v2999_v5 = vmul.f32 -1.442695, %v4422_v39  ;;  %v4436_v1 = vadd.f32 %v4409_v48, %v957_v49  ;;  %v958_v6 = vmul.f32 %v4396_v19, %v4154_v3 }
 0x1b5   : > { %3453 = vpow2.f32 %v2994_v0  ;;  %v959_v2 = vmul.f32 %v4396_v19, %v4157_v42  ;;  %v960_v54 = vmul.f32 %v4396_v19, %v4160_v7  ;;  %v961_v25 = vmul.f32 %v4396_v19, %v4163_v15 }
 0x1b6   : > { %3455 = vpow2.f32 %v2995_v40  ;;  %v3000_v46 = vmul.f32 -1.442695, %v4433_v62  ;;  %v3001_v33 = vmul.f32 -1.442695, %v4436_v1  ;;  %v4449_v56 = vadd.f32 %v4409_v48, %v958_v6 }
 0x1b7   : > { %3457 = vpow2.f32 %v2996_v4  ;;  %v4452_v3 = vadd.f32 %v4409_v48, %v959_v2  ;;  %v4455_v42 = vadd.f32 %v4409_v48, %v960_v54  ;;  %v4458_v7 = vadd.f32 %v4409_v48, %v961_v25 }
 0x1b8   : > { %3459 = vpow2.f32 %v2997_v53  ;;  %v3002_v15 = vmul.f32 -1.442695, %v4449_v56  ;;  %v962_v55 = vmul.f32 %v4396_v19, %v4166_v16  ;;  %v4471_v14 = vrot.slane %v927_v20, %v4118_v61 }
 0x1b9   : > { %3461 = vpow2.f32 %v2998_v58  ;;  %v3003_v57 = vmul.f32 -1.442695, %v4452_v3  ;;  %v3004_v18 = vmul.f32 -1.442695, %v4455_v42  ;;  %v3005_v22 = vmul.f32 -1.442695, %v4458_v7 }
 0x1ba   : > { %3463 = vpow2.f32 %v2999_v5  ;;  %v963_v29 = vmul.f32 %v4396_v19, %v4169_v32  ;;  %v928_v52 = vcombine.high %v4385_v28, %v4385_v28  ;;  %v4480_v35 = vrot.slane %v1004_v59, %v4118_v61  ;;  %v5711_v59 = vld [vmem:[#allocation7_spill] sm:$0xff] }
 0x1bb   : > { %3465 = vpow2.f32 %v3000_v46  ;;  %v4483_v32 = vadd.f32 %v4409_v48, %v962_v55  ;;  %v964_v38 = vmul.f32 %v4396_v19, %v4172_v8  ;;  %v965_v28 = vmul.f32 %v4471_v14, %v4175_v10 }
 0x1bc   : > { %3467 = vpow2.f32 %v3001_v33  ;;  %v4488_v37 = vadd.f32 %v4409_v48, %v963_v29  ;;  %v966_v4 = vmul.f32 %v4471_v14, %v4178_v11  ;;  %v4495_v49 = vrot.slane %v1005_v13, %v4118_v61  ;;  %v5712_v29 = vld [vmem:[#allocation8_spill] sm:$0xff] }
 0x1bd   : > { %3469 = vpow2.f32 %v3002_v15  ;;  %v4498_v8 = vrot.slane %v928_v52, %v4118_v61  ;;  %v967_v58 = vmul.f32 %v4471_v14, %v4181_v12  ;;  %v3006_v6 = vmul.f32 -1.442695, %v4483_v32  ;;  %v5713_v52 = vld [vmem:[#allocation9_spill] sm:$0xff] }
 0x1be   : > { %v3452_v51 = vpop.eup %3451  ;;  %3471 = vpow2.f32 %v3003_v57  ;;  %v4504_v2 = vadd.f32 %v4409_v48, %v964_v38  ;;  %v3007_v25 = vmul.f32 -1.442695, %v4488_v37  ;;  %v4508_v46 = vadd.f32 %v4480_v35, %v965_v28  ;;  %v5710_v57 = vld [vmem:[#allocation6_spill] sm:$0xff] }
 0x1bf   : > { %v3454_v41 = vpop.eup %3453  ;;  %v1154_v26 = vadd.f32 1.0, %v3452_v51  ;;  %3473 = vpow2.f32 %v3004_v18  ;;  %v4511_v12 = vadd.f32 %v4480_v35, %v966_v4  ;;  %v968_v20 = vmul.f32 %v4471_v14, %v5710_v57 }
 0x1c0   : > { %v3456_v60 = vpop.eup %3455  ;;  %v1155_v47 = vadd.f32 1.0, %v3454_v41  ;;  %3475 = vpow2.f32 %v3005_v22  ;;  %v4516_v22 = vadd.f32 %v4480_v35, %v967_v58  ;;  %v969_v51 = vmul.f32 %v4471_v14, %v5711_v59  ;;  %v5715_v58 = vld [vmem:[#allocation11_spill] sm:$0xff] }
 0x1c1   : > { %v3458_v34 = vpop.eup %3457  ;;  %3477 = vrcp.f32 %v1154_v26  ;;  %v1156_v16 = vadd.f32 1.0, %v3456_v60  ;;  %v3008_v26 = vmul.f32 -1.442695, %v4504_v2  ;;  %v970_v60 = vmul.f32 %v4471_v14, %v5712_v29 }
 0x1c2   : > { %v3460_v17 = vpop.eup %3459  ;;  %3479 = vrcp.f32 %v1155_v47  ;;  %v1157_v63 = vadd.f32 1.0, %v3458_v34  ;;  %v3009_v34 = vmul.f32 -1.442695, %v4508_v46  ;;  %v4528_v38 = vadd.f32 %v4480_v35, %v968_v20 }
 0x1c3   : > { %v3462_v31 = vpop.eup %3461  ;;  %3481 = vrcp.f32 %v1156_v16  ;;  %v1158_v21 = vadd.f32 1.0, %v3460_v17  ;;  %v971_v16 = vmul.f32 %v4471_v14, %v5713_v52  ;;  %v4535_v4 = vadd.f32 %v4480_v35, %v969_v51  ;;  %v5716_v51 = vld [vmem:[#allocation12_spill] sm:$0xff] }
 0x1c4   : > { %v3464_v0 = vpop.eup %3463  ;;  %3483 = vrcp.f32 %v1157_v63  ;;  %v1159_v40 = vadd.f32 1.0, %v3462_v31  ;;  %v5714_v31 = vld [vmem:[#allocation10_spill] sm:$0xff] }
 0x1c5   : > { %v3466_v53 = vpop.eup %3465  ;;  %3485 = vrcp.f32 %v1158_v21  ;;  %v1160_v19 = vadd.f32 1.0, %v3464_v0  ;;  %v972_v21 = vmul.f32 %v4471_v14, %v5714_v31  ;;  %v973_v14 = vmul.f32 %v4498_v8, %v5715_v58 }
 0x1c6   : > { %v3468_v5 = vpop.eup %3467  ;;  %3487 = vrcp.f32 %v1159_v40  ;;  %v1161_v10 = vadd.f32 1.0, %v3466_v53  ;;  %v3010_v40 = vmul.f32 -1.442695, %v4511_v12 }
 0x1c7   : > { %v3470_v11 = vpop.eup %3469  ;;  %3489 = vrcp.f32 %v1160_v19  ;;  %v1162_v54 = vadd.f32 1.0, %v3468_v5  ;;  %v4540_v19 = vadd.f32 %v4480_v35, %v970_v60 }
 0x1c8   : > { %v3472_v33 = vpop.eup %3471  ;;  %3491 = vrcp.f32 %v1161_v10  ;;  %v1163_v15 = vadd.f32 1.0, %v3470_v11  ;;  %v4547_v10 = vadd.f32 %v4480_v35, %v971_v16 }
 0x1c9   : > { %v3474_v18 = vpop.eup %3473  ;;  %3493 = vrcp.f32 %v1162_v54  ;;  %v1164_v48 = vadd.f32 1.0, %v3472_v33  ;;  %v3014_v20 = vmul.f32 -1.442695, %v4540_v19 }
 0x1ca   : > { %v3476_v55 = vpop.eup %3475  ;;  %3495 = vrcp.f32 %v1163_v15  ;;  %v1165_v41 = vadd.f32 1.0, %v3474_v18  ;;  %v4559_v18 = vadd.f32 %v4495_v49, %v973_v14 }
 0x1cb   : > { %v3478_v47 = vpop.eup %3477  ;;  %3497 = vrcp.f32 %v1164_v48  ;;  %v1166_v13 = vadd.f32 1.0, %v3476_v55 }
 0x1cc   : > { %v3480_v17 = vpop.eup %3479  ;;  %v1250_v63 = vmul.f32 %v3478_v47, %v4403_v45  ;;  %3499 = vrcp.f32 %v1165_v41  ;;  %v3017_v60 = vmul.f32 -1.442695, %v4559_v18 }
 0x1cd   : > { %v3482_v28 = vpop.eup %3481  ;;  %v1251_v0 = vmul.f32 %v3480_v17, %v4411_v43  ;;  %3501 = vrcp.f32 %v1166_v13  ;;  %v3011_v43 = vmul.f32 -1.442695, %v4516_v22 }
 0x1ce   : > { %v3484_v53 = vpop.eup %3483  ;;  %3228 = vmatprep.mubr.msk.f32.mxu0 %vm464_vm0, %v1250_v63  ;;  %v1252_v45 = vmul.f32 %v3482_v28, %v4413_v23  ;;  %3503 = vpow2.f32 %v3006_v6  ;;  %v3012_v23 = vmul.f32 -1.442695, %v4528_v38  ;;  %v4552_v6 = vadd.f32 %v4480_v35, %v972_v21 }
 0x1cf   : > { %v3486_v5 = vpop.eup %3485  ;;  %3229 = vmatmul.mubr.msk.f32.vlgmr.msra.gmra.mrb[0].mxu0 %vm464_vm0, %v1251_v0  ;;  %3505 = vpow2.f32 %v3007_v25  ;;  %v1253_v33 = vmul.f32 %v3484_v53, %v4415_v24  ;;  %v3013_v25 = vmul.f32 -1.442695, %v4535_v4  ;;  %v3015_v35 = vmul.f32 -1.442695, %v4547_v10  ;;  %v5717_v53 = vld [vmem:[#allocation13_spill] sm:$0xff] }
 0x1d0   : > { %v3488_v11 = vpop.eup %3487  ;;  %3231 = vmatprep.mubr.msk.f32.mxu0 %vm464_vm0, %v1252_v45  ;;  %3507 = vpow2.f32 %v3008_v26  ;;  %v1254_v57 = vmul.f32 %v3486_v5, %v4417_v30  ;;  %v3016_v24 = vmul.f32 -1.442695, %v4552_v6  ;;  %v974_v30 = vmul.f32 %v4498_v8, %v5716_v51 }
 0x1d1   : > { %v3490_v54 = vpop.eup %3489  ;;  %3509 = vpow2.f32 %v3009_v34  ;;  %v1255_v41 = vmul.f32 %v3488_v11, %v4420_v36  ;;  %v975_v28 = vmul.f32 %v4498_v8, %v4205_v27  ;;  %v5718_v11 = vld [vmem:[#allocation14_spill] sm:$0xff]  ;;  %v980_v51 = vmul.f32 %v4498_v8, %v4220_v44 }
 0x1d2   : > { %v3492_v15 = vpop.eup %3491  ;;  %3511 = vpow2.f32 %v3010_v40  ;;  %v1256_v29 = vmul.f32 %v3490_v54, %v4422_v39  ;;  %v4573_v34 = vadd.f32 %v4495_v49, %v974_v30 }
 0x1d3   : > { %v3494_v48 = vpop.eup %3493  ;;  %3232 = vmatmul.mubr.msk.f32.gmra.mrb[2].mxu0 %vm464_vm0, %v1253_v33  ;;  %3513 = vpow2.f32 %v3011_v43  ;;  %v1257_v36 = vmul.f32 %v3492_v15, %v4433_v62  ;;  %v5719_v15 = vld [vmem:[#allocation15_spill] sm:$0xff] }
 0x1d4   : > { %v3496_v59 = vpop.eup %3495  ;;  %3234 = vmatprep.mubr.msk.f32.mxu0 %vm464_vm0, %v1254_v57  ;;  %3515 = vpow2.f32 %v3012_v23  ;;  %v1258_v39 = vmul.f32 %v3494_v48, %v4436_v1  ;;  %v3018_v62 = vmul.f32 -1.442695, %v4573_v34  ;;  %v976_v1 = vmul.f32 %v4498_v8, %v5717_v53 }
 0x1d5   : > { %v3498_v55 = vpop.eup %3497  ;;  %3517 = vpow2.f32 %v3013_v25  ;;  %v1259_v58 = vmul.f32 %v3496_v59, %v4449_v56  ;;  %v977_v23 = vmul.f32 %v4498_v8, %v5718_v11  ;;  %v4590_v25 = vadd.f32 %v4495_v49, %v975_v28 }
 0x1d6   : > { %v3500_v26 = vpop.eup %3499  ;;  %3519 = vpow2.f32 %v3014_v20  ;;  %v1260_v43 = vmul.f32 %v3498_v55, %v4452_v3  ;;  %v978_v56 = vmul.f32 %v4498_v8, %v5719_v15  ;;  %v4596_v3 = vadd.f32 %v4495_v49, %v976_v1 }
 0x1d7   : > { %v3502_v47 = vpop.eup %3501  ;;  %3235 = vmatmul.mubr.msk.f32.gmra.mrb[4].mxu0 %vm464_vm0, %v1255_v41  ;;  %3521 = vpow2.f32 %v3015_v35  ;;  %v979_v48 = vmul.f32 %v4498_v8, %v4217_v9  ;;  %v1261_v59 = vmul.f32 %v3500_v26, %v4455_v42  ;;  %v3019_v44 = vmul.f32 -1.442695, %v4590_v25 }
 0x1d8   : > { %v3504_v13 = vpop.eup %3503  ;;  %3237 = vmatprep.mubr.msk.f32.mxu0 %vm464_vm0, %v1256_v29  ;;  %3523 = vpow2.f32 %v3016_v24  ;;  %v1262_v55 = vmul.f32 %v3502_v47, %v4458_v7  ;;  %v4605_v29 = vadd.f32 %v4495_v49, %v977_v23  ;;  %v3020_v26 = vmul.f32 -1.442695, %v4596_v3 }
 0x1d9   : > { %v3506_v52 = vpop.eup %3505  ;;  %v1167_v16 = vadd.f32 1.0, %v3504_v13  ;;  %3525 = vpow2.f32 %v3017_v60  ;;  %v4609_v60 = vadd.f32 %v4495_v49, %v978_v56  ;;  %v4614_v7 = vadd.f32 %v4495_v49, %v979_v48 }
 0x1da   : > { %v3508_v17 = vpop.eup %3507  ;;  %v1168_v63 = vadd.f32 1.0, %v3506_v52  ;;  %v4618_v47 = vadd.f32 %v4495_v49, %v980_v51 }
 0x1db   : > { %v3510_v31 = vpop.eup %3509  ;;  %3238 = vmatmul.mubr.msk.f32.gmra.mrb[6].mxu0 %vm464_vm0, %v1257_v36  ;;  %3527 = vrcp.f32 %v1167_v16  ;;  %v1169_v21 = vadd.f32 1.0, %v3508_v17  ;;  %v3021_v36 = vmul.f32 -1.442695, %v4605_v29 }
 0x1dc   : > { %v3512_v0 = vpop.eup %3511  ;;  %3240 = vmatprep.mubr.msk.f32.mxu0 %vm464_vm0, %v1258_v39  ;;  %3529 = vrcp.f32 %v1168_v63  ;;  %v1170_v40 = vadd.f32 1.0, %v3510_v31  ;;  %v3022_v39 = vmul.f32 -1.442695, %v4609_v60  ;;  %v3023_v31 = vmul.f32 -1.442695, %v4614_v7 }
 0x1dd   : > { %v3514_v45 = vpop.eup %3513  ;;  %3531 = vrcp.f32 %v1169_v21  ;;  %v1171_v14 = vadd.f32 1.0, %v3512_v0 }
 0x1de   : > { %v3516_v5 = vpop.eup %3515  ;;  %3533 = vrcp.f32 %v1170_v40  ;;  %v1172_v27 = vadd.f32 1.0, %v3514_v45 }
 0x1df   : > { %v3518_v54 = vpop.eup %3517  ;;  %3241 = vmatmul.mubr.msk.f32.gmra.mrb[8].mxu0 %vm464_vm0, %v1259_v58  ;;  %v1173_v33 = vadd.f32 1.0, %v3516_v5  ;;  %3535 = vpow2.f32 %v3018_v62 }
 0x1e0   : > { %v3520_v57 = vpop.eup %3519  ;;  %3243 = vmatprep.mubr.msk.f32.mxu0 %vm464_vm0, %v1260_v43  ;;  %v1174_v20 = vadd.f32 1.0, %v3518_v54  ;;  %3537 = vrcp.f32 %v1171_v14 }
 0x1e1   : > { %v3522_v35 = vpop.eup %3521  ;;  %v1175_v24 = vadd.f32 1.0, %v3520_v57  ;;  %3539 = vrcp.f32 %v1172_v27 }
 0x1e2   : > { %v3524_v30 = vpop.eup %3523  ;;  %v1176_v41 = vadd.f32 1.0, %v3522_v35  ;;  %3541 = vrcp.f32 %v1173_v33 }
 0x1e3   : > { %3244 = vmatmul.mubr.msk.f32.gmra.mrb[10].mxu0 %vm464_vm0, %v1261_v59  ;;  %v1177_v9 = vadd.f32 1.0, %v3524_v30  ;;  %v3526_v42 = vpop.eup %3525  ;;  %3543 = vrcp.f32 %v1174_v20 }
 0x1e4   : > { %3246 = vmatprep.mubr.msk.f32.mxu0 %vm464_vm0, %v1262_v55  ;;  %3545 = vrcp.f32 %v1175_v24  ;;  %v1178_v28 = vadd.f32 1.0, %v3526_v42 }
 0x1e5   : > { %v3528_v8 = vpop.eup %3527  ;;  %3547 = vrcp.f32 %v1176_v41 }
 0x1e6   : > { %v3530_v13 = vpop.eup %3529  ;;  %v1263_v52 = vmul.f32 %v3528_v8, %v4483_v32  ;;  %3549 = vrcp.f32 %v1177_v9  ;;  %v3024_v32 = vmul.f32 -1.442695, %v4618_v47 }
 0x1e7   : > { %v3532_v16 = vpop.eup %3531  ;;  %v1264_v17 = vmul.f32 %v3530_v13, %v4488_v37  ;;  %3551 = vpow2.f32 %v3019_v44 }
 0x1e8   : > { %v3534_v63 = vpop.eup %3533  ;;  %3247 = vmatmul.mubr.msk.f32.gmra.mrb[12].mxu0 %vm464_vm0, %v1263_v52  ;;  %3553 = vpow2.f32 %v3020_v26  ;;  %v1265_v21 = vmul.f32 %v3532_v16, %v4504_v2 }
 0x1e9   : > { %3249 = vmatprep.mubr.msk.f32.mxu0 %vm464_vm0, %v1264_v17  ;;  %v3536_v49 = vpop.eup %3535  ;;  %3555 = vpow2.f32 %v3021_v36  ;;  %v1266_v0 = vmul.f32 %v3534_v63, %v4508_v46 }
 0x1ea   : > { %v3538_v37 = vpop.eup %3537  ;;  %3557 = vpow2.f32 %v3022_v39  ;;  %v1179_v53 = vadd.f32 1.0, %v3536_v49 }
 0x1eb   : > { %v3540_v40 = vpop.eup %3539  ;;  %3559 = vpow2.f32 %v3023_v31  ;;  %v1267_v45 = vmul.f32 %v3538_v37, %v4511_v12 }
 0x1ec   : > { %3250 = vmatmul.mubr.msk.f32.gmra.mrb[14].mxu0 %vm464_vm0, %v1265_v21  ;;  %v3542_v62 = vpop.eup %3541  ;;  %3561 = vpow2.f32 %v3024_v32  ;;  %v1268_v58 = vmul.f32 %v3540_v40, %v4516_v22 }
 0x1ed   : > { %3252 = vmatprep.mubr.msk.f32.mxu0 %vm464_vm0, %v1266_v0  ;;  %v3544_v1 = vpop.eup %3543  ;;  %3563 = vrcp.f32 %v1178_v28  ;;  %v1269_v43 = vmul.f32 %v3542_v62, %v4528_v38 }
 0x1ee   : > { %v3546_v2 = vpop.eup %3545  ;;  %3565 = vrcp.f32 %v1179_v53  ;;  %v1270_v11 = vmul.f32 %v3544_v1, %v4535_v4 }
 0x1ef   : > { %v3548_v14 = vpop.eup %3547  ;;  %v1271_v56 = vmul.f32 %v3546_v2, %v4540_v19 }
 0x1f0   : > { %3253 = vmatmul.mubr.msk.f32.gmra.mrb[16].mxu0 %vm464_vm0, %v1267_v45  ;;  %v3550_v46 = vpop.eup %3549  ;;  %v1272_v38 = vmul.f32 %v3548_v14, %v4547_v10 }
 0x1f1   : > { %3255 = vmatprep.mubr.msk.f32.mxu0 %vm464_vm0, %v1268_v58  ;;  %v3552_v5 = vpop.eup %3551  ;;  %v1273_v59 = vmul.f32 %v3550_v46, %v4552_v6 }
 0x1f2   : > { %v3554_v27 = vpop.eup %3553  ;;  %v1180_v23 = vadd.f32 1.0, %v3552_v5 }
 0x1f3   : > { %v3556_v54 = vpop.eup %3555  ;;  %v1181_v12 = vadd.f32 1.0, %v3554_v27 }
 0x1f4   : > { %3256 = vmatmul.mubr.msk.f32.gmra.mrb[18].mxu0 %vm464_vm0, %v1269_v43  ;;  %v3558_v33 = vpop.eup %3557  ;;  %3567 = vrcp.f32 %v1180_v23  ;;  %v1182_v22 = vadd.f32 1.0, %v3556_v54 }
 0x1f5   : > { %3258 = vmatprep.mubr.msk.f32.mxu0 %vm464_vm0, %v1270_v11  ;;  %v3560_v15 = vpop.eup %3559  ;;  %3569 = vrcp.f32 %v1181_v12  ;;  %v1183_v57 = vadd.f32 1.0, %v3558_v33 }
 0x1f6   : > { %v3562_v20 = vpop.eup %3561  ;;  %3571 = vrcp.f32 %v1182_v22  ;;  %v1184_v4 = vadd.f32 1.0, %v3560_v15 }
 0x1f7   : > { %v3564_v48 = vpop.eup %3563  ;;  %3573 = vrcp.f32 %v1183_v57  ;;  %v1185_v35 = vadd.f32 1.0, %v3562_v20 }
 0x1f8   : > { %3259 = vmatmul.mubr.msk.f32.gmra.mrb[20].mxu0 %vm464_vm0, %v1271_v56  ;;  %3575 = vrcp.f32 %v1184_v4  ;;  %v3566_v24 = vpop.eup %3565  ;;  %v1274_v19 = vmul.f32 %v3564_v48, %v4559_v18  ;;  %v3789_v48 = vmov 0.0  }
 0x1f9   : > { %3261 = vmatprep.mubr.msk.f32.mxu0 %vm464_vm0, %v1272_v38  ;;  %3577 = vrcp.f32 %v1185_v35  ;;  %v1275_v10 = vmul.f32 %v3566_v24, %v4573_v34  ;;  %2412 = vrot.lane.b32.xlu0 %v3789_v48, %s3790_s16 }
 0x1fc   : > { %3262 = vmatmul.mubr.msk.f32.gmra.mrb[22].mxu0 %vm464_vm0, %v1273_v59 }
 0x1fd   : > { %3264 = vmatprep.mubr.msk.f32.mxu0 %vm464_vm0, %v1274_v19 }
 0x1fe   : > { %v3568_v51 = vpop.eup %3567 }
 0x1ff   : > { %v3570_v30 = vpop.eup %3569  ;;  %v1276_v55 = vmul.f32 %v3568_v51, %v4590_v25 }
 0x200   : > { %3265 = vmatmul.mubr.msk.f32.gmra.mrb[24].mxu0 %vm464_vm0, %v1275_v10  ;;  %v3572_v41 = vpop.eup %3571  ;;  %v1277_v6 = vmul.f32 %v3570_v30, %v4596_v3  ;;  %v4665_v3 = vld [vmem:[%s5673_s4] ss:$0 sm:$0xff] }
 0x201   : > { %3267 = vmatprep.mubr.msk.f32.mxu0 %vm464_vm0, %v1276_v55  ;;  %v3574_v9 = vpop.eup %3573  ;;  %v1278_v18 = vmul.f32 %v3572_v41, %v4605_v29 }
 0x202   : > { %v3576_v42 = vpop.eup %3575  ;;  %v1279_v34 = vmul.f32 %v3574_v9, %v4609_v60 }
 0x203   : > { %v3578_v44 = vpop.eup %3577  ;;  %v1280_v8 = vmul.f32 %v3576_v42, %v4614_v7 }
 0x204   : > { %3268 = vmatmul.mubr.msk.f32.gmra.mrb[26].mxu0 %vm464_vm0, %v1277_v6  ;;  %v1281_v25 = vmul.f32 %v3578_v44, %v4618_v47 }
 0x205   : > { %3270 = vmatprep.mubr.msk.f32.mxu0 %vm464_vm0, %v1278_v18 }
 0x208   : > { %3271 = vmatmul.mubr.msk.f32.gmra.mrb[28].mxu0 %vm464_vm0, %v1279_v34 }
 0x209   : > { %3273 = vmatprep.mubr.msk.f32.mxu0 %vm464_vm0, %v1280_v8 }
 0x20c   : > { %3274 = vmatmul.mubr.msk.f32.gmra.mrb[30].mxu0 %vm464_vm0, %v1281_v25 }
 0x2a2   : > { %v3230_v29 = vpop.f32.mrb[0].mxu0 }
 0x2a3   : > { %v4668_v60 = vadd.f32 %v3230_v29, %v4665_v3  ;;  %v1450_v26 = vpop.f32.mrb[1].mxu0 }
 0x2a4   : > { %v4671_v7 = vadd.f32 %v4665_v3, %v1450_v26 }
 0x2a5   : > { %v1626_v13 = vsel %vm1624_vm7, %v4668_v60, 0.0 }
 0x2a6   : > { %v1625_v47 = vsel %vm1624_vm7, %v4671_v7, 0.0  ;;  %v3233_v52 = vpop.f32.mrb[2].mxu0 }
 0x2a7   : > { %v1627_v36 = vadd.f32 %v1626_v13, %v1625_v47  ;;  %v1460_v16 = vpop.f32.mrb[3].mxu0  ;;  %v4678_v17 = vadd.f32 %v3233_v52, %v4665_v3 }
 0x2a8   : > { %v4681_v39 = vadd.f32 %v4665_v3, %v1460_v16 }
 0x2a9   : > { %v1630_v21 = vsel %vm1624_vm7, %v4678_v17, 0.0 }
 0x2aa   : > { %v1628_v63 = vsel %vm1624_vm7, %v4681_v39, 0.0  ;;  %v3236_v31 = vpop.f32.mrb[4].mxu0 }
 0x2ab   : > { %v1629_v32 = vadd.f32 %v1628_v63, %v1627_v36  ;;  %v1470_v49 = vpop.f32.mrb[5].mxu0  ;;  %v1476_v28 = vadd.f32 %v3236_v31, %v4665_v3 }
 0x2ac   : > { %v1471_v37 = vadd.f32 %v4665_v3, %v1470_v49 }
 0x2ad   : > { %v1631_v0 = vadd.f32 %v1630_v21, %v1629_v32  ;;  %v1634_v45 = vsel %vm1624_vm7, %v1476_v28, 0.0 }
 0x2ae   : > { %v1632_v40 = vsel %vm1624_vm7, %v1471_v37, 0.0  ;;  %v3239_v62 = vpop.f32.mrb[6].mxu0 }
 0x2af   : > { %v1633_v53 = vadd.f32 %v1632_v40, %v1631_v0  ;;  %v1480_v1 = vpop.f32.mrb[7].mxu0  ;;  %v1486_v2 = vadd.f32 %v3239_v62, %v4665_v3 }
 0x2b0   : > { %v1481_v58 = vadd.f32 %v4665_v3, %v1480_v1 }
 0x2b1   : > { %v1635_v14 = vadd.f32 %v1634_v45, %v1633_v53  ;;  %v1638_v23 = vsel %vm1624_vm7, %v1486_v2, 0.0 }
 0x2b2   : > { %v1636_v46 = vsel %vm1624_vm7, %v1481_v58, 0.0  ;;  %v3242_v5 = vpop.f32.mrb[8].mxu0 }
 0x2b3   : > { %v1637_v43 = vadd.f32 %v1636_v46, %v1635_v14  ;;  %v4695_v27 = vadd.f32 %v3242_v5, %v4665_v3  ;;  %v1490_v11 = vpop.f32.mrb[9].mxu0 }
 0x2b4   : > { %v4699_v54 = vadd.f32 %v4665_v3, %v1490_v11 }
 0x2b5   : > { %v1639_v12 = vadd.f32 %v1638_v23, %v1637_v43  ;;  %v1647_v33 = vsel %vm1624_vm7, %v4695_v27, 0.0 }
 0x2b6   : > { %v1646_v22 = vsel %vm1624_vm7, %v4699_v54, 0.0  ;;  %v3245_v15 = vpop.f32.mrb[10].mxu0 }
 0x2b7   : > { %v1640_v56 = vrot.slane %v1639_v12, 4  ;;  %v1648_v57 = vadd.f32 %v1647_v33, %v1646_v22  ;;  %v1500_v20 = vpop.f32.mrb[11].mxu0  ;;  %v4706_v38 = vadd.f32 %v3245_v15, %v4665_v3 }
 0x2b8   : > { %v4709_v4 = vadd.f32 %v4665_v3, %v1500_v20 }
 0x2b9   : > { %v1641_v35 = vadd.f32 %v1640_v56, %v1639_v12  ;;  %v1651_v51 = vsel %vm1624_vm7, %v4706_v38, 0.0 }
 0x2ba   : > { %v1649_v59 = vsel %vm1624_vm7, %v4709_v4, 0.0 }
 0x2bb   : > { %v1642_v24 = vrot.slane %v1641_v35, 2  ;;  %v1650_v19 = vadd.f32 %v1649_v59, %v1648_v57  ;;  %v3248_v10 = vpop.f32.mrb[12].mxu0 }
 0x2bc   : > { %v1510_v30 = vpop.f32.mrb[13].mxu0  ;;  %v4717_v41 = vadd.f32 %v3248_v10, %v4665_v3 }
 0x2bd   : > { %v1643_v55 = vadd.f32 %v1642_v24, %v1641_v35  ;;  %v4720_v6 = vadd.f32 %v4665_v3, %v1510_v30  ;;  %v1652_v9 = vadd.f32 %v1651_v51, %v1650_v19 }
 0x2be   : > { %v1655_v29 = vsel %vm1624_vm7, %v4717_v41, 0.0 }
 0x2bf   : > { %v1644_v18 = vrot.slane %v1643_v55, 1  ;;  %v1653_v42 = vsel %vm1624_vm7, %v4720_v6, 0.0  ;;  %v3251_v34 = vpop.f32.mrb[14].mxu0 }
 0x2c0   : > { %v1654_v44 = vadd.f32 %v1653_v42, %v1652_v9  ;;  %v1520_v8 = vpop.f32.mrb[15].mxu0  ;;  %v4732_v16 = vadd.f32 %v3251_v34, %v4665_v3 }
 0x2c1   : > { %v1645_v25 = vadd.f32 %v1644_v18, %v1643_v55  ;;  %v4727_v26 = vadd.f32 %v4665_v3, %v1520_v8 }
 0x2c2   : > { %v1656_v13 = vadd.f32 %v1655_v29, %v1654_v44  ;;  %v1659_v5 = vsel %vm1624_vm7, %v4732_v16, 0.0 }
 0x2c3   : > { %v1709_v47 = vmul.f32 0.015625, %v1645_v25  ;;  %v1657_v52 = vsel %vm1624_vm7, %v4727_v26, 0.0  ;;  %v3254_v36 = vpop.f32.mrb[16].mxu0 }
 0x2c4   : > { %v1658_v63 = vadd.f32 %v1657_v52, %v1656_v13  ;;  %v1530_v31 = vpop.f32.mrb[17].mxu0 }
 0x2c5   : > { %v4735_v32 = vsub.f32 %v4671_v7, %v1709_v47  ;;  %v4738_v49 = vsub.f32 %v4668_v60, %v1709_v47  ;;  %v4741_v21 = vsub.f32 %v4681_v39, %v1709_v47  ;;  %v4744_v0 = vsub.f32 %v4678_v17, %v1709_v47 }
 0x2c6   : > { %v4746_v40 = vsub.f32 %v1471_v37, %v1709_v47  ;;  %v4748_v62 = vsub.f32 %v1476_v28, %v1709_v47  ;;  %v4750_v53 = vsub.f32 %v1481_v58, %v1709_v47  ;;  %v4752_v1 = vsub.f32 %v1486_v2, %v1709_v47 }
 0x2c7   : > { %v1745_v7 = vmul.f32 %v4735_v32, %v4735_v32  ;;  %v1746_v60 = vmul.f32 %v4738_v49, %v4738_v49  ;;  %v1747_v39 = vmul.f32 %v4741_v21, %v4741_v21  ;;  %v4761_v17 = vadd.f32 %v3254_v36, %v4665_v3  ;;  %v3257_v37 = vpop.f32.mrb[18].mxu0 }
 0x2c8   : > { %v1748_v28 = vmul.f32 %v4744_v0, %v4744_v0  ;;  %v1540_v45 = vpop.f32.mrb[19].mxu0  ;;  %v1749_v14 = vmul.f32 %v4746_v40, %v4746_v40  ;;  %v1660_v11 = vadd.f32 %v1659_v5, %v1658_v63  ;;  %v4775_v12 = vadd.f32 %v4665_v3, %v1530_v31 }
 0x2c9   : > { %v1777_v2 = vsel %vm1624_vm7, %v1745_v7, 0.0  ;;  %v1778_v58 = vsel %vm1624_vm7, %v1746_v60, 0.0  ;;  %v1780_v43 = vsel %vm1624_vm7, %v1747_v39, 0.0  ;;  %v1668_v23 = vsel %vm1624_vm7, %v4761_v17, 0.0 }
 0x2ca   : > { %v1779_v46 = vadd.f32 %v1778_v58, %v1777_v2  ;;  %v1750_v22 = vmul.f32 %v4748_v62, %v4748_v62  ;;  %v1782_v56 = vsel %vm1624_vm7, %v1748_v28, 0.0  ;;  %v4781_v57 = vadd.f32 %v4665_v3, %v1540_v45 }
 0x2cb   : > { %v3260_v33 = vpop.f32.mrb[20].mxu0  ;;  %v1661_v48 = vrot.slane %v1660_v11, 4  ;;  %v1667_v35 = vsel %vm1624_vm7, %v4775_v12, 0.0  ;;  %v4786_v59 = vadd.f32 %v3257_v37, %v4665_v3  ;;  %v1751_v30 = vmul.f32 %v4750_v53, %v4750_v53 }
 0x2cc   : > { %v1781_v15 = vadd.f32 %v1780_v43, %v1779_v46  ;;  %v1550_v20 = vpop.f32.mrb[21].mxu0  ;;  %v1669_v10 = vadd.f32 %v1668_v23, %v1667_v35  ;;  %v1670_v51 = vsel %vm1624_vm7, %v4781_v57, 0.0  ;;  %v1752_v55 = vmul.f32 %v4752_v1, %v4752_v1 }
 0x2cd   : > { %v4789_v24 = vadd.f32 %v4665_v3, %v1550_v20  ;;  %v1784_v9 = vsel %vm1624_vm7, %v1749_v14, 0.0  ;;  %v1662_v18 = vadd.f32 %v1661_v48, %v1660_v11  ;;  %v1786_v44 = vsel %vm1624_vm7, %v1750_v22, 0.0 }
 0x2ce   : > { %v1783_v19 = vadd.f32 %v1782_v56, %v1781_v15  ;;  %v1671_v8 = vadd.f32 %v1670_v51, %v1669_v10  ;;  %v4800_v25 = vadd.f32 %v3260_v33, %v4665_v3  ;;  %v1672_v47 = vsel %vm1624_vm7, %v4786_v59, 0.0 }
 0x2cf   : > { %v3263_v42 = vpop.f32.mrb[22].mxu0  ;;  %v1663_v13 = vrot.slane %v1662_v18, 2  ;;  %v1674_v52 = vsel %vm1624_vm7, %v4789_v24, 0.0  ;;  %v1788_v7 = vsel %vm1624_vm7, %v1751_v30, 0.0  ;;  %v1790_v60 = vsel %vm1624_vm7, %v1752_v55, 0.0 }
 0x2d0   : > { %v1785_v34 = vadd.f32 %v1784_v9, %v1783_v19  ;;  %v1560_v29 = vpop.f32.mrb[23].mxu0  ;;  %v1673_v31 = vadd.f32 %v1672_v47, %v1671_v8  ;;  %v1676_v45 = vsel %vm1624_vm7, %v4800_v25, 0.0  ;;  %v4817_v5 = vadd.f32 %v3263_v42, %v4665_v3 }
 0x2d1   : > { %v4807_v36 = vadd.f32 %v4665_v3, %v1560_v29  ;;  %v1664_v39 = vadd.f32 %v1663_v13, %v1662_v18 }
 0x2d2   : > { %v1787_v63 = vadd.f32 %v1786_v44, %v1785_v34  ;;  %v1675_v2 = vadd.f32 %v1674_v52, %v1673_v31  ;;  %v1680_v30 = vsel %vm1624_vm7, %v4817_v5, 0.0 }
 0x2d3   : > { %v3266_v37 = vpop.f32.mrb[24].mxu0  ;;  %v1665_v46 = vrot.slane %v1664_v39, 1  ;;  %v1678_v43 = vsel %vm1624_vm7, %v4807_v36, 0.0 }
 0x2d4   : > { %v1789_v28 = vadd.f32 %v1788_v7, %v1787_v63  ;;  %v4814_v58 = vadd.f32 %v3266_v37, %v4665_v3  ;;  %v1570_v14 = vpop.f32.mrb[25].mxu0  ;;  %v1677_v33 = vadd.f32 %v1676_v45, %v1675_v2 }
 0x2d5   : > { %v4822_v11 = vadd.f32 %v4665_v3, %v1570_v14  ;;  %v1666_v15 = vadd.f32 %v1665_v46, %v1664_v39 }
 0x2d6   : > { %v1791_v23 = vadd.f32 %v1790_v60, %v1789_v28  ;;  %v1689_v22 = vsel %vm1624_vm7, %v4814_v58, 0.0  ;;  %v1679_v35 = vadd.f32 %v1678_v43, %v1677_v33 }
 0x2d7   : > { %v1688_v56 = vsel %vm1624_vm7, %v4822_v11, 0.0  ;;  %v3269_v20 = vpop.f32.mrb[26].mxu0  ;;  %v1710_v51 = vmul.f32 0.015625, %v1666_v15 }
 0x2d8   : > { %v1792_v48 = vrot.slane %v1791_v23, 4  ;;  %v1690_v19 = vadd.f32 %v1689_v22, %v1688_v56  ;;  %v1580_v10 = vpop.f32.mrb[27].mxu0  ;;  %v1681_v9 = vadd.f32 %v1680_v30, %v1679_v35  ;;  %v4831_v18 = vadd.f32 %v3269_v20, %v4665_v3 }
 0x2d9   : > { %v4834_v42 = vsub.f32 %v4699_v54, %v1710_v51  ;;  %v4837_v34 = vsub.f32 %v4695_v27, %v1710_v51  ;;  %v4840_v44 = vsub.f32 %v4709_v4, %v1710_v51  ;;  %v4843_v8 = vsub.f32 %v4706_v38, %v1710_v51 }
 0x2da   : > { %v1793_v55 = vadd.f32 %v1792_v48, %v1791_v23  ;;  %v4846_v47 = vsub.f32 %v4720_v6, %v1710_v51  ;;  %v4849_v52 = vsub.f32 %v4717_v41, %v1710_v51  ;;  %v4852_v54 = vsub.f32 %v4727_v26, %v1710_v51 }
 0x2db   : > { %v3272_v29 = vpop.f32.mrb[28].mxu0  ;;  %v4855_v27 = vsub.f32 %v4732_v16, %v1710_v51  ;;  %v1753_v4 = vmul.f32 %v4834_v42, %v4834_v42  ;;  %v1754_v38 = vmul.f32 %v4837_v34, %v4837_v34  ;;  %v1755_v6 = vmul.f32 %v4840_v44, %v4840_v44 }
 0x2dc   : > { %v1794_v13 = vrot.slane %v1793_v55, 2  ;;  %v1590_v63 = vpop.f32.mrb[29].mxu0  ;;  %v4864_v41 = vadd.f32 %v4665_v3, %v1580_v10  ;;  %v1756_v26 = vmul.f32 %v4843_v8, %v4843_v8  ;;  %v1757_v45 = vmul.f32 %v4846_v47, %v4846_v47 }
 0x2dd   : > { %v1798_v7 = vsel %vm1624_vm7, %v1753_v4, 0.0  ;;  %v1799_v16 = vsel %vm1624_vm7, %v1754_v38, 0.0  ;;  %v1758_v2 = vmul.f32 %v4849_v52, %v4849_v52  ;;  %v1801_v14 = vsel %vm1624_vm7, %v1755_v6, 0.0 }
 0x2de   : > { %v1795_v31 = vadd.f32 %v1794_v13, %v1793_v55  ;;  %v1800_v37 = vadd.f32 %v1799_v16, %v1798_v7  ;;  %v1693_v46 = vsel %vm1624_vm7, %v4831_v18, 0.0  ;;  %v1682_v33 = vrot.slane %v1681_v9, 4  ;;  %v3058_v16 = vld.sshfl [vmem:[%s415_s12] sm:$0x33 pattern:$0x75316420] }
 0x2df   : > { %v3275_v60 = vpop.f32.mrb[30].mxu0  ;;  %v1691_v22 = vsel %vm1624_vm7, %v4864_v41, 0.0  ;;  %v1803_v15 = vsel %vm1624_vm7, %v1756_v26, 0.0  ;;  %v4881_v20 = vadd.f32 %v3272_v29, %v4665_v3  ;;  %v4884_v48 = vadd.f32 %v4665_v3, %v1590_v63 }
 0x2e0   : > { %v1796_v39 = vrot.slane %v1795_v31, 1  ;;  %v1600_v28 = vpop.f32.mrb[31].mxu0  ;;  %v1802_v23 = vadd.f32 %v1801_v14, %v1800_v37  ;;  %v1692_v56 = vadd.f32 %v1691_v22, %v1690_v19  ;;  %v1683_v51 = vadd.f32 %v1682_v33, %v1681_v9 }
 0x2e1   : > { %v4887_v30 = vadd.f32 %v4665_v3, %v1600_v28  ;;  %v1759_v55 = vmul.f32 %v4852_v54, %v4852_v54  ;;  %v1805_v19 = vsel %vm1624_vm7, %v1757_v45, 0.0  ;;  %v1695_v13 = vsel %vm1624_vm7, %v4884_v48, 0.0 }
 0x2e2   : > { %v1797_v43 = vadd.f32 %v1796_v39, %v1795_v31  ;;  %v1804_v10 = vadd.f32 %v1803_v15, %v1802_v23  ;;  %v1694_v29 = vadd.f32 %v1693_v46, %v1692_v56  ;;  %v1760_v9 = vmul.f32 %v4855_v27, %v4855_v27  ;;  %v1609_v23 = vld [vmem:[%s411_s26] sm:$0xf] }
 0x2e3   : > { %v1684_v38 = vrot.slane %v1683_v51, 2  ;;  %v1807_v6 = vsel %vm1624_vm7, %v1758_v2, 0.0  ;;  %v1697_v31 = vsel %vm1624_vm7, %v4881_v20, 0.0  ;;  %v4904_v7 = vadd.f32 %v3275_v60, %v4665_v3 }
 0x2e4   : > { %v1861_v35 = vmul.f32 0.015625, %v1797_v43  ;;  %v1806_v4 = vadd.f32 %v1805_v19, %v1804_v10  ;;  %v1696_v26 = vadd.f32 %v1695_v13, %v1694_v29  ;;  %v1699_v28 = vsel %vm1624_vm7, %v4887_v30, 0.0 }
 0x2e5   : > { %v1685_v37 = vadd.f32 %v1684_v38, %v1683_v51  ;;  %v1809_v45 = vsel %vm1624_vm7, %v1759_v55, 0.0  ;;  %v1811_v43 = vsel %vm1624_vm7, %v1760_v9, 0.0  ;;  %v4915_v60 = vrot.slane %v3058_v16, %v4112_v50 }
 0x2e6   : > { %v1865_v63 = vadd.f32 1e-05, %v1861_v35  ;;  %v1808_v39 = vadd.f32 %v1807_v6, %v1806_v4  ;;  %v1698_v2 = vadd.f32 %v1697_v31, %v1696_v26  ;;  %v1701_v15 = vsel %vm1624_vm7, %v4904_v7, 0.0 }
 0x2e7   : > { %v1686_v46 = vrot.slane %v1685_v37, 1  ;;  %v1942_v51 = vcombine.high %v3058_v16, %v3058_v16  ;;  %v4919_v55 = vadd.f32 1.0, %v1609_v23  ;;  %v4923_v19 = vrot.slane %v4915_v60, %v4118_v61 }
 0x2e8   : > { %3579 = vrsqrt.f32 %v1865_v63  ;;  %v1810_v14 = vadd.f32 %v1809_v45, %v1808_v39  ;;  %v1700_v3 = vadd.f32 %v1699_v28, %v1698_v2 }
 0x2e9   : > { %v1687_v22 = vadd.f32 %v1686_v46, %v1685_v37  ;;  %v4968_v46 = vrot.slane %v1942_v51, %v4112_v50 }
 0x2ea   : > { %v1812_v33 = vadd.f32 %v1811_v43, %v1810_v14  ;;  %v1702_v56 = vadd.f32 %v1701_v15, %v1700_v3 }
 0x2eb   : > { %v1711_v10 = vmul.f32 0.015625, %v1687_v22 }
 0x2ec   : > { %v1813_v35 = vrot.slane %v1812_v33, 4  ;;  %v1703_v28 = vrot.slane %v1702_v56, 4 }
 0x2ed   : > { %v4926_v13 = vsub.f32 %v4775_v12, %v1711_v10  ;;  %v4929_v63 = vsub.f32 %v4761_v17, %v1711_v10  ;;  %v4932_v9 = vsub.f32 %v4781_v57, %v1711_v10  ;;  %v4935_v4 = vsub.f32 %v4786_v59, %v1711_v10 }
 0x2ee   : > { %v1814_v29 = vadd.f32 %v1813_v35, %v1812_v33  ;;  %v4938_v38 = vsub.f32 %v4789_v24, %v1711_v10  ;;  %v4941_v6 = vsub.f32 %v4800_v25, %v1711_v10  ;;  %v4944_v31 = vsub.f32 %v4807_v36, %v1711_v10 }
 0x2ef   : > { %v4947_v17 = vsub.f32 %v4817_v5, %v1711_v10  ;;  %v1761_v57 = vmul.f32 %v4926_v13, %v4926_v13  ;;  %v1762_v59 = vmul.f32 %v4929_v63, %v4929_v63  ;;  %v1763_v25 = vmul.f32 %v4932_v9, %v4932_v9 }
 0x2f0   : > { %v1815_v26 = vrot.slane %v1814_v29, 2  ;;  %v1764_v36 = vmul.f32 %v4935_v4, %v4935_v4  ;;  %v1765_v16 = vmul.f32 %v4938_v38, %v4938_v38  ;;  %v1766_v5 = vmul.f32 %v4941_v6, %v4941_v6 }
 0x2f1   : > { %v1767_v37 = vmul.f32 %v4944_v31, %v4944_v31  ;;  %v1819_v2 = vsel %vm1624_vm7, %v1761_v57, 0.0  ;;  %v1820_v14 = vsel %vm1624_vm7, %v1762_v59, 0.0  ;;  %v1822_v23 = vsel %vm1624_vm7, %v1763_v25, 0.0 }
 0x2f2   : > { %v3580_v12 = vpop.eup %3579  ;;  %v1816_v39 = vadd.f32 %v1815_v26, %v1814_v29  ;;  %v1821_v3 = vadd.f32 %v1820_v14, %v1819_v2  ;;  %v1824_v33 = vsel %vm1624_vm7, %v1764_v36, 0.0  ;;  %v1826_v15 = vsel %vm1624_vm7, %v1765_v16, 0.0 }
 0x2f3   : > { %v1882_v24 = vmul.f32 %v3580_v12, %v4919_v55  ;;  %v1828_v35 = vsel %vm1624_vm7, %v1766_v5, 0.0  ;;  %v1830_v10 = vsel %vm1624_vm7, %v1767_v37, 0.0  ;;  %v1704_v26 = vadd.f32 %v1703_v28, %v1702_v56 }
 0x2f4   : > { %v1817_v43 = vrot.slane %v1816_v39, 1  ;;  %v1823_v12 = vadd.f32 %v1822_v23, %v1821_v3  ;;  %v1768_v37 = vmul.f32 %v4947_v17, %v4947_v17 }
 0x2f5   : > { %v1889_v45 = vrot.slane %v1882_v24, %v4118_v61  ;;  %v1705_v36 = vrot.slane %v1704_v26, 2 }
 0x2f6   : > { %v1818_v29 = vadd.f32 %v1817_v43, %v1816_v39  ;;  %v1825_v25 = vadd.f32 %v1824_v33, %v1823_v12 }
 0x2f7   : > { %v1908_v22 = vmul.f32 %v1889_v45, %v4750_v53  ;;  %v1905_v50 = vmul.f32 %v1889_v45, %v4744_v0  ;;  %v1904_v51 = vmul.f32 %v1889_v45, %v4741_v21  ;;  %v1907_v57 = vmul.f32 %v1889_v45, %v4748_v62 }
 0x2f8   : > { %v1906_v59 = vmul.f32 %v1889_v45, %v4746_v40  ;;  %v1909_v24 = vmul.f32 %v1889_v45, %v4752_v1  ;;  %v1862_v53 = vmul.f32 0.015625, %v1818_v29  ;;  %v1827_v62 = vadd.f32 %v1826_v15, %v1825_v25 }
 0x2f9   : > { %v4982_v16 = vadd.f32 %v4923_v19, %v1905_v50  ;;  %v4985_v39 = vadd.f32 %v4923_v19, %v1904_v51  ;;  %v4988_v56 = vadd.f32 %v4923_v19, %v1907_v57  ;;  %v1706_v1 = vadd.f32 %v1705_v36, %v1704_v26 }
 0x2fa   : > { %v4991_v21 = vadd.f32 %v4923_v19, %v1906_v59  ;;  %v4994_v0 = vadd.f32 %v4923_v19, %v1909_v24  ;;  %v1866_v40 = vadd.f32 1e-05, %v1862_v53  ;;  %v1829_v43 = vadd.f32 %v1828_v35, %v1827_v62 }
 0x2fb   : > { %v3062_v5 = vmul.f32 -1.442695, %v4982_v16  ;;  %v3061_v28 = vmul.f32 -1.442695, %v4985_v39  ;;  %v3064_v2 = vmul.f32 -1.442695, %v4988_v56  ;;  %v5003_v23 = vadd.f32 %v4923_v19, %v1908_v22 }
 0x2fc   : > { %v3063_v14 = vmul.f32 -1.442695, %v4991_v21  ;;  %3581 = vrsqrt.f32 %v1866_v40  ;;  %v1707_v3 = vrot.slane %v1706_v1, 1  ;;  %v3066_v33 = vmul.f32 -1.442695, %v4994_v0 }
 0x2fd   : > { %3583 = vpow2.f32 %v3062_v5  ;;  %v1902_v15 = vmul.f32 %v1889_v45, %v4735_v32  ;;  %v1903_v29 = vmul.f32 %v1889_v45, %v4738_v49  ;;  %v1831_v12 = vadd.f32 %v1830_v10, %v1829_v43 }
 0x2fe   : > { %v1708_v26 = vadd.f32 %v1707_v3, %v1706_v1  ;;  %3585 = vpow2.f32 %v3061_v28  ;;  %v1832_v50 = vsel %vm1624_vm7, %v1768_v37, 0.0  ;;  %v1875_v22 = vrot.slane %v4919_v55, 1 }
 0x2ff   : > { %3587 = vpow2.f32 %v3064_v2  ;;  %v5010_v51 = vadd.f32 %v4923_v19, %v1902_v15  ;;  %v5013_v35 = vadd.f32 %v4923_v19, %v1903_v29  ;;  %v1833_v57 = vadd.f32 %v1832_v50, %v1831_v12 }
 0x300   : > { %v1712_v59 = vmul.f32 0.015625, %v1708_v26  ;;  %3589 = vpow2.f32 %v3063_v14  ;;  %v5017_v32 = vmul.f32 -1.442695, %v5003_v23  ;;  %v5024_v45 = vrot.slane %v4968_v46, %v4118_v61 }
 0x301   : > { %5720 = vst [vmem:[#allocation5_spill] sm:$0xff] %v5013_v35  ;;  %3591 = vpow2.f32 %v3066_v33  ;;  %v5020_v49 = vmul.f32 -1.442695, %v5010_v51  ;;  %v1834_v10 = vrot.slane %v1833_v57, 4 }
 0x302   : > { %v5027_v19 = vsub.f32 %v4822_v11, %v1712_v59  ;;  %v5030_v24 = vsub.f32 %v4814_v58, %v1712_v59  ;;  %v5033_v53 = vsub.f32 %v4864_v41, %v1712_v59  ;;  %v5036_v25 = vsub.f32 %v4831_v18, %v1712_v59 }
 0x303   : > { %v5039_v36 = vsub.f32 %v4884_v48, %v1712_v59  ;;  %v5042_v40 = vsub.f32 %v4881_v20, %v1712_v59  ;;  %v5045_v62 = vsub.f32 %v4887_v30, %v1712_v59  ;;  %v1835_v11 = vadd.f32 %v1834_v10, %v1833_v57 }
 0x304   : > { %v5048_v1 = vsub.f32 %v4904_v7, %v1712_v59  ;;  %v1769_v58 = vmul.f32 %v5027_v19, %v5027_v19  ;;  %v1770_v18 = vmul.f32 %v5030_v24, %v5030_v24  ;;  %v1771_v41 = vmul.f32 %v5033_v53, %v5033_v53 }
 0x305   : > { %5721 = vst [vmem:[#allocation6_spill] sm:$0xff] %v5039_v36  ;;  %v1772_v20 = vmul.f32 %v5036_v25, %v5036_v25  ;;  %v1773_v48 = vmul.f32 %v5039_v36, %v5039_v36  ;;  %v1774_v30 = vmul.f32 %v5042_v40, %v5042_v40  ;;  %v1836_v5 = vrot.slane %v1835_v11, 2 }
 0x306   : > { %5722 = vst [vmem:[#allocation7_spill] sm:$0xff] %v5048_v1  ;;  %v3582_v7 = vpop.eup %3581  ;;  %v1775_v37 = vmul.f32 %v5045_v62, %v5045_v62  ;;  %v1776_v28 = vmul.f32 %v5048_v1, %v5048_v1  ;;  %v1840_v2 = vsel %vm1624_vm7, %v1769_v58, 0.0  ;;  %v1841_v3 = vsel %vm1624_vm7, %v1770_v18, 0.0 }
 0x307   : > { %v3584_v14 = vpop.eup %3583  ;;  %v1883_v43 = vmul.f32 %v3582_v7, %v1875_v22  ;;  %v1843_v33 = vsel %vm1624_vm7, %v1771_v41, 0.0  ;;  %v1845_v15 = vsel %vm1624_vm7, %v1772_v20, 0.0  ;;  %v1837_v12 = vadd.f32 %v1836_v5, %v1835_v11 }
 0x308   : > { %v3586_v29 = vpop.eup %3585  ;;  %v1842_v26 = vadd.f32 %v1841_v3, %v1840_v2  ;;  %v1847_v50 = vsel %vm1624_vm7, %v1773_v48, 0.0  ;;  %v1849_v57 = vsel %vm1624_vm7, %v1774_v30, 0.0  ;;  %v1851_v58 = vsel %vm1624_vm7, %v1775_v37, 0.0 }
 0x309   : > { %v3588_v59 = vpop.eup %3587  ;;  %v1893_v10 = vrot.slane %v1883_v43, %v4118_v61  ;;  %v1853_v22 = vsel %vm1624_vm7, %v1776_v28, 0.0  ;;  %v2110_v7 = vadd.f32 1.0, %v3584_v14  ;;  %v1838_v35 = vrot.slane %v1837_v12, 1 }
 0x30a   : > { %v3590_v18 = vpop.eup %3589  ;;  %v1844_v41 = vadd.f32 %v1843_v33, %v1842_v26  ;;  %v2109_v1 = vadd.f32 1.0, %v3586_v29  ;;  %v2112_v20 = vadd.f32 1.0, %v3588_v59  ;;  %v1612_v26 = vld [vmem:[%s5676_s7 + $0x8] sm:$0xff] }
 0x30b   : > { %v3592_v36 = vpop.eup %3591  ;;  %v1916_v11 = vmul.f32 %v1893_v10, %v4852_v54  ;;  %3593 = vrcp.f32 %v2110_v7  ;;  %v2111_v48 = vadd.f32 1.0, %v3590_v18  ;;  %v1913_v30 = vmul.f32 %v1893_v10, %v4843_v8  ;;  %v1613_v7 = vld [vmem:[%s5676_s7 + $0x10] sm:$0xff] }
 0x30c   : > { %v1839_v5 = vadd.f32 %v1838_v35, %v1837_v12  ;;  %v1846_v2 = vadd.f32 %v1845_v15, %v1844_v41  ;;  %3595 = vrcp.f32 %v2109_v1  ;;  %v2114_v43 = vadd.f32 1.0, %v3592_v36  ;;  %v1611_v12 = vld [vmem:[%s5676_s7] sm:$0xff] }
 0x30d   : > { %3597 = vrcp.f32 %v2112_v20  ;;  %v5078_v37 = vadd.f32 %v5024_v45, %v1913_v30  ;;  %v1912_v28 = vmul.f32 %v1893_v10, %v4840_v44  ;;  %v1915_v14 = vmul.f32 %v1893_v10, %v4849_v52 }
 0x30e   : > { %v1863_v3 = vmul.f32 0.015625, %v1839_v5  ;;  %v1848_v33 = vadd.f32 %v1847_v50, %v1846_v2  ;;  %3599 = vrcp.f32 %v2111_v48  ;;  %v1914_v54 = vmul.f32 %v1893_v10, %v4846_v47 }
 0x30f   : > { %3601 = vrcp.f32 %v2114_v43  ;;  %v3070_v8 = vmul.f32 -1.442695, %v5078_v37  ;;  %v5085_v35 = vadd.f32 %v5024_v45, %v1912_v28  ;;  %v5088_v36 = vadd.f32 %v5024_v45, %v1915_v14 }
 0x310   : > { %v1867_v1 = vadd.f32 1e-05, %v1863_v3  ;;  %v1850_v15 = vadd.f32 %v1849_v57, %v1848_v33  ;;  %3603 = vpow2.f32 %v5017_v32  ;;  %v5092_v44 = vadd.f32 %v5024_v45, %v1914_v54 }
 0x311   : > { %3605 = vpow2.f32 %v5020_v49  ;;  %v3069_v47 = vmul.f32 -1.442695, %v5085_v35  ;;  %v3072_v52 = vmul.f32 -1.442695, %v5088_v36  ;;  %v1917_v29 = vmul.f32 %v1893_v10, %v4855_v27 }
 0x312   : > { %3607 = vrsqrt.f32 %v1867_v1  ;;  %v1852_v32 = vadd.f32 %v1851_v58, %v1850_v15  ;;  %v3071_v50 = vmul.f32 -1.442695, %v5092_v44  ;;  %v5106_v49 = vadd.f32 %v5024_v45, %v1916_v11  ;;  %v1614_v58 = vld [vmem:[%s5676_s7 + $0x18] sm:$0xff]  ;;  %v1617_v1 = vld [vmem:[%s5676_s7 + $0x30] sm:$0xff] }
 0x313   : > { %3609 = vpow2.f32 %v3070_v8  ;;  %v5109_v57 = vadd.f32 %v5024_v45, %v1917_v29  ;;  %v1911_v27 = vmul.f32 %v1893_v10, %v4837_v34  ;;  %v1910_v59 = vmul.f32 %v1893_v10, %v4834_v42  ;;  %v1615_v10 = vld [vmem:[%s5676_s7 + $0x20] sm:$0xff]  ;;  %v1618_v15 = vld [vmem:[%s5676_s7 + $0x38] sm:$0xff] }
 0x314   : > { %v1854_v18 = vadd.f32 %v1853_v22, %v1852_v32  ;;  %3611 = vpow2.f32 %v3069_v47  ;;  %v3073_v41 = vmul.f32 -1.442695, %v5106_v49  ;;  %v3364_v20 = vpack.c.bf16 %v1612_v26, %v1611_v12  ;;  %v1616_v22 = vld [vmem:[%s5676_s7 + $0x28] sm:$0xff] }
 0x315   : > { %v3594_v11 = vpop.eup %3593  ;;  %3613 = vpow2.f32 %v3072_v52  ;;  %v3074_v48 = vmul.f32 -1.442695, %v5109_v57  ;;  %v5122_v34 = vadd.f32 %v5024_v45, %v1911_v27  ;;  %v5125_v42 = vadd.f32 %v5024_v45, %v1910_v59 }
 0x316   : > { %v3596_v30 = vpop.eup %3595  ;;  %v1855_v5 = vrot.slane %v1854_v18, 4  ;;  %v5134_v2 = vmul.f32 %v3594_v11, %v4982_v16  ;;  %3615 = vpow2.f32 %v3071_v50  ;;  %3388 = vmatprep.subr.bf16.mxu1 %v3364_v20  ;;  %v3368_v43 = vpack.c.bf16 %v1614_v58, %v1613_v7  ;;  %3365 = vmatprep.subr.bf16.mxu0 %v3364_v20 }
 0x317   : > { %v3598_v28 = vpop.eup %3597  ;;  %v5137_v45 = vmul.f32 %v3596_v30, %v4985_v39  ;;  %3617 = vpow2.f32 %v3074_v48  ;;  %v3068_v14 = vmul.f32 -1.442695, %v5122_v34  ;;  %v3067_v3 = vmul.f32 -1.442695, %v5125_v42  ;;  %3394 = vmatpush3.bf16.msra.mxu1 %v3364_v20  ;;  %3367 = vmatpush3.bf16.msra.mxu0 %v3364_v20 }
 0x318   : > { %v3600_v33 = vpop.eup %3599  ;;  %v1856_v54 = vadd.f32 %v1855_v5, %v1854_v18  ;;  %2273 = vrot.lane.b32.xlu1 %v5134_v2, %s3791_s18  ;;  %3619 = vpow2.f32 %v3073_v41  ;;  %3389 = vmatprep.subr.bf16.mxu1 %v3368_v43  ;;  %v3372_v16 = vpack.c.bf16 %v1616_v22, %v1615_v10  ;;  %v1876_v39 = vrot.slane %v4919_v55, 2 }
 0x319   : > { %v3602_v8 = vpop.eup %3601  ;;  %2271 = vrot.lane.b32.xlu0 %v5137_v45, %s3791_s18  ;;  %3369 = vmatprep.subr.bf16.mxu0 %v3368_v43  ;;  %v5153_v29 = vmul.f32 %v3598_v28, %v4988_v56  ;;  %3621 = vpow2.f32 %v3067_v3  ;;  %v5156_v26 = vmul.f32 %v3600_v33, %v4991_v21  ;;  %v1957_v50 = vcombine.high %v4915_v60, %v4915_v60  ;;  %v1619_v60 = vld [vmem:[%s5676_s7 + $0x40] sm:$0xff]  ;;  %v1620_v21 = vld [vmem:[%s5676_s7 + $0x48] sm:$0xff]  ;;  %v1622_v28 = vld [vmem:[%s5676_s7 + $0x58] sm:$0xff] }
 0x31a   : > { %v3604_v47 = vpop.eup %3603  ;;  %v1857_v52 = vrot.slane %v1856_v54, 2  ;;  %3623 = vpow2.f32 %v3068_v14  ;;  %v3376_v56 = vpack.c.bf16 %v1618_v15, %v1617_v1  ;;  %v5171_v11 = vmul.f32 %v3602_v8, %v4994_v0 }
 0x31b   : > { %v3606_v12 = vpop.eup %3605  ;;  %v2113_v32 = vadd.f32 1.0, %v3604_v47  ;;  %3395 = vmatpush3.bf16.msra.mxu1 %v3368_v43  ;;  %3371 = vmatpush3.bf16.msra.mxu0 %v3368_v43  ;;  %v5175_v5 = vrot.slane %v1957_v50, %v4118_v61  ;;  %v1621_v43 = vld [vmem:[%s5676_s7 + $0x50] sm:$0xff]  ;;  %v3380_v33 = vpack.c.bf16 %v1620_v21, %v1619_v60 }
 0x31c   : > { %v3608_v27 = vpop.eup %3607  ;;  %v1858_v59 = vadd.f32 %v1857_v52, %v1856_v54  ;;  %2277 = vrot.lane.b32.xlu1 %v5153_v29, %s3791_s18  ;;  %v2107_v7 = vadd.f32 1.0, %v3606_v12  ;;  %3390 = vmatprep.subr.bf16.mxu1 %v3372_v16  ;;  %v3384_v52 = vpack.c.bf16 %v1622_v28, %v1621_v43 }
 0x31d   : > { %v3610_v58 = vpop.eup %3609  ;;  %v1884_v18 = vmul.f32 %v3608_v27, %v1876_v39  ;;  %2275 = vrot.lane.b32.xlu0 %v5156_v26, %s3791_s18  ;;  %3625 = vrcp.f32 %v2113_v32  ;;  %3373 = vmatprep.subr.bf16.mxu0 %v3372_v16 }
 0x31e   : > { %v3612_v41 = vpop.eup %3611  ;;  %v1859_v20 = vrot.slane %v1858_v59, 1  ;;  %3627 = vrcp.f32 %v2107_v7  ;;  %v2118_v48 = vadd.f32 1.0, %v3610_v58 }
 0x31f   : > { %v3614_v10 = vpop.eup %3613  ;;  %v1897_v22 = vrot.slane %v1884_v18, %v4118_v61  ;;  %v2117_v30 = vadd.f32 1.0, %v3612_v41  ;;  %3396 = vmatpush3.bf16.msra.mxu1 %v3372_v16  ;;  %3375 = vmatpush3.bf16.msra.mxu0 %v3372_v16 }
 0x320   : > { %v3616_v0 = vpop.eup %3615  ;;  %v1860_v14 = vadd.f32 %v1859_v20, %v1858_v59  ;;  %2281 = vrot.lane.b32.xlu1 %v5171_v11, %s3791_s18  ;;  %3629 = vrcp.f32 %v2118_v48  ;;  %v2120_v3 = vadd.f32 1.0, %v3614_v10  ;;  %3391 = vmatprep.subr.bf16.mxu1 %v3376_v56 }
 0x321   : > { %v3618_v54 = vpop.eup %3617  ;;  %v5186_v8 = vmul.f32 %v1897_v22, %v4944_v31  ;;  %3631 = vrcp.f32 %v2117_v30  ;;  %v2119_v39 = vadd.f32 1.0, %v3616_v0  ;;  %v1919_v1 = vmul.f32 %v1897_v22, %v4929_v63  ;;  %3377 = vmatprep.subr.bf16.mxu0 %v3376_v56 }
 0x322   : > { %v3620_v15 = vpop.eup %3619  ;;  %v1864_v16 = vmul.f32 0.015625, %v1860_v14  ;;  %v1918_v47 = vmul.f32 %v1897_v22, %v4926_v13  ;;  %v1921_v50 = vmul.f32 %v1897_v22, %v4935_v4  ;;  %v2122_v59 = vadd.f32 1.0, %v3618_v54 }
 0x323   : > { %3633 = vrcp.f32 %v2119_v39  ;;  %v2121_v12 = vadd.f32 1.0, %v3620_v15  ;;  %v5191_v32 = vadd.f32 %v5175_v5, %v1919_v1  ;;  %3397 = vmatpush3.bf16.msra.mxu1 %v3376_v56  ;;  %3379 = vmatpush3.bf16.msra.mxu0 %v3376_v56  ;;  %v3622_v31 = vpop.eup %3621  ;;  %v1920_v18 = vmul.f32 %v1897_v22, %v4932_v9 }
 0x324   : > { %v1868_v27 = vadd.f32 1e-05, %v1864_v16  ;;  %3635 = vrcp.f32 %v2120_v3  ;;  %v5195_v63 = vadd.f32 %v5175_v5, %v1918_v47  ;;  %3392 = vmatprep.subr.bf16.mxu1 %v3380_v33  ;;  %3381 = vmatprep.subr.bf16.mxu0 %v3380_v33  ;;  %v3624_v13 = vpop.eup %3623  ;;  %v2115_v7 = vadd.f32 1.0, %v3622_v31 }
 0x325   : > { %3637 = vrcp.f32 %v2121_v12  ;;  %v1923_v4 = vmul.f32 %v1897_v22, %v4941_v6  ;;  %v3076_v60 = vmul.f32 -1.442695, %v5191_v32  ;;  %v5202_v21 = vadd.f32 %v5175_v5, %v1921_v50 }
 0x326   : > { %3639 = vrsqrt.f32 %v1868_v27  ;;  %v3075_v58 = vmul.f32 -1.442695, %v5195_v63  ;;  %v1922_v41 = vmul.f32 %v1897_v22, %v4938_v38  ;;  %v1925_v20 = vmul.f32 %v1897_v22, %v4947_v17 }
 0x327   : > { %v3626_v56 = vpop.eup %3625  ;;  %3398 = vmatpush3.bf16.msra.mxu1 %v3380_v33  ;;  %3383 = vmatpush3.bf16.msra.mxu0 %v3380_v33  ;;  %3641 = vrcp.f32 %v2122_v59  ;;  %v2116_v9 = vadd.f32 1.0, %v3624_v13  ;;  %v5210_v6 = vadd.f32 %v5175_v5, %v1920_v18  ;;  %v5228_v28 = vadd.f32 %v5175_v5, %v1923_v4 }
 0x328   : > { %v3628_v48 = vpop.eup %3627  ;;  %v5207_v10 = vmul.f32 %v3626_v56, %v5003_v23  ;;  %3393 = vmatprep.subr.bf16.mxu1 %v3384_v52  ;;  %3385 = vmatprep.subr.bf16.mxu0 %v3384_v52  ;;  %3643 = vrcp.f32 %v2115_v7  ;;  %v5219_v23 = vadd.f32 %v5175_v5, %v1922_v41  ;;  %v1877_v3 = vrot.slane %v4919_v55, 3 }
 0x329   : > { %v5213_v30 = vmul.f32 %v3628_v48, %v5010_v51  ;;  %3645 = vpow2.f32 %v3075_v58  ;;  %v3077_v17 = vmul.f32 -1.442695, %v5210_v6  ;;  %v3078_v51 = vmul.f32 -1.442695, %v5202_v21 }
 0x32a   : > { %v3630_v38 = vpop.eup %3629  ;;  %2279 = vrot.lane.b32.xlu0 %v5207_v10, %s3791_s18  ;;  %3647 = vpow2.f32 %v3076_v60  ;;  %v5239_v54 = vadd.f32 %v5175_v5, %v5186_v8  ;;  %v5245_v55 = vadd.f32 %v5175_v5, %v1925_v20 }
 0x32b   : > { %v3632_v22 = vpop.eup %3631  ;;  %2267 = vrot.lane.b32.xlu1 %v5213_v30, %s3791_s18  ;;  %v5224_v43 = vmul.f32 %v3630_v38, %v5078_v37  ;;  %3399 = vmatpush3.bf16.msra.mxu1 %v3384_v52  ;;  %3649 = vrcp.f32 %v2116_v9  ;;  %v3079_v37 = vmul.f32 -1.442695, %v5219_v23 }
 0x32c   : > { %v5231_v0 = vmul.f32 %v3632_v22, %v5085_v35  ;;  %3387 = vmatpush3.bf16.msra.mxu0 %v3384_v52  ;;  %3651 = vpow2.f32 %v3077_v17  ;;  %v3080_v35 = vmul.f32 -1.442695, %v5228_v28  ;;  %v3081_v52 = vmul.f32 -1.442695, %v5239_v54 }
 0x32d   : > { %v3634_v14 = vpop.eup %3633  ;;  %3653 = vpow2.f32 %v3078_v51 }
 0x32e   : > { %v3636_v33 = vpop.eup %3635  ;;  %2368 = vrot.lane.b32.xlu0 %v5231_v0, %s3790_s16  ;;  %v5248_v15 = vmul.f32 %v3634_v14, %v5092_v44  ;;  %3655 = vpow2.f32 %v3079_v37  ;;  %v3082_v44 = vmul.f32 -1.442695, %v5245_v55 }
 0x32f   : > { %v3638_v39 = vpop.eup %3637  ;;  %2370 = vrot.lane.b32.xlu1 %v5224_v43, %s3790_s16  ;;  %v5251_v47 = vmul.f32 %v3636_v33, %v5088_v36  ;;  %3657 = vpow2.f32 %v3080_v35 }
 0x330   : > { %v3640_v1 = vpop.eup %3639  ;;  %v5261_v36 = vmul.f32 %v3638_v39, %v5106_v49  ;;  %3659 = vpow2.f32 %v3081_v52 }
 0x331   : > { %v1885_v16 = vmul.f32 %v3640_v1, %v1877_v3  ;;  %v3642_v8 = vpop.eup %3641  ;;  %3661 = vpow2.f32 %v3082_v44 }
 0x332   : > { %2372 = vrot.lane.b32.xlu0 %v5248_v15, %s3790_s16  ;;  %v3644_v12 = vpop.eup %3643  ;;  %v5267_v59 = vmul.f32 %v3642_v8, %v5109_v57 }
 0x333   : > { %v1901_v50 = vrot.slane %v1885_v16, %v4118_v61  ;;  %2374 = vrot.lane.b32.xlu1 %v5251_v47, %s3790_s16  ;;  %v3646_v5 = vpop.eup %3645  ;;  %v5278_v4 = vmul.f32 %v3644_v12, %v5125_v42  ;;  %v5723_v42 = vld [vmem:[#allocation6_spill] sm:$0xff] }
 0x334   : > { %v3648_v31 = vpop.eup %3647 }
 0x335   : > { %v5264_v27 = vmul.f32 %v1901_v50, %v5045_v62  ;;  %v1927_v13 = vmul.f32 %v1901_v50, %v5030_v24  ;;  %v1926_v7 = vmul.f32 %v1901_v50, %v5027_v19  ;;  %v3650_v58 = vpop.eup %3649  ;;  %v1929_v18 = vmul.f32 %v1901_v50, %v5036_v25 }
 0x336   : > { %2376 = vrot.lane.b32.xlu0 %v5261_v36, %s3790_s16  ;;  %v1928_v49 = vmul.f32 %v1901_v50, %v5033_v53  ;;  %v2123_v62 = vadd.f32 1.0, %v3646_v5  ;;  %v3652_v57 = vpop.eup %3651  ;;  %v2124_v24 = vadd.f32 1.0, %v3648_v31  ;;  %v5281_v56 = vmul.f32 %v3650_v58, %v5122_v34  ;;  %v5724_v34 = vld [vmem:[#allocation7_spill] sm:$0xff] }
 0x337   : > { %2378 = vrot.lane.b32.xlu1 %v5267_v59, %s3790_s16  ;;  %v3654_v19 = vpop.eup %3653  ;;  %v1958_v53 = vcombine.high %v4968_v46, %v4968_v46  ;;  %v2125_v25 = vadd.f32 1.0, %v3652_v57  ;;  %v1931_v60 = vmul.f32 %v1901_v50, %v5042_v40  ;;  %v1930_v41 = vmul.f32 %v1901_v50, %v5723_v42 }
 0x338   : > { %3663 = vrcp.f32 %v2123_v62  ;;  %v3656_v20 = vpop.eup %3655  ;;  %v2126_v48 = vadd.f32 1.0, %v3654_v19  ;;  %v1933_v9 = vmul.f32 %v1901_v50, %v5724_v34 }
 0x339   : > { %3665 = vrcp.f32 %v2124_v24  ;;  %v3658_v38 = vpop.eup %3657  ;;  %v1974_v46 = vrot.slane %v1958_v53, %v4118_v61  ;;  %v2127_v17 = vadd.f32 1.0, %v3656_v20 }
 0x33a   : > { %2283 = vrot.lane.b32.xlu0 %v5278_v4, %s3791_s18  ;;  %3667 = vrcp.f32 %v2125_v25  ;;  %v3660_v22 = vpop.eup %3659  ;;  %v2128_v40 = vadd.f32 1.0, %v3658_v38 }
 0x33b   : > { %2285 = vrot.lane.b32.xlu1 %v5281_v56, %s3791_s18  ;;  %3669 = vrcp.f32 %v2126_v48  ;;  %v3662_v51 = vpop.eup %3661  ;;  %v5299_v14 = vadd.f32 %v1974_v46, %v1926_v7  ;;  %v2129_v3 = vadd.f32 1.0, %v3660_v22  ;;  %v5303_v61 = vadd.f32 %v1974_v46, %v1927_v13 }
 0x33c   : > { %3671 = vrcp.f32 %v2127_v17  ;;  %v2130_v33 = vadd.f32 1.0, %v3662_v51  ;;  %v5308_v1 = vadd.f32 %v1974_v46, %v1928_v49  ;;  %v5313_v8 = vadd.f32 %v1974_v46, %v1929_v18  ;;  %v5725_v51 = vld [vmem:[#allocation5_spill] sm:$0xff] }
 0x33d   : > { %3673 = vrcp.f32 %v2128_v40  ;;  %v3083_v35 = vmul.f32 -1.442695, %v5299_v14  ;;  %v3084_v16 = vmul.f32 -1.442695, %v5303_v61  ;;  %v5324_v31 = vadd.f32 %v1974_v46, %v1930_v41 }
 0x33e   : > { %2287 = vrot.lane.b32.xlu0 %v5231_v0, %s3791_s18  ;;  %3675 = vrcp.f32 %v2129_v3  ;;  %v3085_v5 = vmul.f32 -1.442695, %v5308_v1  ;;  %v5329_v13 = vadd.f32 %v1974_v46, %v1931_v60  ;;  %v5341_v62 = vadd.f32 %v1974_v46, %v5264_v27 }
 0x33f   : > { %2289 = vrot.lane.b32.xlu1 %v5224_v43, %s3791_s18  ;;  %3677 = vrcp.f32 %v2130_v33  ;;  %v3087_v49 = vmul.f32 -1.442695, %v5324_v31  ;;  %v5346_v57 = vadd.f32 %v1974_v46, %v1933_v9  ;;  %v3060_v3 = vmul.f32 -1.442695, %v5725_v51 }
 0x340   : > { %3679 = vpow2.f32 %v3083_v35  ;;  %v3089_v27 = vmul.f32 -1.442695, %v5341_v62 }
 0x341   : > { %3681 = vpow2.f32 %v3084_v16  ;;  %v3090_v25 = vmul.f32 -1.442695, %v5346_v57 }
 0x342   : > { %2291 = vrot.lane.b32.xlu0 %v5248_v15, %s3791_s18  ;;  %v3664_v37 = vpop.eup %3663  ;;  %3683 = vpow2.f32 %v3085_v5 }
 0x343   : > { %2293 = vrot.lane.b32.xlu1 %v5251_v47, %s3791_s18  ;;  %v3666_v39 = vpop.eup %3665  ;;  %v5316_v52 = vmul.f32 %v3664_v37, %v5195_v63  ;;  %v3086_v63 = vmul.f32 -1.442695, %v5313_v8 }
 0x344   : > { %v3668_v12 = vpop.eup %3667  ;;  %v5319_v50 = vmul.f32 %v3666_v39, %v5191_v32 }
 0x345   : > { %v3670_v44 = vpop.eup %3669  ;;  %v5332_v32 = vmul.f32 %v3668_v12, %v5210_v6  ;;  %3685 = vpow2.f32 %v3086_v63  ;;  %v3088_v6 = vmul.f32 -1.442695, %v5329_v13 }
 0x346   : > { %2295 = vrot.lane.b32.xlu0 %v5261_v36, %s3791_s18  ;;  %v3672_v7 = vpop.eup %3671  ;;  %v5335_v58 = vmul.f32 %v3670_v44, %v5202_v21  ;;  %3687 = vpow2.f32 %v3087_v49 }
 0x347   : > { %2297 = vrot.lane.b32.xlu1 %v5267_v59, %s3791_s18  ;;  %v3674_v18 = vpop.eup %3673  ;;  %v5349_v21 = vmul.f32 %v3672_v7, %v5219_v23  ;;  %3689 = vpow2.f32 %v3088_v6 }
 0x348   : > { %v3676_v24 = vpop.eup %3675  ;;  %v5352_v19 = vmul.f32 %v3674_v18, %v5228_v28  ;;  %3691 = vpow2.f32 %v3089_v27 }
 0x349   : > { %v3678_v53 = vpop.eup %3677  ;;  %v5361_v23 = vmul.f32 %v3676_v24, %v5239_v54  ;;  %3693 = vpow2.f32 %v3090_v25 }
 0x34a   : > { %2380 = vrot.lane.b32.xlu0 %v5316_v52, %s3790_s16  ;;  %v3680_v60 = vpop.eup %3679  ;;  %v5364_v28 = vmul.f32 %v3678_v53, %v5245_v55 }
 0x34b   : > { %2382 = vrot.lane.b32.xlu1 %v5319_v50, %s3790_s16  ;;  %v3682_v42 = vpop.eup %3681  ;;  %v2131_v41 = vadd.f32 1.0, %v3680_v60 }
 0x34c   : > { %v3684_v20 = vpop.eup %3683  ;;  %v2132_v48 = vadd.f32 1.0, %v3682_v42 }
 0x34d   : > { %3695 = vrcp.f32 %v2131_v41  ;;  %v2133_v54 = vadd.f32 1.0, %v3684_v20 }
 0x34e   : > { %2384 = vrot.lane.b32.xlu0 %v5332_v32, %s3790_s16  ;;  %3697 = vrcp.f32 %v2132_v48 }
 0x34f   : > { %2386 = vrot.lane.b32.xlu1 %v5335_v58, %s3790_s16  ;;  %v3686_v34 = vpop.eup %3685  ;;  %3699 = vrcp.f32 %v2133_v54 }
 0x350   : > { %v3688_v55 = vpop.eup %3687  ;;  %v2134_v9 = vadd.f32 1.0, %v3686_v34 }
 0x351   : > { %v3690_v38 = vpop.eup %3689  ;;  %v2135_v46 = vadd.f32 1.0, %v3688_v55 }
 0x352   : > { %2388 = vrot.lane.b32.xlu0 %v5349_v21, %s3790_s16  ;;  %v3692_v17 = vpop.eup %3691  ;;  %3701 = vrcp.f32 %v2134_v9  ;;  %v2136_v22 = vadd.f32 1.0, %v3690_v38 }
 0x353   : > { %2390 = vrot.lane.b32.xlu1 %v5352_v19, %s3790_s16  ;;  %v3694_v40 = vpop.eup %3693  ;;  %3703 = vrcp.f32 %v2135_v46  ;;  %v2137_v33 = vadd.f32 1.0, %v3692_v17 }
 0x354   : > { %3705 = vrcp.f32 %v2136_v22  ;;  %v2138_v37 = vadd.f32 1.0, %v3694_v40 }
 0x355   : > { %3707 = vpow2.f32 %v3060_v3 }
 0x356   : > { %2392 = vrot.lane.b32.xlu0 %v5361_v23, %s3790_s16  ;;  %3709 = vrcp.f32 %v2137_v33 }
 0x357   : > { %2394 = vrot.lane.b32.xlu1 %v5364_v28, %s3790_s16  ;;  %v3696_v39 = vpop.eup %3695  ;;  %3711 = vrcp.f32 %v2138_v37 }
 0x358   : > { %v3698_v35 = vpop.eup %3697  ;;  %v2227_v16 = vmul.f32 %v3696_v39, %v5299_v14 }
 0x359   : > { %v3700_v12 = vpop.eup %3699  ;;  %v2228_v44 = vmul.f32 %v3698_v35, %v5303_v61 }
 0x35a   : > { %2299 = vrot.lane.b32.xlu0 %v5316_v52, %s3791_s18  ;;  %v2229_v63 = vmul.f32 %v3700_v12, %v5308_v1 }
 0x35b   : > { %2301 = vrot.lane.b32.xlu1 %v5319_v50, %s3791_s18 }
 0x35c   : > { %v3702_v5 = vpop.eup %3701 }
 0x35d   : > { %v3704_v7 = vpop.eup %3703  ;;  %v2230_v18 = vmul.f32 %v3702_v5, %v5313_v8 }
 0x35e   : > { %2303 = vrot.lane.b32.xlu0 %v5332_v32, %s3791_s18  ;;  %v3706_v49 = vpop.eup %3705  ;;  %v2231_v6 = vmul.f32 %v3704_v7, %v5324_v31 }
 0x35f   : > { %2305 = vrot.lane.b32.xlu1 %v5335_v58, %s3791_s18  ;;  %v3708_v14 = vpop.eup %3707  ;;  %v2232_v61 = vmul.f32 %v3706_v49, %v5329_v13 }
 0x360   : > { %v3710_v24 = vpop.eup %3709  ;;  %v2108_v27 = vadd.f32 1.0, %v3708_v14 }
 0x361   : > { %v3712_v53 = vpop.eup %3711  ;;  %v2233_v1 = vmul.f32 %v3710_v24, %v5341_v62  ;;  %v5413_v62 = vpop.permute.xlu0 %2412 }
 0x362   : > { %2307 = vrot.lane.b32.xlu0 %v5349_v21, %s3791_s18  ;;  %v2234_v8 = vmul.f32 %v3712_v53, %v5346_v57  ;;  %3713 = vrcp.f32 %v2108_v27 }
 0x363   : > { %2309 = vrot.lane.b32.xlu1 %v5352_v19, %s3791_s18 }
 0x366   : > { %2311 = vrot.lane.b32.xlu0 %v5361_v23, %s3791_s18 }
 0x367   : > { %2313 = vrot.lane.b32.xlu1 %v5364_v28, %s3791_s18 }
 0x36a   : > { %2396 = vrot.lane.b32.xlu0 %v2227_v16, %s3790_s16 }
 0x36b   : > { %2398 = vrot.lane.b32.xlu1 %v2228_v44, %s3790_s16 }
 0x36c   : > { %v3714_v31 = vpop.eup %3713 }
 0x36d   : > { %v2204_v13 = vmul.f32 %v3714_v31, %v5725_v51 }
 0x36e   : > { %2400 = vrot.lane.b32.xlu0 %v2229_v63, %s3790_s16 }
 0x36f   : > { %2402 = vrot.lane.b32.xlu1 %v2230_v18, %s3790_s16 }
 0x372   : > { %2404 = vrot.lane.b32.xlu0 %v2231_v6, %s3790_s16 }
 0x373   : > { %2406 = vrot.lane.b32.xlu1 %v2232_v61, %s3790_s16 }
 0x376   : > { %2408 = vrot.lane.b32.xlu0 %v2233_v1, %s3790_s16 }
 0x377   : > { %2410 = vrot.lane.b32.xlu1 %v2234_v8, %s3790_s16 }
 0x37a   : > { %2315 = vrot.lane.b32.xlu0 %v2227_v16, %s3791_s18 }
 0x37b   : > { %2317 = vrot.lane.b32.xlu1 %v2228_v44, %s3791_s18 }
 0x37e   : > { %2321 = vrot.lane.b32.xlu0 %v2230_v18, %s3791_s18 }
 0x37f   : > { %2319 = vrot.lane.b32.xlu1 %v2229_v63, %s3791_s18 }
 0x382   : > { %2325 = vrot.lane.b32.xlu0 %v2232_v61, %s3791_s18 }
 0x383   : > { %2323 = vrot.lane.b32.xlu1 %v2231_v6, %s3791_s18 }
 0x386   : > { %2327 = vrot.lane.b32.xlu0 %v2233_v1, %s3791_s18 }
 0x387   : > { %2269 = vrot.lane.b32.xlu1 %v2204_v13, %s3791_s18 }
 0x38a   : > { %2329 = vrot.lane.b32.xlu0 %v2234_v8, %s3791_s18  ;;  %v2274_v57 = vpop.permute.xlu1 %2273 }
 0x38b   : > { %2364 = vrot.lane.b32.xlu1 %v5278_v4, %s3790_s16  ;;  %v2272_v25 = vpop.permute.xlu0 %2271  ;;  %v2442_v55 = vsel %vm1624_vm7, 0.0, %v2274_v57 }
 0x38c   : > { %v2441_v34 = vsel %vm1624_vm7, 0.0, %v2272_v25 }
 0x38e   : > { %2366 = vrot.lane.b32.xlu0 %v5281_v56, %s3790_s16  ;;  %v2278_v60 = vpop.permute.xlu1 %2277  ;;  %s3127_s16 = sshll.u32 %s5731_s13, 8 }
 0x38f   : > { %v2276_v42 = vpop.permute.xlu0 %2275  ;;  %v2444_v40 = vsel %vm1624_vm7, 0.0, %v2278_v60  ;;  %s5558_s26 = scalar_lea.vmem %s5678_s9, %s3127_s16 }
 0x390   : > { %v2443_v17 = vsel %vm1624_vm7, 0.0, %v2276_v42 }
 0x392   : > { %v2282_v41 = vpop.permute.xlu1 %2281 }
 0x393   : > { %v2446_v35 = vsel %vm1624_vm7, 0.0, %v2282_v41 }
 0x39c   : > { %v2280_v20 = vpop.permute.xlu0 %2279 }
 0x39d   : > { %v5419_v48 = vpop.permute.xlu1 %2267  ;;  %v2445_v37 = vsel %vm1624_vm7, 0.0, %v2280_v20 }
 0x3a0   : > { %v2369_v54 = vpop.permute.xlu0 %2368 }
 0x3a1   : > { %v2371_v9 = vpop.permute.xlu1 %2370  ;;  %v2473_v38 = vsel %vm464_vm0, %v2441_v34, %v2369_v54 }
 0x3a2   : > { %v2474_v46 = vsel %vm464_vm0, %v2442_v55, %v2371_v9  ;;  %3303 = vmatprep.mubr.msk.f32.mxu1 %vm2509_vm8, %v2473_v38 }
 0x3a3   : > { %3304 = vmatmul.mubr.msk.f32.vlgmr.msra.gmra.mrb[0].mxu1 %vm2509_vm8, %v2474_v46 }
 0x3a4   : > { %v2373_v22 = vpop.permute.xlu0 %2372 }
 0x3a5   : > { %v2375_v51 = vpop.permute.xlu1 %2374  ;;  %v2475_v3 = vsel %vm464_vm0, %v2443_v17, %v2373_v22 }
 0x3a6   : > { %v2476_v33 = vsel %vm464_vm0, %v2444_v40, %v2375_v51  ;;  %3306 = vmatprep.mubr.msk.f32.mxu1 %vm2509_vm8, %v2475_v3 }
 0x3a7   : > { %3307 = vmatmul.mubr.msk.f32.gmra.mrb[2].mxu1 %vm2509_vm8, %v2476_v33 }
 0x3a8   : > { %v2377_v39 = vpop.permute.xlu0 %2376 }
 0x3a9   : > { %v2379_v16 = vpop.permute.xlu1 %2378  ;;  %v2477_v12 = vsel %vm464_vm0, %v2445_v37, %v2377_v39 }
 0x3aa   : > { %v2478_v44 = vsel %vm464_vm0, %v2446_v35, %v2379_v16  ;;  %3309 = vmatprep.mubr.msk.f32.mxu1 %vm2509_vm8, %v2477_v12 }
 0x3ab   : > { %3310 = vmatmul.mubr.msk.f32.gmra.mrb[4].mxu1 %vm2509_vm8, %v2478_v44 }
 0x3ac   : > { %v2284_v5 = vpop.permute.xlu0 %2283 }
 0x3ad   : > { %v2286_v63 = vpop.permute.xlu1 %2285  ;;  %v2447_v61 = vsel %vm1624_vm7, %v5213_v30, %v2284_v5 }
 0x3ae   : > { %v2448_v1 = vsel %vm1624_vm7, %v2204_v13, %v2286_v63 }
 0x3b0   : > { %v2288_v7 = vpop.permute.xlu0 %2287 }
 0x3b1   : > { %v2290_v18 = vpop.permute.xlu1 %2289  ;;  %v2449_v57 = vsel %vm1624_vm7, %v5137_v45, %v2288_v7 }
 0x3b2   : > { %v2450_v60 = vsel %vm1624_vm7, %v5134_v2, %v2290_v18 }
 0x3b4   : > { %v2292_v49 = vpop.permute.xlu0 %2291 }
 0x3b5   : > { %v2294_v14 = vpop.permute.xlu1 %2293  ;;  %v2451_v41 = vsel %vm1624_vm7, %v5156_v26, %v2292_v49 }
 0x3b6   : > { %v2452_v45 = vsel %vm1624_vm7, %v5153_v29, %v2294_v14 }
 0x3b8   : > { %v2296_v6 = vpop.permute.xlu0 %2295 }
 0x3b9   : > { %v2298_v24 = vpop.permute.xlu1 %2297  ;;  %v2453_v55 = vsel %vm1624_vm7, %v5207_v10, %v2296_v6 }
 0x3ba   : > { %v2454_v26 = vsel %vm1624_vm7, %v5171_v11, %v2298_v24 }
 0x3bc   : > { %v2381_v53 = vpop.permute.xlu0 %2380 }
 0x3bd   : > { %v2383_v27 = vpop.permute.xlu1 %2382  ;;  %v2479_v8 = vsel %vm464_vm0, %v2447_v61, %v2381_v53 }
 0x3be   : > { %v2480_v31 = vsel %vm464_vm0, %v2448_v1, %v2383_v27  ;;  %3312 = vmatprep.mubr.msk.f32.mxu1 %vm2509_vm8, %v2479_v8 }
 0x3bf   : > { %3313 = vmatmul.mubr.msk.f32.gmra.mrb[6].mxu1 %vm2509_vm8, %v2480_v31 }
 0x3c0   : > { %v2385_v25 = vpop.permute.xlu0 %2384 }
 0x3c1   : > { %v2387_v30 = vpop.permute.xlu1 %2386  ;;  %v2481_v42 = vsel %vm464_vm0, %v2449_v57, %v2385_v25 }
 0x3c2   : > { %v2482_v13 = vsel %vm464_vm0, %v2450_v60, %v2387_v30  ;;  %3315 = vmatprep.mubr.msk.f32.mxu1 %vm2509_vm8, %v2481_v42 }
 0x3c3   : > { %3316 = vmatmul.mubr.msk.f32.gmra.mrb[8].mxu1 %vm2509_vm8, %v2482_v13 }
 0x3c4   : > { %v2389_v20 = vpop.permute.xlu0 %2388 }
 0x3c5   : > { %v2391_v34 = vpop.permute.xlu1 %2390  ;;  %v2483_v54 = vsel %vm464_vm0, %v2451_v41, %v2389_v20 }
 0x3c6   : > { %v2484_v2 = vsel %vm464_vm0, %v2452_v45, %v2391_v34  ;;  %3318 = vmatprep.mubr.msk.f32.mxu1 %vm2509_vm8, %v2483_v54 }
 0x3c7   : > { %3319 = vmatmul.mubr.msk.f32.gmra.mrb[10].mxu1 %vm2509_vm8, %v2484_v2 }
 0x3c8   : > { %v2393_v9 = vpop.permute.xlu0 %2392 }
 0x3c9   : > { %v2395_v38 = vpop.permute.xlu1 %2394  ;;  %v2485_v46 = vsel %vm464_vm0, %v2453_v55, %v2393_v9  ;;  %v2439_v9 = vsel %vm1624_vm7, 0.0, %v5419_v48 }
 0x3ca   : > { %v2486_v29 = vsel %vm464_vm0, %v2454_v26, %v2395_v38  ;;  %3321 = vmatprep.mubr.msk.f32.mxu1 %vm2509_vm8, %v2485_v46 }
 0x3cb   : > { %3322 = vmatmul.mubr.msk.f32.gmra.mrb[12].mxu1 %vm2509_vm8, %v2486_v29 }
 0x3cc   : > { %v2300_v17 = vpop.permute.xlu0 %2299 }
 0x3cd   : > { %v2302_v22 = vpop.permute.xlu1 %2301  ;;  %v2455_v11 = vsel %vm1624_vm7, %v5278_v4, %v2300_v17 }
 0x3ce   : > { %v2456_v35 = vsel %vm1624_vm7, %v5281_v56, %v2302_v22 }
 0x3d0   : > { %v2304_v40 = vpop.permute.xlu0 %2303 }
 0x3d1   : > { %v2306_v51 = vpop.permute.xlu1 %2305  ;;  %v2457_v5 = vsel %vm1624_vm7, %v5231_v0, %v2304_v40 }
 0x3d2   : > { %v2458_v4 = vsel %vm1624_vm7, %v5224_v43, %v2306_v51 }
 0x3d4   : > { %v2308_v3 = vpop.permute.xlu0 %2307 }
 0x3d5   : > { %v2310_v33 = vpop.permute.xlu1 %2309  ;;  %v2459_v49 = vsel %vm1624_vm7, %v5248_v15, %v2308_v3 }
 0x3d6   : > { %v2460_v0 = vsel %vm1624_vm7, %v5251_v47, %v2310_v33 }
 0x3d8   : > { %v2312_v10 = vpop.permute.xlu0 %2311 }
 0x3d9   : > { %v2314_v37 = vpop.permute.xlu1 %2313  ;;  %v2461_v61 = vsel %vm1624_vm7, %v5261_v36, %v2312_v10 }
 0x3da   : > { %v2462_v15 = vsel %vm1624_vm7, %v5267_v59, %v2314_v37 }
 0x3dc   : > { %v2397_v39 = vpop.permute.xlu0 %2396 }
 0x3dd   : > { %v2399_v16 = vpop.permute.xlu1 %2398  ;;  %v2487_v12 = vsel %vm464_vm0, %v2455_v11, %v2397_v39 }
 0x3de   : > { %v2488_v44 = vsel %vm464_vm0, %v2456_v35, %v2399_v16  ;;  %3324 = vmatprep.mubr.msk.f32.mxu1 %vm2509_vm8, %v2487_v12 }
 0x3df   : > { %3325 = vmatmul.mubr.msk.f32.gmra.mrb[14].mxu1 %vm2509_vm8, %v2488_v44 }
 0x3e0   : > { %v2401_v63 = vpop.permute.xlu0 %2400 }
 0x3e1   : > { %v2403_v7 = vpop.permute.xlu1 %2402  ;;  %v2489_v18 = vsel %vm464_vm0, %v2457_v5, %v2401_v63 }
 0x3e2   : > { %v2490_v56 = vsel %vm464_vm0, %v2458_v4, %v2403_v7  ;;  %3327 = vmatprep.mubr.msk.f32.mxu1 %vm2509_vm8, %v2489_v18 }
 0x3e3   : > { %3328 = vmatmul.mubr.msk.f32.gmra.mrb[16].mxu1 %vm2509_vm8, %v2490_v56 }
 0x3e4   : > { %v2405_v14 = vpop.permute.xlu0 %2404 }
 0x3e5   : > { %v2407_v6 = vpop.permute.xlu1 %2406  ;;  %v2491_v24 = vsel %vm464_vm0, %v2459_v49, %v2405_v14 }
 0x3e6   : > { %v2492_v43 = vsel %vm464_vm0, %v2460_v0, %v2407_v6  ;;  %3330 = vmatprep.mubr.msk.f32.mxu1 %vm2509_vm8, %v2491_v24 }
 0x3e7   : > { %3331 = vmatmul.mubr.msk.f32.gmra.mrb[18].mxu1 %vm2509_vm8, %v2492_v43 }
 0x3e8   : > { %v2409_v53 = vpop.permute.xlu0 %2408 }
 0x3e9   : > { %v2411_v1 = vpop.permute.xlu1 %2410  ;;  %v2493_v27 = vsel %vm464_vm0, %v2461_v61, %v2409_v53 }
 0x3ea   : > { %v2494_v47 = vsel %vm464_vm0, %v2462_v15, %v2411_v1  ;;  %3333 = vmatprep.mubr.msk.f32.mxu1 %vm2509_vm8, %v2493_v27 }
 0x3eb   : > { %3334 = vmatmul.mubr.msk.f32.gmra.mrb[20].mxu1 %vm2509_vm8, %v2494_v47 }
 0x3ec   : > { %v2316_v8 = vpop.permute.xlu0 %2315 }
 0x3ed   : > { %v2318_v31 = vpop.permute.xlu1 %2317  ;;  %v2463_v57 = vsel %vm1624_vm7, %v5316_v52, %v2316_v8 }
 0x3ee   : > { %v2464_v36 = vsel %vm1624_vm7, %v5319_v50, %v2318_v31  ;;  %v2495_v59 = vsel %vm464_vm0, %v2463_v57, %v5413_v62 }
 0x3ef   : > { %3336 = vmatprep.mubr.msk.f32.mxu1 %vm2509_vm8, %v2495_v59  ;;  %v2496_v25 = vsel %vm464_vm0, %v2464_v36, %v5413_v62 }
 0x3f0   : > { %3337 = vmatmul.mubr.msk.f32.gmra.mrb[22].mxu1 %vm2509_vm8, %v2496_v25  ;;  %v2322_v60 = vpop.permute.xlu0 %2321 }
 0x3f1   : > { %v2320_v30 = vpop.permute.xlu1 %2319  ;;  %v2466_v42 = vsel %vm1624_vm7, %v5335_v58, %v2322_v60 }
 0x3f2   : > { %v2465_v52 = vsel %vm1624_vm7, %v5332_v32, %v2320_v30  ;;  %v2498_v50 = vsel %vm464_vm0, %v2466_v42, %v5413_v62 }
 0x3f3   : > { %v2497_v13 = vsel %vm464_vm0, %v2465_v52, %v5413_v62 }
 0x3f4   : > { %3339 = vmatprep.mubr.msk.f32.mxu1 %vm2509_vm8, %v2497_v13  ;;  %v2326_v41 = vpop.permute.xlu0 %2325 }
 0x3f5   : > { %v2324_v20 = vpop.permute.xlu1 %2323  ;;  %3340 = vmatmul.mubr.msk.f32.gmra.mrb[24].mxu1 %vm2509_vm8, %v2498_v50  ;;  %v2468_v45 = vsel %vm1624_vm7, %v5352_v19, %v2326_v41 }
 0x3f6   : > { %v2467_v58 = vsel %vm1624_vm7, %v5349_v21, %v2324_v20  ;;  %v2500_v32 = vsel %vm464_vm0, %v2468_v45, %v5413_v62 }
 0x3f7   : > { %v2499_v34 = vsel %vm464_vm0, %v2467_v58, %v5413_v62 }
 0x3f8   : > { %3342 = vmatprep.mubr.msk.f32.mxu1 %vm2509_vm8, %v2499_v34  ;;  %v2328_v54 = vpop.permute.xlu0 %2327 }
 0x3f9   : > { %v2270_v2 = vpop.permute.xlu1 %2269  ;;  %3343 = vmatmul.mubr.msk.f32.gmra.mrb[26].mxu1 %vm2509_vm8, %v2500_v32  ;;  %v2469_v55 = vsel %vm1624_vm7, %v5361_v23, %v2328_v54 }
 0x3fa   : > { %v2501_v19 = vsel %vm464_vm0, %v2469_v55, %v5413_v62  ;;  %v2440_v23 = vsel %vm1624_vm7, 0.0, %v2270_v2 }
 0x3fb   : > { %3345 = vmatprep.mubr.msk.f32.mxu1 %vm2509_vm8, %v2501_v19 }
 0x3fc   : > { %v2330_v21 = vpop.permute.xlu0 %2329 }
 0x3fd   : > { %v2365_v26 = vpop.permute.xlu1 %2364  ;;  %v2470_v38 = vsel %vm1624_vm7, %v5364_v28, %v2330_v21  ;;  %v5553_v28 = vld [vmem:[%s5677_s8] ss:$0 sm:$0xff] }
 0x3fe   : > { %v2471_v46 = vsel %vm464_vm0, %v2439_v9, %v2365_v26  ;;  %v2502_v29 = vsel %vm464_vm0, %v2470_v38, %v5413_v62 }
 0x3ff   : > { %3300 = vmatprep.mubr.msk.f32.mxu0 %vm2509_vm8, %v2471_v46  ;;  %3346 = vmatmul.mubr.msk.f32.gmra.mrb[28].mxu1 %vm2509_vm8, %v2502_v29 }
 0x400   : > { %v2367_v17 = vpop.permute.xlu0 %2366 }
 0x401   : > { %v2472_v22 = vsel %vm464_vm0, %v2440_v23, %v2367_v17 }
 0x402   : > { %3301 = vmatmul.mubr.msk.f32.vlgmr.msra.gmra.mrb[32].mxu0 %vm2509_vm8, %v2472_v22 }
 0x476   : > { %v3305_v62 = vpop.f32.mrb[0].mxu1 }
 0x477   : > { %v2688_v48 = vadd.f32 %v3305_v62, %v5553_v28  ;;  %v2682_v40 = vpop.f32.mrb[1].mxu1 }
 0x478   : > { %v2683_v51 = vadd.f32 %v5553_v28, %v2682_v40 }
 0x479   : > { %2834 = vst.msk [vmem:[%s5558_s26 + $0x18] sm:$0xff] %vm1624_vm7, %v2688_v48 }
 0x47a   : > { %2833 = vst.msk [vmem:[%s5558_s26 + $0x10] sm:$0xff] %vm1624_vm7, %v2683_v51  ;;  %v3308_v3 = vpop.f32.mrb[2].mxu1 }
 0x47b   : > { %v2698_v33 = vadd.f32 %v3308_v3, %v5553_v28  ;;  %v2692_v10 = vpop.f32.mrb[3].mxu1 }
 0x47c   : > { %v2693_v37 = vadd.f32 %v5553_v28, %v2692_v10 }
 0x47d   : > { %2836 = vst.msk [vmem:[%s5558_s26 + $0x28] sm:$0xff] %vm1624_vm7, %v2698_v33 }
 0x47e   : > { %2835 = vst.msk [vmem:[%s5558_s26 + $0x20] sm:$0xff] %vm1624_vm7, %v2693_v37  ;;  %v3311_v11 = vpop.f32.mrb[4].mxu1 }
 0x47f   : > { %v2708_v39 = vadd.f32 %v3311_v11, %v5553_v28  ;;  %v2702_v35 = vpop.f32.mrb[5].mxu1 }
 0x480   : > { %v2703_v16 = vadd.f32 %v5553_v28, %v2702_v35 }
 0x481   : > { %2838 = vst.msk [vmem:[%s5558_s26 + $0x38] sm:$0xff] %vm1624_vm7, %v2708_v39 }
 0x482   : > { %2837 = vst.msk [vmem:[%s5558_s26 + $0x30] sm:$0xff] %vm1624_vm7, %v2703_v16 }
 0x492   : > { %v3314_v12 = vpop.f32.mrb[6].mxu1 }
 0x493   : > { %v2718_v44 = vadd.f32 %v3314_v12, %v5553_v28  ;;  %v2712_v5 = vpop.f32.mrb[7].mxu1 }
 0x494   : > { %v2713_v63 = vadd.f32 %v5553_v28, %v2712_v5 }
 0x495   : > { %2840 = vst.msk [vmem:[%s5558_s26 + $0x48] sm:$0xff] %vm1624_vm7, %v2718_v44 }
 0x496   : > { %2839 = vst.msk [vmem:[%s5558_s26 + $0x40] sm:$0xff] %vm1624_vm7, %v2713_v63  ;;  %v3317_v4 = vpop.f32.mrb[8].mxu1 }
 0x497   : > { %v2728_v7 = vadd.f32 %v3317_v4, %v5553_v28  ;;  %v2722_v18 = vpop.f32.mrb[9].mxu1 }
 0x498   : > { %v2723_v56 = vadd.f32 %v5553_v28, %v2722_v18 }
 0x499   : > { %2842 = vst.msk [vmem:[%s5558_s26 + $0x58] sm:$0xff] %vm1624_vm7, %v2728_v7 }
 0x49a   : > { %2841 = vst.msk [vmem:[%s5558_s26 + $0x50] sm:$0xff] %vm1624_vm7, %v2723_v56  ;;  %v3320_v49 = vpop.f32.mrb[10].mxu1 }
 0x49b   : > { %v2738_v14 = vadd.f32 %v3320_v49, %v5553_v28  ;;  %v2732_v0 = vpop.f32.mrb[11].mxu1 }
 0x49c   : > { %v2733_v6 = vadd.f32 %v5553_v28, %v2732_v0 }
 0x49d   : > { %2844 = vst.msk [vmem:[%s5558_s26 + $0x68] sm:$0xff] %vm1624_vm7, %v2738_v14 }
 0x49e   : > { %2843 = vst.msk [vmem:[%s5558_s26 + $0x60] sm:$0xff] %vm1624_vm7, %v2733_v6  ;;  %v3323_v24 = vpop.f32.mrb[12].mxu1 }
 0x49f   : > { %v2748_v43 = vadd.f32 %v3323_v24, %v5553_v28  ;;  %v2742_v61 = vpop.f32.mrb[13].mxu1 }
 0x4a0   : > { %v2743_v53 = vadd.f32 %v5553_v28, %v2742_v61 }
 0x4a1   : > { %2846 = vst.msk [vmem:[%s5558_s26 + $0x78] sm:$0xff] %vm1624_vm7, %v2748_v43 }
 0x4a2   : > { %2845 = vst.msk [vmem:[%s5558_s26 + $0x70] sm:$0xff] %vm1624_vm7, %v2743_v53 }
 0x4b2   : > { %v3326_v15 = vpop.f32.mrb[14].mxu1 }
 0x4b3   : > { %v2758_v1 = vadd.f32 %v3326_v15, %v5553_v28  ;;  %v2752_v27 = vpop.f32.mrb[15].mxu1 }
 0x4b4   : > { %v2753_v47 = vadd.f32 %v5553_v28, %v2752_v27 }
 0x4b5   : > { %2848 = vst.msk [vmem:[%s5558_s26 + $0x88] sm:$0xff] %vm1624_vm7, %v2758_v1 }
 0x4b6   : > { %2847 = vst.msk [vmem:[%s5558_s26 + $0x80] sm:$0xff] %vm1624_vm7, %v2753_v47  ;;  %v3329_v8 = vpop.f32.mrb[16].mxu1 }
 0x4b7   : > { %v2768_v31 = vadd.f32 %v3329_v8, %v5553_v28  ;;  %v2762_v57 = vpop.f32.mrb[17].mxu1 }
 0x4b8   : > { %v2763_v36 = vadd.f32 %v5553_v28, %v2762_v57 }
 0x4b9   : > { %2850 = vst.msk [vmem:[%s5558_s26 + $0x98] sm:$0xff] %vm1624_vm7, %v2768_v31 }
 0x4ba   : > { %2849 = vst.msk [vmem:[%s5558_s26 + $0x90] sm:$0xff] %vm1624_vm7, %v2763_v36  ;;  %v3332_v59 = vpop.f32.mrb[18].mxu1 }
 0x4bb   : > { %v2778_v25 = vadd.f32 %v3332_v59, %v5553_v28  ;;  %v2772_v60 = vpop.f32.mrb[19].mxu1 }
 0x4bc   : > { %v2773_v30 = vadd.f32 %v5553_v28, %v2772_v60 }
 0x4bd   : > { %2852 = vst.msk [vmem:[%s5558_s26 + $0xa8] sm:$0xff] %vm1624_vm7, %v2778_v25 }
 0x4be   : > { %2851 = vst.msk [vmem:[%s5558_s26 + $0xa0] sm:$0xff] %vm1624_vm7, %v2773_v30  ;;  %v3335_v42 = vpop.f32.mrb[20].mxu1 }
 0x4bf   : > { %v2788_v52 = vadd.f32 %v3335_v42, %v5553_v28  ;;  %v2782_v50 = vpop.f32.mrb[21].mxu1 }
 0x4c0   : > { %v2783_v13 = vadd.f32 %v5553_v28, %v2782_v50 }
 0x4c1   : > { %2854 = vst.msk [vmem:[%s5558_s26 + $0xb8] sm:$0xff] %vm1624_vm7, %v2788_v52 }
 0x4c2   : > { %2853 = vst.msk [vmem:[%s5558_s26 + $0xb0] sm:$0xff] %vm1624_vm7, %v2783_v13 }
 0x4c3   : > { %v3338_v41 = vpop.f32.mrb[22].mxu1 }
 0x4c4   : > { %v2798_v20 = vadd.f32 %v3338_v41, %v5553_v28  ;;  %v2792_v45 = vpop.f32.mrb[23].mxu1 }
 0x4c5   : > { %v2793_v58 = vadd.f32 %v5553_v28, %v2792_v45 }
 0x4c6   : > { %2856 = vst.msk [vmem:[%s5558_s26 + $0xc8] sm:$0xff] %vm1624_vm7, %v2798_v20 }
 0x4c7   : > { %2855 = vst.msk [vmem:[%s5558_s26 + $0xc0] sm:$0xff] %vm1624_vm7, %v2793_v58 }
 0x4c8   : > { %v3341_v32 = vpop.f32.mrb[24].mxu1 }
 0x4c9   : > { %v2808_v34 = vadd.f32 %v3341_v32, %v5553_v28  ;;  %v2802_v54 = vpop.f32.mrb[25].mxu1 }
 0x4ca   : > { %v2803_v2 = vadd.f32 %v5553_v28, %v2802_v54 }
 0x4cb   : > { %2858 = vst.msk [vmem:[%s5558_s26 + $0xd8] sm:$0xff] %vm1624_vm7, %v2808_v34 }
 0x4cc   : > { %2857 = vst.msk [vmem:[%s5558_s26 + $0xd0] sm:$0xff] %vm1624_vm7, %v2803_v2  ;;  %v3344_v55 = vpop.f32.mrb[26].mxu1 }
 0x4cd   : > { %v2818_v19 = vadd.f32 %v3344_v55, %v5553_v28  ;;  %v2812_v21 = vpop.f32.mrb[27].mxu1 }
 0x4ce   : > { %v2813_v9 = vadd.f32 %v5553_v28, %v2812_v21 }
 0x4cf   : > { %2860 = vst.msk [vmem:[%s5558_s26 + $0xe8] sm:$0xff] %vm1624_vm7, %v2818_v19 }
 0x4d0   : > { %2859 = vst.msk [vmem:[%s5558_s26 + $0xe0] sm:$0xff] %vm1624_vm7, %v2813_v9 }
 0x4d2   : > { %v3347_v26 = vpop.f32.mrb[28].mxu1 }
 0x4d3   : > { %v2828_v38 = vadd.f32 %v3347_v26, %v5553_v28  ;;  %v2822_v46 = vpop.f32.mrb[29].mxu1 }
 0x4d4   : > { %v2823_v29 = vadd.f32 %v5553_v28, %v2822_v46 }
 0x4d5   : > { %2862 = vst.msk [vmem:[%s5558_s26 + $0xf8] sm:$0xff] %vm1624_vm7, %v2828_v38  ;;  %v3302_v23 = vpop.f32.mrb[32].mxu0 }
 0x4d6   : > { %2861 = vst.msk [vmem:[%s5558_s26 + $0xf0] sm:$0xff] %vm1624_vm7, %v2823_v29  ;;  %v2678_v17 = vadd.f32 %v3302_v23, %v5553_v28  ;;  %v2672_v22 = vpop.f32.mrb[33].mxu0 }
 0x4d7   : > { %v2673_v62 = vadd.f32 %v5553_v28, %v2672_v22 }
 0x4d8   : > { %2832 = vst.msk [vmem:[%s5558_s26 + $0x8] sm:$0xff] %vm1624_vm7, %v2678_v17 }
 0x4d9   : > { %2831 = vst.msk [vmem:[%s5558_s26] sm:$0xff] %vm1624_vm7, %v2673_v62 }
 0x4da PF: > { %p19_p8 = scmp.ge.s32.totalorder %s3864_s14, 4   ;;  %s5726_s30 = smov %s3771_s10 }
 0x4db   : > { %s5727_s10 = smov %s3775_s11  ;;  %s5728_s11 = smov %s3874_s17 }
 0x4dc   : > { %s5729_s12 = smov %s3864_s14  ;;  %21 = sbr.rel (!%p19_p8) target bundleno = 3 (0x3), region = 108 }
 0x4e3   :  { %2884 = vsyncpa [#allocation3], 1 }
 0x4e4   :  { %2886 = vsyncpa [#allocation3 + $0x1], 1 }

</bundles_post_ra>
